<compile_context>
chip_gen: v5e
topology: v5e:2x2
jax: 0.10.0
libtpu: 0.0.40
codegen_flags: <defaults>
</compile_context>

<pallas_src>
import numpy as np
import jax
import jax.numpy as jnp
from jax.experimental import pallas as pl
from jax.experimental.pallas import tpu as pltpu


# ---------------------------------------------------------------------------
# Fused forward kernel: one batch tile (BT images) per grid step, all in VMEM.
# ---------------------------------------------------------------------------
def _dog_kernel(x_ref, m1_ref, b1_ref, m2_ref, b2_ref,
                wf1_ref, bf1_ref, wf2_ref, bf2_ref, wf3_ref, bf3_ref,
                o_ref):
    f32 = jnp.float32
    bf16 = jnp.bfloat16

    x = x_ref[...].astype(bf16)                              # (BT, 28, 28)
    bt = x.shape[0]

    # ---- conv1 (1->6, 5x5, valid) + ReLU: 5 banded matmuls, f32 accumulation.
    # Output lane for (ow, co): (ow & 1) * 128 + (ow >> 1) * 6 + co.
    c1 = jnp.dot(x[:, 0:24, :].reshape(bt * 24, 28), m1_ref[0],
                 preferred_element_type=f32)
    for i in range(1, 5):
        c1 = c1 + jnp.dot(x[:, i:i + 24, :].reshape(bt * 24, 28), m1_ref[i],
                          preferred_element_type=f32)
    c1 = jnp.maximum(c1 + b1_ref[...], 0.0).reshape(bt, 24, 256)

    # ---- maxpool1 2x2: width = one vreg-aligned half-max, height = 12 row pairs.
    wp1 = jnp.maximum(c1[:, :, 0:72], c1[:, :, 128:200])     # (BT, 24, 72)
    a1 = jnp.concatenate(
        [jnp.maximum(wp1[:, 2 * h:2 * h + 1, :], wp1[:, 2 * h + 1:2 * h + 2, :])
         for h in range(12)], axis=1).astype(bf16)           # (BT, 12, 72), lane=(w,ci)

    # ---- conv2 (6->16, 5x5, valid) + ReLU: 5 banded matmuls.
    # Output lane for (ow, co): (ow & 1) * 128 + (ow >> 1) * 16 + co.
    c2 = jnp.dot(a1[:, 0:8, :].reshape(bt * 8, 72), m2_ref[0],
                 preferred_element_type=f32)
    for i in range(1, 5):
        c2 = c2 + jnp.dot(a1[:, i:i + 8, :].reshape(bt * 8, 72), m2_ref[i],
                          preferred_element_type=f32)
    c2 = jnp.maximum(c2 + b2_ref[...], 0.0).reshape(bt, 8, 256)

    # ---- maxpool2 2x2 + flatten: width half-max; the 4 row-pair maxes concat
    # directly along lanes -> flattened (h, w, c) fc1 input at 64-aligned offsets.
    wp2 = jnp.maximum(c2[:, :, 0:64], c2[:, :, 128:192])     # (BT, 8, 64)
    f = jnp.concatenate(
        [jnp.maximum(wp2[:, 2 * h:2 * h + 1, :], wp2[:, 2 * h + 1:2 * h + 2, :])
         for h in range(4)], axis=-1).reshape(bt, 256)       # (BT, 256)

    # ---- fc1 -> relu -> fc2 -> relu -> fc3 (N padded to 128: lane-dense stores).
    h1 = jnp.maximum(
        jnp.dot(f.astype(bf16), wf1_ref[...], preferred_element_type=f32)
        + bf1_ref[...], 0.0)
    h2 = jnp.maximum(
        jnp.dot(h1.astype(bf16), wf2_ref[...], preferred_element_type=f32)
        + bf2_ref[...], 0.0)
    h3 = (jnp.dot(h2.astype(bf16), wf3_ref[...], preferred_element_type=f32)
          + bf3_ref[...])
    o_ref[...] = h3.astype(o_ref.dtype)


# ---------------------------------------------------------------------------
# One-time host-side weight packing (torch layout -> Toeplitz / lane-friendly).
# ---------------------------------------------------------------------------
def pack_params(p):
    def npf(a):
        return np.asarray(a, dtype=np.float32)

    # conv1 -> 5 banded (28, 256) weights, one per kernel row i.
    # Output lane for (ow, co): (ow & 1) * 128 + (ow >> 1) * 6 + co.
    w1 = npf(p["conv1_w"])                       # (6, 1, 5, 5)  [co, ci, kh, kw]
    m1 = np.zeros((5, 28, 256), np.float32)
    b1 = np.zeros((1, 256), np.float32)
    for ow in range(24):
        base = (ow % 2) * 128 + (ow // 2) * 6
        b1[0, base:base + 6] = npf(p["conv1_b"])
        for i in range(5):
            for kw in range(5):
                m1[i, ow + kw, base:base + 6] = w1[:, 0, i, kw]

    # conv2 -> 5 banded (72, 256) weights; input lane = w * 6 + ci,
    # output lane for (ow, co): (ow & 1) * 128 + (ow >> 1) * 16 + co.
    w2 = npf(p["conv2_w"])                       # (16, 6, 5, 5) [co, ci, kh, kw]
    m2 = np.zeros((5, 72, 256), np.float32)
    b2 = np.zeros((1, 256), np.float32)
    for ow in range(8):
        base = (ow % 2) * 128 + (ow // 2) * 16
        b2[0, base:base + 16] = npf(p["conv2_b"])
        for i in range(5):
            for kw in range(5):
                for ci in range(6):
                    m2[i, (ow + kw) * 6 + ci, base:base + 16] = w2[:, ci, i, kw]

    # fc1: kernel flatten order is (h, w, c) -> feature = h*64 + w*16 + c;
    # torch order is (c, h, w).  Transpose to (K, N) and zero-pad N: 120 -> 128.
    fc1 = npf(p["fc1_w"])                        # (120, 256)
    wf1 = np.zeros((256, 128), np.float32)
    for c in range(16):
        for h in range(4):
            for w in range(4):
                wf1[h * 64 + w * 16 + c, :120] = fc1[:, c * 16 + h * 4 + w]
    bf1 = np.zeros((1, 128), np.float32)
    bf1[0, :120] = npf(p["fc1_b"])

    # fc2: K 120 -> 128 (zero rows swallow fc1's padded lanes), N 84 -> 128.
    wf2 = np.zeros((128, 128), np.float32)
    wf2[:120, :84] = npf(p["fc2_w"]).T
    bf2 = np.zeros((1, 128), np.float32)
    bf2[0, :84] = npf(p["fc2_b"])

    # fc3: K 84 -> 128, N 120 -> 128.
    wf3 = np.zeros((128, 128), np.float32)
    wf3[:84, :120] = npf(p["fc3_w"]).T
    bf3 = np.zeros((1, 128), np.float32)
    bf3[0, :120] = npf(p["fc3_b"])

    bf16, f32 = jnp.bfloat16, jnp.float32
    return (jnp.asarray(m1, bf16), jnp.asarray(b1, f32),
            jnp.asarray(m2, bf16), jnp.asarray(b2, f32),
            jnp.asarray(wf1, bf16), jnp.asarray(bf1, f32),
            jnp.asarray(wf2, bf16), jnp.asarray(bf2, f32),
            jnp.asarray(wf3, bf16), jnp.asarray(bf3, f32))


# ---------------------------------------------------------------------------
# Batch tile selection: <= 64 images, multiple of 8, >= 2 grid steps if B allows.
# ---------------------------------------------------------------------------
def _choose_bt(B):
    if B <= 8:
        return 8
    n_steps = max(2, -(-B // 64))
    return min(64, 8 * (-(-B // (8 * n_steps))))


# ---------------------------------------------------------------------------
# Forward pass: one pallas_call over a parallel batch-tile grid.
# ---------------------------------------------------------------------------
def dog_identifier_forward(packed, x):
    """x: (B, 1, 28, 28) float32 -> (B, 120) logits (single fused Pallas kernel)."""
    B = x.shape[0]
    assert x.shape[1:] == (1, 28, 28), x.shape
    xs = x.reshape(B, 28, 28).astype(jnp.float32)

    bt = _choose_bt(B)
    Bp = -(-B // bt) * bt                        # pad batch to a tile multiple
    if Bp != B:
        xs = jnp.pad(xs, ((0, Bp - B), (0, 0), (0, 0)))
    grid = (Bp // bt,)

    in_specs = [pl.BlockSpec((bt, 28, 28), lambda b: (b, 0, 0))]
    # Weights/biases: full blocks, constant index_map -> DMA'd once, VMEM resident.
    in_specs += [pl.BlockSpec(w.shape, lambda b, _nd=w.ndim: (0,) * _nd)
                 for w in packed]

    out = pl.pallas_call(
        _dog_kernel,
        out_shape=jax.ShapeDtypeStruct((Bp, 128), jnp.float32),
        grid=grid,
        in_specs=in_specs,
        out_specs=pl.BlockSpec((bt, 128), lambda b: (b, 0)),
        compiler_params=pltpu.CompilerParams(
            dimension_semantics=("parallel",),
            vmem_limit_bytes=48 * 1024 * 1024,
        ),
    )(xs, *packed)
    return out[:B, :120]


# ---------------------------------------------------------------------------
# Parameter init (mimics PyTorch's default U(-1/sqrt(fan_in), +1/sqrt(fan_in))).
# ---------------------------------------------------------------------------
def init_params(key):
    ks = jax.random.split(key, 10)

    def u(k, shape, fan_in):
        bound = 1.0 / float(fan_in) ** 0.5
        return jax.random.uniform(k, shape, jnp.float32, -bound, bound)

    return {
        "conv1_w": u(ks[0], (6, 1, 5, 5), 1 * 5 * 5),
        "conv1_b": u(ks[1], (6,), 1 * 5 * 5),
        "conv2_w": u(ks[2], (16, 6, 5, 5), 6 * 5 * 5),
        "conv2_b": u(ks[3], (16,), 6 * 5 * 5),
        "fc1_w": u(ks[4], (120, 16 * 4 * 4), 16 * 4 * 4),
        "fc1_b": u(ks[5], (120,), 16 * 4 * 4),
        "fc2_w": u(ks[6], (84, 120), 120),
        "fc2_b": u(ks[7], (84,), 120),
        "fc3_w": u(ks[8], (120, 84), 84),
        "fc3_b": u(ks[9], (120,), 84),
    }


# ---------------------------------------------------------------------------
# Plain-XLA reference of the same network (numerical sanity check only).
# ---------------------------------------------------------------------------
def reference_forward(params, x):
    def conv(y, w, b):
        out = jax.lax.conv_general_dilated(
            y, w, window_strides=(1, 1), padding="VALID",
            dimension_numbers=("NCHW", "OIHW", "NCHW"))
        return jax.nn.relu(out + b.reshape(1, -1, 1, 1))

    def pool(y):
        b, c, h, w = y.shape
        return y.reshape(b, c, h // 2, 2, w // 2, 2).max(axis=(3, 5))

    y = pool(conv(x, params["conv1_w"], params["conv1_b"]))
    y = pool(conv(y, params["conv2_w"], params["conv2_b"]))
    y = y.reshape(x.shape[0], 16 * 4 * 4)
    y = jax.nn.relu(y @ params["fc1_w"].T + params["fc1_b"])
    y = jax.nn.relu(y @ params["fc2_w"].T + params["fc2_b"])
    return y @ params["fc3_w"].T + params["fc3_b"]


if __name__ == "__main__":
    key = jax.random.PRNGKey(0)
    pkey, xkey = jax.random.split(key)
    params = init_params(pkey)
    x = jax.random.normal(xkey, (2, 1, 28, 28), dtype=jnp.float32)

    packed = pack_params(params)                 # done once, outside the jit
    fwd = jax.jit(dog_identifier_forward)
    out = fwd(packed, x)
    jax.block_until_ready(out)

    assert out.shape == (2, 120), out.shape
    assert out.dtype == jnp.float32

    # Sanity check against the plain-XLA reference (loose tol: bf16 MXU passes
    # on both sides).
    ref = reference_forward(params, x)
    err = float(jnp.max(jnp.abs(out - ref)))
    assert err < 5e-2, f"max abs err {err}"

    print("KERNEL_OK")
</pallas_src>

<mosaic_0001>
module attributes {stable_mosaic.version = 11 : i64} {
  func.func @_dog_kernel(%arg0: i32, %arg1: memref<8x28x28xf32, #tpu.memory_space<vmem>>, %arg2: memref<5x28x256xbf16, #tpu.memory_space<vmem>>, %arg3: memref<1x256xf32, #tpu.memory_space<vmem>>, %arg4: memref<5x72x256xbf16, #tpu.memory_space<vmem>>, %arg5: memref<1x256xf32, #tpu.memory_space<vmem>>, %arg6: memref<256x128xbf16, #tpu.memory_space<vmem>>, %arg7: memref<1x128xf32, #tpu.memory_space<vmem>>, %arg8: memref<128x128xbf16, #tpu.memory_space<vmem>>, %arg9: memref<1x128xf32, #tpu.memory_space<vmem>>, %arg10: memref<128x128xbf16, #tpu.memory_space<vmem>>, %arg11: memref<1x128xf32, #tpu.memory_space<vmem>>, %arg12: memref<8x128xf32, #tpu.memory_space<vmem>>) attributes {dimension_semantics = [#tpu.dimension_semantics<parallel>], iteration_bounds = array<i64: 1>, scalar_prefetch = 0 : i64, scratch_operands = 0 : i64, tpu.core_type = #tpu.core_type<tc>, window_params = [{transform_indices = @transform_0, window_bounds = array<i64: 8, 28, 28>}, {pipeline_mode = #tpu.pipeline_mode<synchronous>, transform_indices = @transform_1, window_bounds = array<i64: 5, 28, 256>}, {pipeline_mode = #tpu.pipeline_mode<synchronous>, transform_indices = @transform_2, window_bounds = array<i64: 1, 256>}, {pipeline_mode = #tpu.pipeline_mode<synchronous>, transform_indices = @transform_3, window_bounds = array<i64: 5, 72, 256>}, {pipeline_mode = #tpu.pipeline_mode<synchronous>, transform_indices = @transform_4, window_bounds = array<i64: 1, 256>}, {pipeline_mode = #tpu.pipeline_mode<synchronous>, transform_indices = @transform_5, window_bounds = array<i64: 256, 128>}, {pipeline_mode = #tpu.pipeline_mode<synchronous>, transform_indices = @transform_6, window_bounds = array<i64: 1, 128>}, {pipeline_mode = #tpu.pipeline_mode<synchronous>, transform_indices = @transform_7, window_bounds = array<i64: 128, 128>}, {pipeline_mode = #tpu.pipeline_mode<synchronous>, transform_indices = @transform_8, window_bounds = array<i64: 1, 128>}, {pipeline_mode = #tpu.pipeline_mode<synchronous>, transform_indices = @transform_9, window_bounds = array<i64: 128, 128>}, {pipeline_mode = #tpu.pipeline_mode<synchronous>, transform_indices = @transform_10, window_bounds = array<i64: 1, 128>}, {transform_indices = @transform_11, window_bounds = array<i64: 8, 128>}]} {
    %c0 = arith.constant 0 : index
    %c0_0 = arith.constant 0 : index
    %c0_1 = arith.constant 0 : index
    %0 = vector.load %arg1[%c0, %c0_0, %c0_1] : memref<8x28x28xf32, #tpu.memory_space<vmem>>, vector<8x28x28xf32>
    %1 = arith.truncf %0 : vector<8x28x28xf32> to vector<8x28x28xbf16>
    %2 = vector.extract_strided_slice %1 {offsets = [0, 0, 0], sizes = [8, 24, 28], strides = [1, 1, 1]} : vector<8x28x28xbf16> to vector<8x24x28xbf16>
    %3 = vector.shape_cast %2 : vector<8x24x28xbf16> to vector<192x28xbf16>
    %c0_2 = arith.constant 0 : index
    %c0_3 = arith.constant 0 : index
    %c0_4 = arith.constant 0 : index
    %4 = vector.load %arg2[%c0_2, %c0_3, %c0_4] : memref<5x28x256xbf16, #tpu.memory_space<vmem>>, vector<1x28x256xbf16>
    %5 = vector.shape_cast %4 : vector<1x28x256xbf16> to vector<28x256xbf16>
    %cst = arith.constant dense<0.000000e+00> : vector<192x256xf32>
    %6 = tpu.matmul %3, %5, %cst {dimension_numbers = #tpu.dot_dimension_numbers<[1], [0], [0], [1], [0, 0, 1, 1], [], []>} : vector<192x28xbf16>, vector<28x256xbf16>, vector<192x256xf32> -> vector<192x256xf32>
    %7 = vector.extract_strided_slice %1 {offsets = [0, 1, 0], sizes = [8, 24, 28], strides = [1, 1, 1]} : vector<8x28x28xbf16> to vector<8x24x28xbf16>
    %8 = vector.shape_cast %7 : vector<8x24x28xbf16> to vector<192x28xbf16>
    %c1 = arith.constant 1 : index
    %c0_5 = arith.constant 0 : index
    %c0_6 = arith.constant 0 : index
    %9 = vector.load %arg2[%c1, %c0_5, %c0_6] : memref<5x28x256xbf16, #tpu.memory_space<vmem>>, vector<1x28x256xbf16>
    %10 = vector.shape_cast %9 : vector<1x28x256xbf16> to vector<28x256xbf16>
    %cst_7 = arith.constant dense<0.000000e+00> : vector<192x256xf32>
    %11 = tpu.matmul %8, %10, %cst_7 {dimension_numbers = #tpu.dot_dimension_numbers<[1], [0], [0], [1], [0, 0, 1, 1], [], []>} : vector<192x28xbf16>, vector<28x256xbf16>, vector<192x256xf32> -> vector<192x256xf32>
    %12 = arith.addf %6, %11 : vector<192x256xf32>
    %13 = vector.extract_strided_slice %1 {offsets = [0, 2, 0], sizes = [8, 24, 28], strides = [1, 1, 1]} : vector<8x28x28xbf16> to vector<8x24x28xbf16>
    %14 = vector.shape_cast %13 : vector<8x24x28xbf16> to vector<192x28xbf16>
    %c2 = arith.constant 2 : index
    %c0_8 = arith.constant 0 : index
    %c0_9 = arith.constant 0 : index
    %15 = vector.load %arg2[%c2, %c0_8, %c0_9] : memref<5x28x256xbf16, #tpu.memory_space<vmem>>, vector<1x28x256xbf16>
    %16 = vector.shape_cast %15 : vector<1x28x256xbf16> to vector<28x256xbf16>
    %cst_10 = arith.constant dense<0.000000e+00> : vector<192x256xf32>
    %17 = tpu.matmul %14, %16, %cst_10 {dimension_numbers = #tpu.dot_dimension_numbers<[1], [0], [0], [1], [0, 0, 1, 1], [], []>} : vector<192x28xbf16>, vector<28x256xbf16>, vector<192x256xf32> -> vector<192x256xf32>
    %18 = arith.addf %12, %17 : vector<192x256xf32>
    %19 = vector.extract_strided_slice %1 {offsets = [0, 3, 0], sizes = [8, 24, 28], strides = [1, 1, 1]} : vector<8x28x28xbf16> to vector<8x24x28xbf16>
    %20 = vector.shape_cast %19 : vector<8x24x28xbf16> to vector<192x28xbf16>
    %c3 = arith.constant 3 : index
    %c0_11 = arith.constant 0 : index
    %c0_12 = arith.constant 0 : index
    %21 = vector.load %arg2[%c3, %c0_11, %c0_12] : memref<5x28x256xbf16, #tpu.memory_space<vmem>>, vector<1x28x256xbf16>
    %22 = vector.shape_cast %21 : vector<1x28x256xbf16> to vector<28x256xbf16>
    %cst_13 = arith.constant dense<0.000000e+00> : vector<192x256xf32>
    %23 = tpu.matmul %20, %22, %cst_13 {dimension_numbers = #tpu.dot_dimension_numbers<[1], [0], [0], [1], [0, 0, 1, 1], [], []>} : vector<192x28xbf16>, vector<28x256xbf16>, vector<192x256xf32> -> vector<192x256xf32>
    %24 = arith.addf %18, %23 : vector<192x256xf32>
    %25 = vector.extract_strided_slice %1 {offsets = [0, 4, 0], sizes = [8, 24, 28], strides = [1, 1, 1]} : vector<8x28x28xbf16> to vector<8x24x28xbf16>
    %26 = vector.shape_cast %25 : vector<8x24x28xbf16> to vector<192x28xbf16>
    %c4 = arith.constant 4 : index
    %c0_14 = arith.constant 0 : index
    %c0_15 = arith.constant 0 : index
    %27 = vector.load %arg2[%c4, %c0_14, %c0_15] : memref<5x28x256xbf16, #tpu.memory_space<vmem>>, vector<1x28x256xbf16>
    %28 = vector.shape_cast %27 : vector<1x28x256xbf16> to vector<28x256xbf16>
    %cst_16 = arith.constant dense<0.000000e+00> : vector<192x256xf32>
    %29 = tpu.matmul %26, %28, %cst_16 {dimension_numbers = #tpu.dot_dimension_numbers<[1], [0], [0], [1], [0, 0, 1, 1], [], []>} : vector<192x28xbf16>, vector<28x256xbf16>, vector<192x256xf32> -> vector<192x256xf32>
    %30 = arith.addf %24, %29 : vector<192x256xf32>
    %c0_17 = arith.constant 0 : index
    %c0_18 = arith.constant 0 : index
    %31 = vector.load %arg3[%c0_17, %c0_18] : memref<1x256xf32, #tpu.memory_space<vmem>>, vector<1x256xf32>
    %32 = vector.broadcast %31 : vector<1x256xf32> to vector<192x256xf32>
    %33 = arith.addf %30, %32 : vector<192x256xf32>
    %cst_19 = arith.constant 0.000000e+00 : f32
    %34 = vector.broadcast %cst_19 : f32 to vector<192x256xf32>
    %35 = arith.maximumf %33, %34 : vector<192x256xf32>
    %36 = vector.shape_cast %35 : vector<192x256xf32> to vector<8x24x256xf32>
    %37 = vector.extract_strided_slice %36 {offsets = [0, 0, 0], sizes = [8, 24, 72], strides = [1, 1, 1]} : vector<8x24x256xf32> to vector<8x24x72xf32>
    %38 = vector.extract_strided_slice %36 {offsets = [0, 0, 128], sizes = [8, 24, 72], strides = [1, 1, 1]} : vector<8x24x256xf32> to vector<8x24x72xf32>
    %39 = arith.maximumf %37, %38 : vector<8x24x72xf32>
    %40 = vector.extract_strided_slice %39 {offsets = [0, 0, 0], sizes = [8, 1, 72], strides = [1, 1, 1]} : vector<8x24x72xf32> to vector<8x1x72xf32>
    %41 = vector.extract_strided_slice %39 {offsets = [0, 1, 0], sizes = [8, 1, 72], strides = [1, 1, 1]} : vector<8x24x72xf32> to vector<8x1x72xf32>
    %42 = arith.maximumf %40, %41 : vector<8x1x72xf32>
    %43 = vector.extract_strided_slice %39 {offsets = [0, 2, 0], sizes = [8, 1, 72], strides = [1, 1, 1]} : vector<8x24x72xf32> to vector<8x1x72xf32>
    %44 = vector.extract_strided_slice %39 {offsets = [0, 3, 0], sizes = [8, 1, 72], strides = [1, 1, 1]} : vector<8x24x72xf32> to vector<8x1x72xf32>
    %45 = arith.maximumf %43, %44 : vector<8x1x72xf32>
    %46 = vector.extract_strided_slice %39 {offsets = [0, 4, 0], sizes = [8, 1, 72], strides = [1, 1, 1]} : vector<8x24x72xf32> to vector<8x1x72xf32>
    %47 = vector.extract_strided_slice %39 {offsets = [0, 5, 0], sizes = [8, 1, 72], strides = [1, 1, 1]} : vector<8x24x72xf32> to vector<8x1x72xf32>
    %48 = arith.maximumf %46, %47 : vector<8x1x72xf32>
    %49 = vector.extract_strided_slice %39 {offsets = [0, 6, 0], sizes = [8, 1, 72], strides = [1, 1, 1]} : vector<8x24x72xf32> to vector<8x1x72xf32>
    %50 = vector.extract_strided_slice %39 {offsets = [0, 7, 0], sizes = [8, 1, 72], strides = [1, 1, 1]} : vector<8x24x72xf32> to vector<8x1x72xf32>
    %51 = arith.maximumf %49, %50 : vector<8x1x72xf32>
    %52 = vector.extract_strided_slice %39 {offsets = [0, 8, 0], sizes = [8, 1, 72], strides = [1, 1, 1]} : vector<8x24x72xf32> to vector<8x1x72xf32>
    %53 = vector.extract_strided_slice %39 {offsets = [0, 9, 0], sizes = [8, 1, 72], strides = [1, 1, 1]} : vector<8x24x72xf32> to vector<8x1x72xf32>
    %54 = arith.maximumf %52, %53 : vector<8x1x72xf32>
    %55 = vector.extract_strided_slice %39 {offsets = [0, 10, 0], sizes = [8, 1, 72], strides = [1, 1, 1]} : vector<8x24x72xf32> to vector<8x1x72xf32>
    %56 = vector.extract_strided_slice %39 {offsets = [0, 11, 0], sizes = [8, 1, 72], strides = [1, 1, 1]} : vector<8x24x72xf32> to vector<8x1x72xf32>
    %57 = arith.maximumf %55, %56 : vector<8x1x72xf32>
    %58 = vector.extract_strided_slice %39 {offsets = [0, 12, 0], sizes = [8, 1, 72], strides = [1, 1, 1]} : vector<8x24x72xf32> to vector<8x1x72xf32>
    %59 = vector.extract_strided_slice %39 {offsets = [0, 13, 0], sizes = [8, 1, 72], strides = [1, 1, 1]} : vector<8x24x72xf32> to vector<8x1x72xf32>
    %60 = arith.maximumf %58, %59 : vector<8x1x72xf32>
    %61 = vector.extract_strided_slice %39 {offsets = [0, 14, 0], sizes = [8, 1, 72], strides = [1, 1, 1]} : vector<8x24x72xf32> to vector<8x1x72xf32>
    %62 = vector.extract_strided_slice %39 {offsets = [0, 15, 0], sizes = [8, 1, 72], strides = [1, 1, 1]} : vector<8x24x72xf32> to vector<8x1x72xf32>
    %63 = arith.maximumf %61, %62 : vector<8x1x72xf32>
    %64 = vector.extract_strided_slice %39 {offsets = [0, 16, 0], sizes = [8, 1, 72], strides = [1, 1, 1]} : vector<8x24x72xf32> to vector<8x1x72xf32>
    %65 = vector.extract_strided_slice %39 {offsets = [0, 17, 0], sizes = [8, 1, 72], strides = [1, 1, 1]} : vector<8x24x72xf32> to vector<8x1x72xf32>
    %66 = arith.maximumf %64, %65 : vector<8x1x72xf32>
    %67 = vector.extract_strided_slice %39 {offsets = [0, 18, 0], sizes = [8, 1, 72], strides = [1, 1, 1]} : vector<8x24x72xf32> to vector<8x1x72xf32>
    %68 = vector.extract_strided_slice %39 {offsets = [0, 19, 0], sizes = [8, 1, 72], strides = [1, 1, 1]} : vector<8x24x72xf32> to vector<8x1x72xf32>
    %69 = arith.maximumf %67, %68 : vector<8x1x72xf32>
    %70 = vector.extract_strided_slice %39 {offsets = [0, 20, 0], sizes = [8, 1, 72], strides = [1, 1, 1]} : vector<8x24x72xf32> to vector<8x1x72xf32>
    %71 = vector.extract_strided_slice %39 {offsets = [0, 21, 0], sizes = [8, 1, 72], strides = [1, 1, 1]} : vector<8x24x72xf32> to vector<8x1x72xf32>
    %72 = arith.maximumf %70, %71 : vector<8x1x72xf32>
    %73 = vector.extract_strided_slice %39 {offsets = [0, 22, 0], sizes = [8, 1, 72], strides = [1, 1, 1]} : vector<8x24x72xf32> to vector<8x1x72xf32>
    %74 = vector.extract_strided_slice %39 {offsets = [0, 23, 0], sizes = [8, 1, 72], strides = [1, 1, 1]} : vector<8x24x72xf32> to vector<8x1x72xf32>
    %75 = arith.maximumf %73, %74 : vector<8x1x72xf32>
    %76 = tpu.concatenate %42, %45, %48, %51, %54, %57, %60, %63, %66, %69, %72, %75 in 1 : vector<8x1x72xf32>, vector<8x1x72xf32>, vector<8x1x72xf32>, vector<8x1x72xf32>, vector<8x1x72xf32>, vector<8x1x72xf32>, vector<8x1x72xf32>, vector<8x1x72xf32>, vector<8x1x72xf32>, vector<8x1x72xf32>, vector<8x1x72xf32>, vector<8x1x72xf32> -> vector<8x12x72xf32>
    %77 = arith.truncf %76 : vector<8x12x72xf32> to vector<8x12x72xbf16>
    %78 = vector.extract_strided_slice %77 {offsets = [0, 0, 0], sizes = [8, 8, 72], strides = [1, 1, 1]} : vector<8x12x72xbf16> to vector<8x8x72xbf16>
    %79 = vector.shape_cast %78 : vector<8x8x72xbf16> to vector<64x72xbf16>
    %c0_20 = arith.constant 0 : index
    %c0_21 = arith.constant 0 : index
    %c0_22 = arith.constant 0 : index
    %80 = vector.load %arg4[%c0_20, %c0_21, %c0_22] : memref<5x72x256xbf16, #tpu.memory_space<vmem>>, vector<1x72x256xbf16>
    %81 = vector.shape_cast %80 : vector<1x72x256xbf16> to vector<72x256xbf16>
    %cst_23 = arith.constant dense<0.000000e+00> : vector<64x256xf32>
    %82 = tpu.matmul %79, %81, %cst_23 {dimension_numbers = #tpu.dot_dimension_numbers<[1], [0], [0], [1], [0, 0, 1, 1], [], []>} : vector<64x72xbf16>, vector<72x256xbf16>, vector<64x256xf32> -> vector<64x256xf32>
    %83 = vector.extract_strided_slice %77 {offsets = [0, 1, 0], sizes = [8, 8, 72], strides = [1, 1, 1]} : vector<8x12x72xbf16> to vector<8x8x72xbf16>
    %84 = vector.shape_cast %83 : vector<8x8x72xbf16> to vector<64x72xbf16>
    %c1_24 = arith.constant 1 : index
    %c0_25 = arith.constant 0 : index
    %c0_26 = arith.constant 0 : index
    %85 = vector.load %arg4[%c1_24, %c0_25, %c0_26] : memref<5x72x256xbf16, #tpu.memory_space<vmem>>, vector<1x72x256xbf16>
    %86 = vector.shape_cast %85 : vector<1x72x256xbf16> to vector<72x256xbf16>
    %cst_27 = arith.constant dense<0.000000e+00> : vector<64x256xf32>
    %87 = tpu.matmul %84, %86, %cst_27 {dimension_numbers = #tpu.dot_dimension_numbers<[1], [0], [0], [1], [0, 0, 1, 1], [], []>} : vector<64x72xbf16>, vector<72x256xbf16>, vector<64x256xf32> -> vector<64x256xf32>
    %88 = arith.addf %82, %87 : vector<64x256xf32>
    %89 = vector.extract_strided_slice %77 {offsets = [0, 2, 0], sizes = [8, 8, 72], strides = [1, 1, 1]} : vector<8x12x72xbf16> to vector<8x8x72xbf16>
    %90 = vector.shape_cast %89 : vector<8x8x72xbf16> to vector<64x72xbf16>
    %c2_28 = arith.constant 2 : index
    %c0_29 = arith.constant 0 : index
    %c0_30 = arith.constant 0 : index
    %91 = vector.load %arg4[%c2_28, %c0_29, %c0_30] : memref<5x72x256xbf16, #tpu.memory_space<vmem>>, vector<1x72x256xbf16>
    %92 = vector.shape_cast %91 : vector<1x72x256xbf16> to vector<72x256xbf16>
    %cst_31 = arith.constant dense<0.000000e+00> : vector<64x256xf32>
    %93 = tpu.matmul %90, %92, %cst_31 {dimension_numbers = #tpu.dot_dimension_numbers<[1], [0], [0], [1], [0, 0, 1, 1], [], []>} : vector<64x72xbf16>, vector<72x256xbf16>, vector<64x256xf32> -> vector<64x256xf32>
    %94 = arith.addf %88, %93 : vector<64x256xf32>
    %95 = vector.extract_strided_slice %77 {offsets = [0, 3, 0], sizes = [8, 8, 72], strides = [1, 1, 1]} : vector<8x12x72xbf16> to vector<8x8x72xbf16>
    %96 = vector.shape_cast %95 : vector<8x8x72xbf16> to vector<64x72xbf16>
    %c3_32 = arith.constant 3 : index
    %c0_33 = arith.constant 0 : index
    %c0_34 = arith.constant 0 : index
    %97 = vector.load %arg4[%c3_32, %c0_33, %c0_34] : memref<5x72x256xbf16, #tpu.memory_space<vmem>>, vector<1x72x256xbf16>
    %98 = vector.shape_cast %97 : vector<1x72x256xbf16> to vector<72x256xbf16>
    %cst_35 = arith.constant dense<0.000000e+00> : vector<64x256xf32>
    %99 = tpu.matmul %96, %98, %cst_35 {dimension_numbers = #tpu.dot_dimension_numbers<[1], [0], [0], [1], [0, 0, 1, 1], [], []>} : vector<64x72xbf16>, vector<72x256xbf16>, vector<64x256xf32> -> vector<64x256xf32>
    %100 = arith.addf %94, %99 : vector<64x256xf32>
    %101 = vector.extract_strided_slice %77 {offsets = [0, 4, 0], sizes = [8, 8, 72], strides = [1, 1, 1]} : vector<8x12x72xbf16> to vector<8x8x72xbf16>
    %102 = vector.shape_cast %101 : vector<8x8x72xbf16> to vector<64x72xbf16>
    %c4_36 = arith.constant 4 : index
    %c0_37 = arith.constant 0 : index
    %c0_38 = arith.constant 0 : index
    %103 = vector.load %arg4[%c4_36, %c0_37, %c0_38] : memref<5x72x256xbf16, #tpu.memory_space<vmem>>, vector<1x72x256xbf16>
    %104 = vector.shape_cast %103 : vector<1x72x256xbf16> to vector<72x256xbf16>
    %cst_39 = arith.constant dense<0.000000e+00> : vector<64x256xf32>
    %105 = tpu.matmul %102, %104, %cst_39 {dimension_numbers = #tpu.dot_dimension_numbers<[1], [0], [0], [1], [0, 0, 1, 1], [], []>} : vector<64x72xbf16>, vector<72x256xbf16>, vector<64x256xf32> -> vector<64x256xf32>
    %106 = arith.addf %100, %105 : vector<64x256xf32>
    %c0_40 = arith.constant 0 : index
    %c0_41 = arith.constant 0 : index
    %107 = vector.load %arg5[%c0_40, %c0_41] : memref<1x256xf32, #tpu.memory_space<vmem>>, vector<1x256xf32>
    %108 = vector.broadcast %107 : vector<1x256xf32> to vector<64x256xf32>
    %109 = arith.addf %106, %108 : vector<64x256xf32>
    %cst_42 = arith.constant 0.000000e+00 : f32
    %110 = vector.broadcast %cst_42 : f32 to vector<64x256xf32>
    %111 = arith.maximumf %109, %110 : vector<64x256xf32>
    %112 = vector.shape_cast %111 : vector<64x256xf32> to vector<8x8x256xf32>
    %113 = vector.extract_strided_slice %112 {offsets = [0, 0, 0], sizes = [8, 8, 64], strides = [1, 1, 1]} : vector<8x8x256xf32> to vector<8x8x64xf32>
    %114 = vector.extract_strided_slice %112 {offsets = [0, 0, 128], sizes = [8, 8, 64], strides = [1, 1, 1]} : vector<8x8x256xf32> to vector<8x8x64xf32>
    %115 = arith.maximumf %113, %114 : vector<8x8x64xf32>
    %116 = vector.extract_strided_slice %115 {offsets = [0, 0, 0], sizes = [8, 1, 64], strides = [1, 1, 1]} : vector<8x8x64xf32> to vector<8x1x64xf32>
    %117 = vector.extract_strided_slice %115 {offsets = [0, 1, 0], sizes = [8, 1, 64], strides = [1, 1, 1]} : vector<8x8x64xf32> to vector<8x1x64xf32>
    %118 = arith.maximumf %116, %117 : vector<8x1x64xf32>
    %119 = vector.extract_strided_slice %115 {offsets = [0, 2, 0], sizes = [8, 1, 64], strides = [1, 1, 1]} : vector<8x8x64xf32> to vector<8x1x64xf32>
    %120 = vector.extract_strided_slice %115 {offsets = [0, 3, 0], sizes = [8, 1, 64], strides = [1, 1, 1]} : vector<8x8x64xf32> to vector<8x1x64xf32>
    %121 = arith.maximumf %119, %120 : vector<8x1x64xf32>
    %122 = vector.extract_strided_slice %115 {offsets = [0, 4, 0], sizes = [8, 1, 64], strides = [1, 1, 1]} : vector<8x8x64xf32> to vector<8x1x64xf32>
    %123 = vector.extract_strided_slice %115 {offsets = [0, 5, 0], sizes = [8, 1, 64], strides = [1, 1, 1]} : vector<8x8x64xf32> to vector<8x1x64xf32>
    %124 = arith.maximumf %122, %123 : vector<8x1x64xf32>
    %125 = vector.extract_strided_slice %115 {offsets = [0, 6, 0], sizes = [8, 1, 64], strides = [1, 1, 1]} : vector<8x8x64xf32> to vector<8x1x64xf32>
    %126 = vector.extract_strided_slice %115 {offsets = [0, 7, 0], sizes = [8, 1, 64], strides = [1, 1, 1]} : vector<8x8x64xf32> to vector<8x1x64xf32>
    %127 = arith.maximumf %125, %126 : vector<8x1x64xf32>
    %128 = tpu.concatenate %118, %121, %124, %127 in 2 : vector<8x1x64xf32>, vector<8x1x64xf32>, vector<8x1x64xf32>, vector<8x1x64xf32> -> vector<8x1x256xf32>
    %129 = vector.shape_cast %128 : vector<8x1x256xf32> to vector<8x256xf32>
    %130 = arith.truncf %129 : vector<8x256xf32> to vector<8x256xbf16>
    %c0_43 = arith.constant 0 : index
    %c0_44 = arith.constant 0 : index
    %131 = vector.load %arg6[%c0_43, %c0_44] : memref<256x128xbf16, #tpu.memory_space<vmem>>, vector<256x128xbf16>
    %cst_45 = arith.constant dense<0.000000e+00> : vector<8x128xf32>
    %132 = tpu.matmul %130, %131, %cst_45 {dimension_numbers = #tpu.dot_dimension_numbers<[1], [0], [0], [1], [0, 0, 1, 1], [], []>} : vector<8x256xbf16>, vector<256x128xbf16>, vector<8x128xf32> -> vector<8x128xf32>
    %c0_46 = arith.constant 0 : index
    %c0_47 = arith.constant 0 : index
    %133 = vector.load %arg7[%c0_46, %c0_47] : memref<1x128xf32, #tpu.memory_space<vmem>>, vector<1x128xf32>
    %134 = vector.broadcast %133 : vector<1x128xf32> to vector<8x128xf32>
    %135 = arith.addf %132, %134 : vector<8x128xf32>
    %cst_48 = arith.constant 0.000000e+00 : f32
    %136 = vector.broadcast %cst_48 : f32 to vector<8x128xf32>
    %137 = arith.maximumf %135, %136 : vector<8x128xf32>
    %138 = arith.truncf %137 : vector<8x128xf32> to vector<8x128xbf16>
    %c0_49 = arith.constant 0 : index
    %c0_50 = arith.constant 0 : index
    %139 = vector.load %arg8[%c0_49, %c0_50] : memref<128x128xbf16, #tpu.memory_space<vmem>>, vector<128x128xbf16>
    %cst_51 = arith.constant dense<0.000000e+00> : vector<8x128xf32>
    %140 = tpu.matmul %138, %139, %cst_51 {dimension_numbers = #tpu.dot_dimension_numbers<[1], [0], [0], [1], [0, 0, 1, 1], [], []>} : vector<8x128xbf16>, vector<128x128xbf16>, vector<8x128xf32> -> vector<8x128xf32>
    %c0_52 = arith.constant 0 : index
    %c0_53 = arith.constant 0 : index
    %141 = vector.load %arg9[%c0_52, %c0_53] : memref<1x128xf32, #tpu.memory_space<vmem>>, vector<1x128xf32>
    %142 = vector.broadcast %141 : vector<1x128xf32> to vector<8x128xf32>
    %143 = arith.addf %140, %142 : vector<8x128xf32>
    %cst_54 = arith.constant 0.000000e+00 : f32
    %144 = vector.broadcast %cst_54 : f32 to vector<8x128xf32>
    %145 = arith.maximumf %143, %144 : vector<8x128xf32>
    %146 = arith.truncf %145 : vector<8x128xf32> to vector<8x128xbf16>
    %c0_55 = arith.constant 0 : index
    %c0_56 = arith.constant 0 : index
    %147 = vector.load %arg10[%c0_55, %c0_56] : memref<128x128xbf16, #tpu.memory_space<vmem>>, vector<128x128xbf16>
    %cst_57 = arith.constant dense<0.000000e+00> : vector<8x128xf32>
    %148 = tpu.matmul %146, %147, %cst_57 {dimension_numbers = #tpu.dot_dimension_numbers<[1], [0], [0], [1], [0, 0, 1, 1], [], []>} : vector<8x128xbf16>, vector<128x128xbf16>, vector<8x128xf32> -> vector<8x128xf32>
    %c0_58 = arith.constant 0 : index
    %c0_59 = arith.constant 0 : index
    %149 = vector.load %arg11[%c0_58, %c0_59] : memref<1x128xf32, #tpu.memory_space<vmem>>, vector<1x128xf32>
    %150 = vector.broadcast %149 : vector<1x128xf32> to vector<8x128xf32>
    %151 = arith.addf %148, %150 : vector<8x128xf32>
    %c0_60 = arith.constant 0 : index
    %c0_61 = arith.constant 0 : index
    %152 = vector.load %arg12[%c0_60, %c0_61] : memref<8x128xf32, #tpu.memory_space<vmem>>, vector<8x128xf32>
    tpu.vector_store %arg12[%c0_60, %c0_61], %151 {strides = array<i32>} : memref<8x128xf32, #tpu.memory_space<vmem>>, vector<8x128xf32>,
    return
  }
  func.func @transform_0(%arg0: i32) -> (i32, i32, i32) {
    %c0_i32 = arith.constant 0 : i32
    %c0_i32_0 = arith.constant 0 : i32
    %c0_i32_1 = arith.constant 0 : i32
    return %arg0, %c0_i32, %c0_i32_0 : i32, i32, i32
  }
  func.func @transform_1(%arg0: i32) -> (i32, i32, i32) {
    %c0_i32 = arith.constant 0 : i32
    %c0_i32_0 = arith.constant 0 : i32
    %c0_i32_1 = arith.constant 0 : i32
    %c0_i32_2 = arith.constant 0 : i32
    return %c0_i32, %c0_i32_0, %c0_i32_1 : i32, i32, i32
  }
  func.func @transform_2(%arg0: i32) -> (i32, i32) {
    %c0_i32 = arith.constant 0 : i32
    %c0_i32_0 = arith.constant 0 : i32
    %c0_i32_1 = arith.constant 0 : i32
    return %c0_i32, %c0_i32_0 : i32, i32
  }
  func.func @transform_3(%arg0: i32) -> (i32, i32, i32) {
    %c0_i32 = arith.constant 0 : i32
    %c0_i32_0 = arith.constant 0 : i32
    %c0_i32_1 = arith.constant 0 : i32
    %c0_i32_2 = arith.constant 0 : i32
    return %c0_i32, %c0_i32_0, %c0_i32_1 : i32, i32, i32
  }
  func.func @transform_4(%arg0: i32) -> (i32, i32) {
    %c0_i32 = arith.constant 0 : i32
    %c0_i32_0 = arith.constant 0 : i32
    %c0_i32_1 = arith.constant 0 : i32
    return %c0_i32, %c0_i32_0 : i32, i32
  }
  func.func @transform_5(%arg0: i32) -> (i32, i32) {
    %c0_i32 = arith.constant 0 : i32
    %c0_i32_0 = arith.constant 0 : i32
    %c0_i32_1 = arith.constant 0 : i32
    return %c0_i32, %c0_i32_0 : i32, i32
  }
  func.func @transform_6(%arg0: i32) -> (i32, i32) {
    %c0_i32 = arith.constant 0 : i32
    %c0_i32_0 = arith.constant 0 : i32
    %c0_i32_1 = arith.constant 0 : i32
    return %c0_i32, %c0_i32_0 : i32, i32
  }
  func.func @transform_7(%arg0: i32) -> (i32, i32) {
    %c0_i32 = arith.constant 0 : i32
    %c0_i32_0 = arith.constant 0 : i32
    %c0_i32_1 = arith.constant 0 : i32
    return %c0_i32, %c0_i32_0 : i32, i32
  }
  func.func @transform_8(%arg0: i32) -> (i32, i32) {
    %c0_i32 = arith.constant 0 : i32
    %c0_i32_0 = arith.constant 0 : i32
    %c0_i32_1 = arith.constant 0 : i32
    return %c0_i32, %c0_i32_0 : i32, i32
  }
  func.func @transform_9(%arg0: i32) -> (i32, i32) {
    %c0_i32 = arith.constant 0 : i32
    %c0_i32_0 = arith.constant 0 : i32
    %c0_i32_1 = arith.constant 0 : i32
    return %c0_i32, %c0_i32_0 : i32, i32
  }
  func.func @transform_10(%arg0: i32) -> (i32, i32) {
    %c0_i32 = arith.constant 0 : i32
    %c0_i32_0 = arith.constant 0 : i32
    %c0_i32_1 = arith.constant 0 : i32
    return %c0_i32, %c0_i32_0 : i32, i32
  }
  func.func @transform_11(%arg0: i32) -> (i32, i32) {
    %c0_i32 = arith.constant 0 : i32
    %c0_i32_0 = arith.constant 0 : i32
    return %arg0, %c0_i32 : i32, i32
  }
}

</mosaic_0001>

<bundles_post_ra>
// kernel: dog_identifier_forward.1
= control target key start
LH: loop header
LB: loop body
LE: loop exit
PB: predicated region body
PF: predicated region fallthrough
CT: control target
= control target key end

     0   :  { %16 = vsyncpa [#allocation3], 0  ;;  %s7582_s0 = inlined_call_operand.vmem [shape: f32[8,28,28], index: 0, kind: input, shape index: {}]   ;;  %s7583_s1 = inlined_call_operand.vmem [shape: bf16[5,28,256], index: 1, kind: input, shape index: {}]   ;;  %s7584_s2 = inlined_call_operand.vmem [shape: f32[1,256], index: 2, kind: input, shape index: {}]   ;;  %s7585_s3 = inlined_call_operand.vmem [shape: bf16[5,72,256], index: 3, kind: input, shape index: {}]   ;;  %s7586_s4 = inlined_call_operand.vmem [shape: f32[1,256], index: 4, kind: input, shape index: {}]   ;;  %s7587_s5 = inlined_call_operand.hbm [shape: bf16[256,128], index: 5, kind: input, shape index: {}]   ;;  %s7588_s6 = inlined_call_operand.vmem [shape: f32[1,128], index: 6, kind: input, shape index: {}]   ;;  %s7589_s7 = inlined_call_operand.hbm [shape: bf16[128,128], index: 7, kind: input, shape index: {}]   ;;  %s7590_s8 = inlined_call_operand.vmem [shape: f32[1,128], index: 8, kind: input, shape index: {}]   ;;  %s7591_s9 = inlined_call_operand.hbm [shape: bf16[128,128], index: 9, kind: input, shape index: {}]   ;;  %s7592_s10 = inlined_call_operand.vmem [shape: f32[1,128], index: 10, kind: input, shape index: {}]   ;;  %s7593_s11 = inlined_call_operand.vmem [shape: f32[8,128], index: 11, kind: output, shape index: {}]  }
   0x1   :  { %17 = vsyncpa [#allocation5], 0  ;;  %s47_s19 = sshll.u32 %s7589_s7, 4  ;;  %s5098_s20 = smov [#allocation4]   ;;  %s48_s19 = int_to_ptr.hbm [resolvable:$true] %s47_s19 }
   0x2   :  { %s49_s21 = sshll.u32 %s5098_s20, 4  ;;  %s32_s24 = sshll.u32 %s7587_s5, 4  ;;  %s50_s21 = int_to_ptr.vmem [resolvable:$true] %s49_s21  ;;  %s33_s24 = int_to_ptr.hbm [resolvable:$true] %s32_s24 }
   0x3   :  { %s5099_s25 = smov 64   ;;  %s5100_s26 = smov 4  }
   0x4   :  { %55 = dma.hbm_to_vmem [thread:$0]  %s48_s19, 1024, %s50_s21, [#allocation5], %s5099_s25, %s5099_s25, %s5100_s26  }
   0x5   :  { %s5101_s27 = smov [#allocation2]   ;;  %s62_s7 = sshll.u32 %s7591_s9, 4  ;;  %s63_s7 = int_to_ptr.hbm [resolvable:$true] %s62_s7 }
   0x6   :  { %s34_s28 = sshll.u32 %s5101_s27, 4  ;;  %s5102_s12 = smov [#allocation6]   ;;  %s35_s28 = int_to_ptr.vmem [resolvable:$true] %s34_s28 }
   0x7   :  { %40 = dma.hbm_to_vmem [thread:$0]  %s33_s24, 2048, %s35_s28, [#allocation3], %s5099_s25, %s5099_s25, %s5100_s26  }
   0x8   :  { %s64_s13 = sshll.u32 %s5102_s12, 4  ;;  %s65_s13 = int_to_ptr.vmem [resolvable:$true] %s64_s13 }
   0x9   :  { %70 = dma.hbm_to_vmem [thread:$0]  %s63_s7, 1024, %s65_s13, [#allocation5], %s5099_s25, %s5099_s25, %s5100_s26  }
   0xa   :  { %5094 = dma.done.wait [#allocation3], 2048  }
   0xb   :  { %5095 = vsyncadd [#allocation3], 4294965248 }
   0xc   :  { %5096 = dma.done.wait [#allocation5], 2048  }
   0xd   :  { %5097 = vsyncadd [#allocation5], 4294965248  ;;  %vm525_vm0 = vcmask 1045504   ;;  %v4324_v0 = vld [vmem:[%s7583_s1 + $0x10] sm:$0xf]  ;;  %vm488_vm1 = vcmask 228352  }
   0xe   :  { %v4885_v1 = vld [vmem:[%s7583_s1 + $0x14] sm:$0x30]  ;;  %v4884_v2 = vld [vmem:[%s7583_s1 + $0x14] sm:$0xf]  ;;  %v4326_v4 = vld [vmem:[%s7583_s1 + $0x18] sm:$0x30] }
   0xf   :  { %v4325_v3 = vor.u32 %v4885_v1, %v4324_v0  ;;  %v4316_v5 = vld [vmem:[%s7583_s1] sm:$0xf]  ;;  %v4883_v6 = vld [vmem:[%s7583_s1 + $0x4] sm:$0xf0]  ;;  %v4329_v7 = vor.u32 %v4884_v2, %v4326_v4  ;;  %v4882_v8 = vld [vmem:[%s7583_s1 + $0x4] sm:$0xf] }
  0x10   :  { %v4318_v9 = vld [vmem:[%s7583_s1 + $0x8] sm:$0xf0]  ;;  %v4284_v10 = vld [vmem:[%s7583_s1 + $0x30] sm:$0xf]  ;;  %vm154_vm2 = vsmask.f32 3328  ;;  %v4317_v16 = vor.u32 %v4883_v6, %v4316_v5 }
  0x11   :  { %vm155_vm3 = vsmask.f32 7440  ;;  %v785_v11 = vsel %vm525_vm0, %v4325_v3, 0  ;;  %v4889_v12 = vld [vmem:[%s7583_s1 + $0x34] sm:$0x30]  ;;  %v86_v14 = vld [vmem:[%s7582_s0] sm:$0xff]  ;;  %v4321_v22 = vor.u32 %v4882_v8, %v4318_v9 }
  0x12   :  { %v4888_v13 = vld [vmem:[%s7583_s1 + $0x34] sm:$0xf]  ;;  %796 = vmatpush.bf16.msra.mxu2 %v785_v11  ;;  %v788_v15 = vsel %vm525_vm0, %v4329_v7, 0  ;;  %v4285_v17 = vor.u32 %v4889_v12, %v4284_v10  ;;  %v4286_v18 = vld [vmem:[%s7583_s1 + $0x38] sm:$0x30]  ;;  %v87_v19 = vld [vmem:[%s7582_s0 + $0x8] sm:$0xff]  ;;  %v5222_v20 = vpack.c.bf16 %v86_v14, %v86_v14 }
  0x13   :  { %v4276_v21 = vld [vmem:[%s7583_s1 + $0x20] sm:$0xf]  ;;  %865 = vmatpush.bf16.msra.mxu3 %v788_v15  ;;  %v4289_v23 = vor.u32 %v4888_v13, %v4286_v18  ;;  %v5227_v24 = vpack.c.bf16 %v87_v19, %v87_v19  ;;  %v4887_v25 = vld [vmem:[%s7583_s1 + $0x24] sm:$0xf0]  ;;  %v4886_v26 = vld [vmem:[%s7583_s1 + $0x24] sm:$0xf] }
  0x14   :  { %v4278_v27 = vld [vmem:[%s7583_s1 + $0x28] sm:$0xf0]  ;;  %v527_v28 = vsel %vm525_vm0, %v4285_v17, 0  ;;  %v694_v29 = vunpack.c.l.b16 %v5222_v20  ;;  %v4277_v30 = vor.u32 %v4887_v25, %v4276_v21  ;;  %v88_v32 = vld [vmem:[%s7582_s0 + $0x10] sm:$0xff]  ;;  %v4893_v34 = vld [vmem:[%s7583_s1 + $0x54] sm:$0x30] }
  0x15   :  { %v4281_v31 = vor.u32 %v4886_v26, %v4278_v27  ;;  %v4376_v33 = vld [vmem:[%s7583_s1 + $0x50] sm:$0xf]  ;;  %538 = vmatpush.bf16.msra.mxu0 %v527_v28  ;;  %v530_v35 = vsel %vm525_vm0, %v4289_v23, 0  ;;  %v695_v36 = vunpack.c.l.b16 %v5227_v24  ;;  %v5251_v37 = vpack.c.bf16 %v88_v32, %v88_v32  ;;  %v4892_v46 = vld [vmem:[%s7583_s1 + $0x54] sm:$0xf]  ;;  %v90_v51 = vld [vmem:[%s7582_s0 + $0x20] sm:$0xff] }
  0x16   :  { %v158_v38 = vshrl.u32 %v5222_v20, 16  ;;  %797 = vmatpush.bf16.msra.mxu2 %v4317_v16  ;;  %607 = vmatpush.bf16.msra.mxu1 %v530_v35  ;;  %v161_v39 = vshll.u32 %v5222_v20, 16  ;;  %v167_v40 = vshll.u32 %v5227_v24, 16  ;;  %v171_v41 = vshrl.u32 %v5227_v24, 16  ;;  %v4378_v47 = vld [vmem:[%s7583_s1 + $0x58] sm:$0x30]  ;;  %vm5284_vm4 = vmor %vm154_vm2, %vm155_vm3 }
  0x17   :  { %v4377_v42 = vor.u32 %v4893_v34, %v4376_v33  ;;  %866 = vmatpush.bf16.msra.mxu3 %v4321_v22  ;;  %v718_v43 = vpack.c.b16 %v695_v36, %v694_v29  ;;  %v177_v45 = vshll.u32 %v5251_v37, 16  ;;  %v89_v52 = vld [vmem:[%s7582_s0 + $0x18] sm:$0xf]  ;;  %v91_v56 = vld [vmem:[%s7582_s0 + $0x28] sm:$0xff]  ;;  %v4381_v60 = vor.u32 %v4892_v46, %v4378_v47  ;;  %v92_v22 = vld [vmem:[%s7582_s0 + $0x30] sm:$0xff] }
  0x18   :  { %v160_v44 = vrot.slane %v158_v38, 4  ;;  %v163_v48 = vrot.slane %v161_v39, 5  ;;  %v169_v49 = vrot.slane %v167_v40, 5  ;;  %v173_v50 = vrot.slane %v171_v41, 4  ;;  %v93_v36 = vld [vmem:[%s7582_s0 + $0x38] sm:$0xf] }
  0x19   :  { %4330 = vmatmul.msk.bf16.vlgmr.msra.gmra.mxu2 %vm488_vm1, %v718_v43  ;;  %539 = vmatpush.bf16.msra.mxu0 %v4277_v30  ;;  %v179_v53 = vrot.slane %v177_v45, 5  ;;  %v1313_v54 = vrot.slane %v171_v41, 5  ;;  %v1314_v55 = vrot.slane %v167_v40, 6  ;;  %v1115_v59 = vsel %vm525_vm0, %v4377_v42, 0 }
  0x1a   :  { %4342 = vmatmul.msk.bf16.vlgmr.msra.gmra.mxu3 %vm488_vm1, %v718_v43  ;;  %608 = vmatpush.bf16.msra.mxu1 %v4281_v31  ;;  %v164_v57 = vor.u32 %v163_v48, %v160_v44  ;;  %v174_v58 = vor.u32 %v173_v50, %v169_v49  ;;  %v7663_v61 = vmov 0  ;;  %v5290_v63 = vpack.c.bf16 %v90_v51, %v90_v51  ;;  %v94_v51 = vld [vmem:[%s7582_s0 + $0x40] sm:$0xff] }
  0x1b   :  { %v7664_v61 = vsel %vm5284_vm4, 4294967295, %v7663_v61  ;;  %v5288_v62 = vor.u32 %v1314_v55, %v1313_v54  ;;  %v5292_v0 = vpack.c.bf16 %v89_v52, %v89_v52  ;;  %v1118_v3 = vsel %vm525_vm0, %v4381_v60, 0  ;;  %v95_v54 = vld [vmem:[%s7582_s0 + $0x48] sm:$0xff] }
  0x1c   :  { %7665 = vst [vmem:[#allocation9_spill] sm:$0xff] %v7664_v61  ;;  %v165_v1 = vrot.slane %v164_v57, 4  ;;  %v175_v2 = vrot.slane %v174_v58, 4  ;;  %v5295_v4 = vpack.c.bf16 %v91_v56, %v91_v56  ;;  %v181_v5 = vshrl.u32 %v5251_v37, 16 }
  0x1d   :  { %1126 = vmatpush.bf16.msrb.mxu0 %v1115_v59  ;;  %7666 = vst [vmem:[#allocation10_spill] sm:$0xff] %v5290_v63  ;;  %v7637_v6 = vshrl.u32 %v5290_v63, 16  ;;  %v7636_v9 = vshll.u32 %v5290_v63, 16  ;;  %v7639_v13 = vshll.u32 %v5292_v0, 16  ;;  %v696_v18 = vunpack.c.l.b16 %v5251_v37 }
  0x1e   :  { %7667 = vst [vmem:[#allocation11_spill] sm:$0xff] %v5292_v0  ;;  %1195 = vmatpush.bf16.msrb.mxu1 %v1118_v3  ;;  %v170_v7 = vsel %vm5284_vm4, %v165_v1, %v169_v49  ;;  %v180_v8 = vsel %vm5284_vm4, %v175_v2, %v179_v53  ;;  %v183_v12 = vrot.slane %v181_v5, 4  ;;  %v7638_v16 = vshll.u32 %v5295_v4, 16 }
  0x1f   :  { %7668 = vst [vmem:[#allocation12_spill] sm:$0xff] %v5295_v4  ;;  %v434_v10 = vunpack.c.l.b16 %v170_v7  ;;  %v435_v11 = vunpack.c.l.b16 %v180_v8  ;;  %v194_v14 = vrot.slane %v7637_v6, 4  ;;  %v197_v15 = vrot.slane %v7636_v9, 5  ;;  %v96_v8 = vld [vmem:[%s7582_s0 + $0x50] sm:$0xff]  ;;  %v4422_v9 = vld [vmem:[%s7583_s1 + $0x78] sm:$0x30] }
  0x20   :  { %v697_v19 = vunpack.c.l.b16 %v5290_v63  ;;  %v184_v21 = vor.u32 %v183_v12, %v179_v53  ;;  %v189_v25 = vrot.slane %v7639_v13, 5  ;;  %v203_v28 = vrot.slane %v7638_v16, 5 }
  0x21   :  { %v458_v17 = vpack.c.b16 %v435_v11, %v434_v10  ;;  %v198_v23 = vor.u32 %v197_v15, %v194_v14  ;;  %v5323_v29 = vpack.c.bf16 %v92_v22, %v92_v22  ;;  %v7633_v31 = vshrl.u32 %v5295_v4, 16 }
  0x22   :  { %v185_v26 = vrot.slane %v184_v21, 4  ;;  %v719_v30 = vpack.c.b16 %v697_v19, %v696_v18  ;;  %v5337_v42 = vpack.c.bf16 %v93_v36, %v93_v36  ;;  %v698_v52 = vunpack.c.l.b16 %v5295_v4 }
  0x23   :  { %4290 = vmatmul.msk.bf16.vlgmr.msra.gmra.mxu0 %vm488_vm1, %v458_v17  ;;  %4302 = vmatmul.msk.bf16.vlgmr.msra.gmra.mxu1 %vm488_vm1, %v458_v17  ;;  %v199_v27 = vrot.slane %v198_v23, 4  ;;  %7669 = vst [vmem:[#allocation13_spill] sm:$0xff] %v5323_v29  ;;  %v7629_v34 = vshll.u32 %v5323_v29, 16  ;;  %v7627_v35 = vshrl.u32 %v5323_v29, 16  ;;  %v207_v43 = vrot.slane %v7633_v31, 4 }
  0x24   :  { %v190_v32 = vsel %vm5284_vm4, %v185_v26, %v189_v25  ;;  %7670 = vst [vmem:[#allocation14_spill] sm:$0xff] %v5337_v42  ;;  %v7628_v50 = vshll.u32 %v5337_v42, 16  ;;  %v699_v53 = vunpack.c.l.b16 %v5323_v29  ;;  %v5356_v55 = vpack.c.bf16 %v94_v51, %v94_v51  ;;  %v99_v51 = vld [vmem:[%s7582_s0 + $0x68] sm:$0xff] }
  0x25   :  { %v204_v33 = vsel %vm5284_vm4, %v199_v27, %v203_v28  ;;  %v436_v40 = vunpack.c.l.b16 %v190_v32  ;;  %v213_v44 = vrot.slane %v7629_v34, 5  ;;  %v217_v46 = vrot.slane %v7627_v35, 4 }
  0x26   :  { %v437_v41 = vunpack.c.l.b16 %v204_v33  ;;  %v208_v48 = vor.u32 %v207_v43, %v203_v28  ;;  %v223_v58 = vrot.slane %v7628_v50, 5  ;;  %v5360_v59 = vpack.c.bf16 %v95_v54, %v95_v54 }
  0x27   :  { %v218_v49 = vor.u32 %v217_v46, %v213_v44  ;;  %v720_v60 = vpack.c.b16 %v699_v53, %v698_v52  ;;  %v7624_v1 = vshrl.u32 %v5356_v55, 16  ;;  %v7622_v2 = vshll.u32 %v5356_v55, 16 }
  0x28   :  { %v459_v47 = vpack.c.b16 %v437_v41, %v436_v40  ;;  %v209_v56 = vrot.slane %v208_v48, 4  ;;  %v7626_v10 = vshll.u32 %v5360_v59, 16  ;;  %v7619_v11 = vshrl.u32 %v5360_v59, 16 }
  0x29   :  { %4331 = vmatmul.msk.bf16.gmra.mxu2 %vm488_vm1, %v719_v30  ;;  %v219_v57 = vrot.slane %v218_v49, 4  ;;  %v5375_v15 = vpack.c.bf16 %v96_v8, %v96_v8  ;;  %v228_v17 = vrot.slane %v7624_v1, 4  ;;  %v231_v18 = vrot.slane %v7622_v2, 5 }
  0x2a   :  { %4343 = vmatmul.msk.bf16.gmra.mxu3 %vm488_vm1, %v719_v30  ;;  %v214_v3 = vsel %vm5284_vm4, %v209_v56, %v213_v44  ;;  %v237_v19 = vrot.slane %v7626_v10, 5  ;;  %v241_v21 = vrot.slane %v7619_v11, 4  ;;  %v700_v27 = vunpack.c.l.b16 %v5356_v55  ;;  %v98_v30 = vld [vmem:[%s7582_s0 + $0x60] sm:$0xff] }
  0x2b   :  { %v224_v7 = vsel %vm5284_vm4, %v219_v57, %v223_v58  ;;  %v438_v12 = vunpack.c.l.b16 %v214_v3  ;;  %7671 = vst [vmem:[#allocation15_spill] sm:$0xff] %v5375_v15  ;;  %v232_v23 = vor.u32 %v231_v18, %v228_v17  ;;  %v7625_v26 = vshll.u32 %v5375_v15, 16  ;;  %v100_v17 = vld [vmem:[%s7582_s0 + $0x70] sm:$0xff] }
  0x2c   :  { %v439_v14 = vunpack.c.l.b16 %v224_v7  ;;  %v242_v25 = vor.u32 %v241_v21, %v237_v19  ;;  %v701_v28 = vunpack.c.l.b16 %v5360_v59  ;;  %v5395_v40 = vpack.c.bf16 %v98_v30, %v98_v30 }
  0x2d   :  { %v233_v32 = vrot.slane %v232_v23, 4  ;;  %v247_v36 = vrot.slane %v7625_v26, 5  ;;  %v7616_v43 = vshrl.u32 %v5375_v15, 16  ;;  %v5416_v57 = vpack.c.bf16 %v99_v51, %v99_v51 }
  0x2e   :  { %v460_v22 = vpack.c.b16 %v439_v14, %v438_v12  ;;  %v243_v33 = vrot.slane %v242_v25, 4  ;;  %7672 = vst [vmem:[#allocation16_spill] sm:$0xff] %v5395_v40  ;;  %v721_v41 = vpack.c.b16 %v701_v28, %v700_v27  ;;  %v7612_v48 = vshrl.u32 %v5395_v40, 16 }
  0x2f   :  { %v238_v44 = vsel %vm5284_vm4, %v233_v32, %v237_v19  ;;  %v7608_v49 = vshll.u32 %v5395_v40, 16  ;;  %v251_v56 = vrot.slane %v7616_v43, 4  ;;  %7674 = vst [vmem:[#allocation18_spill] sm:$0xff] %v5416_v57  ;;  %v7614_v14 = vshll.u32 %v5416_v57, 16 }
  0x30   :  { %v248_v46 = vsel %vm5284_vm4, %v243_v33, %v247_v36  ;;  %v440_v52 = vunpack.c.l.b16 %v238_v44  ;;  %v262_v58 = vrot.slane %v7612_v48, 4  ;;  %v702_v18 = vunpack.c.l.b16 %v5375_v15  ;;  %v101_v44 = vld [vmem:[%s7582_s0 + $0x78] sm:$0xf] }
  0x31   :  { %v441_v53 = vunpack.c.l.b16 %v248_v46  ;;  %v252_v7 = vor.u32 %v251_v56, %v247_v36  ;;  %v703_v19 = vunpack.c.l.b16 %v5395_v40  ;;  %v5433_v23 = vpack.c.bf16 %v100_v17, %v100_v17 }
  0x32   :  { %v271_v27 = vrot.slane %v7614_v14, 5  ;;  %v7607_v30 = vshrl.u32 %v5416_v57, 16  ;;  %vm1306_vm5 = vsmask.f32 2304  ;;  %vm1307_vm6 = vsmask.f32 6416 }
  0x33   :  { %4291 = vmatmul.msk.bf16.gmra.mxu0 %vm488_vm1, %v459_v47  ;;  %4303 = vmatmul.msk.bf16.gmra.mxu1 %vm488_vm1, %v459_v47  ;;  %v97_v47 = vld [vmem:[%s7582_s0 + $0x58] sm:$0xf]  ;;  %v461_v3 = vpack.c.b16 %v441_v53, %v440_v52  ;;  %v253_v21 = vrot.slane %v252_v7, 4  ;;  %7675 = vst [vmem:[#allocation19_spill] sm:$0xff] %v5433_v23  ;;  %v722_v28 = vpack.c.b16 %v703_v19, %v702_v18  ;;  %v7601_v33 = vshll.u32 %v5433_v23, 16  ;;  %v102_v18 = vld [vmem:[%s7582_s0 + $0x80] sm:$0xff]  ;;  %vm5752_vm7 = vmor %vm1306_vm5, %vm1307_vm6 }
  0x34   :  { %v5412_v54 = vpack.c.bf16 %v97_v47, %v97_v47  ;;  %v7599_v36 = vshrl.u32 %v5433_v23, 16  ;;  %v275_v47 = vrot.slane %v7607_v30, 4  ;;  %v5451_v52 = vpack.c.bf16 %v101_v44, %v101_v44  ;;  %v103_v19 = vld [vmem:[%s7582_s0 + $0x88] sm:$0xff] }
  0x35   :  { %v281_v53 = vrot.slane %v7601_v33, 5  ;;  %v705_v17 = vunpack.c.l.b16 %v5433_v23  ;;  %vm936_vm8 = vcmask 1042432   ;;  %vm937_vm9 = vcmask 1046532  }
  0x36   :  { %7673 = vst [vmem:[#allocation17_spill] sm:$0xff] %v5412_v54  ;;  %v7615_v8 = vshll.u32 %v5412_v54, 16  ;;  %v285_v56 = vrot.slane %v7599_v36, 4  ;;  %v7600_v7 = vshll.u32 %v5451_v52, 16  ;;  %vm5834_vm10 = vmor %vm936_vm8, %vm937_vm9  ;;  %vm1756_vm11 = vcmask 1041408  }
  0x37   :  { %7676 = vst [vmem:[#allocation20_spill] sm:$0xff] %v5451_v52  ;;  %vm1757_vm12 = vcmask 1045508   ;;  %vm2559_vm14 = vcmask 1043456   ;;  %vm2532_vm15 = vcmask 1040384   ;;  %vm2568_vm2 = vcmask 1044480  }
  0x38   :  { %vm6259_vm13 = vmor %vm1756_vm11, %vm1757_vm12  ;;  %vm2585_vm3 = vcmask 1046528   ;;  %vm3940_vm5 = vcmask 1042434   ;;  %vm3943_vm6 = vcmask 1043459   ;;  %vm3952_vm9 = vcmask 1046534  }
  0x39   :  { %4332 = vmatmul.msk.bf16.gmra.mxu2 %vm488_vm1, %v720_v60 }
  0x3a   :  { %4344 = vmatmul.msk.bf16.gmra.mxu3 %vm488_vm1, %v720_v60  ;;  %v265_v60 = vrot.slane %v7608_v49, 5 }
  0x3c   :  { %v266_v12 = vor.u32 %v265_v60, %v262_v58  ;;  %v276_v58 = vor.u32 %v275_v47, %v271_v27  ;;  %v4370_v47 = vld [vmem:[%s7583_s1 + $0x48] sm:$0xf0] }
  0x3e   :  { %v267_v25 = vrot.slane %v266_v12, 4  ;;  %v704_v12 = vunpack.c.l.b16 %v5416_v57 }
  0x43   :  { %4292 = vmatmul.msk.bf16.gmra.mxu0 %vm488_vm1, %v460_v22  ;;  %4304 = vmatmul.msk.bf16.gmra.mxu1 %vm488_vm1, %v460_v22  ;;  %v257_v22 = vrot.slane %v7615_v8, 5 }
  0x45   :  { %v258_v32 = vsel %vm5284_vm4, %v253_v21, %v257_v22  ;;  %v277_v21 = vrot.slane %v276_v58, 4 }
  0x46   :  { %v442_v46 = vunpack.c.l.b16 %v258_v32  ;;  %v5476_v32 = vpack.c.bf16 %v102_v18, %v102_v18 }
  0x47   :  { %v282_v58 = vsel %vm5284_vm4, %v277_v21, %v281_v53 }
  0x48   :  { %v7595_v18 = vshrl.u32 %v5476_v32, 16 }
  0x49   :  { %4333 = vmatmul.msk.bf16.gmra.mxu2 %vm488_vm1, %v721_v41 }
  0x4a   :  { %4345 = vmatmul.msk.bf16.gmra.mxu3 %vm488_vm1, %v721_v41  ;;  %v272_v41 = vsel %vm5284_vm4, %v267_v25, %v271_v27  ;;  %v291_v25 = vrot.slane %v7600_v7, 5  ;;  %v4368_v27 = vld [vmem:[%s7583_s1 + $0x40] sm:$0xf] }
  0x4b   :  { %v443_v51 = vunpack.c.l.b16 %v272_v41  ;;  %v5478_v41 = vpack.c.bf16 %v103_v19, %v103_v19  ;;  %v7594_v19 = vshll.u32 %v5476_v32, 16 }
  0x4d   :  { %v462_v60 = vpack.c.b16 %v443_v51, %v442_v46  ;;  %v4890_v46 = vld [vmem:[%s7583_s1 + $0x44] sm:$0xf]  ;;  %v723_v51 = vpack.c.b16 %v705_v17, %v704_v12  ;;  %v7596_v12 = vshrl.u32 %v5478_v41, 16 }
  0x53   :  { %4293 = vmatmul.msk.bf16.gmra.mxu0 %vm488_vm1, %v461_v3  ;;  %4305 = vmatmul.msk.bf16.gmra.mxu1 %vm488_vm1, %v461_v3  ;;  %v286_v3 = vor.u32 %v285_v56, %v281_v53  ;;  %v4373_v56 = vor.u32 %v4890_v46, %v4370_v47  ;;  %v444_v53 = vunpack.c.l.b16 %v282_v58  ;;  %v706_v58 = vunpack.c.l.b16 %v5476_v32 }
  0x55   :  { %v287_v22 = vrot.slane %v286_v3, 4  ;;  %1196 = vmatpush.bf16.msrb.mxu1 %v4373_v56  ;;  %v104_v3 = vld [vmem:[%s7582_s0 + $0x90] sm:$0xff] }
  0x56   :  { %v5499_v21 = vpack.c.bf16 %v104_v3, %v104_v3  ;;  %v106_v3 = vld [vmem:[%s7582_s0 + $0xa0] sm:$0xff] }
  0x59   :  { %4334 = vmatmul.msk.bf16.gmra.mxu2 %vm488_vm1, %v722_v28 }
  0x5a   :  { %4346 = vmatmul.msk.bf16.gmra.mxu3 %vm488_vm1, %v722_v28  ;;  %v4891_v28 = vld [vmem:[%s7583_s1 + $0x44] sm:$0xf0] }
  0x5b   :  { %v4369_v44 = vor.u32 %v4891_v28, %v4368_v27  ;;  %v7598_v27 = vshll.u32 %v5478_v41, 16 }
  0x5d   :  { %1127 = vmatpush.bf16.msrb.mxu0 %v4369_v44  ;;  %v305_v28 = vrot.slane %v7598_v27, 5  ;;  %v309_v44 = vrot.slane %v7596_v12, 4 }
  0x5f   :  { %v310_v56 = vor.u32 %v309_v44, %v305_v28 }
  0x63   :  { %4294 = vmatmul.msk.bf16.gmra.mxu0 %vm488_vm1, %v462_v60  ;;  %4306 = vmatmul.msk.bf16.gmra.mxu1 %vm488_vm1, %v462_v60  ;;  %v292_v60 = vsel %vm5284_vm4, %v287_v22, %v291_v25  ;;  %v296_v22 = vrot.slane %v7595_v18, 4  ;;  %v299_v25 = vrot.slane %v7594_v19, 5  ;;  %v311_v18 = vrot.slane %v310_v56, 4 }
  0x64   :  { %v445_v17 = vunpack.c.l.b16 %v292_v60  ;;  %v707_v60 = vunpack.c.l.b16 %v5478_v41 }
  0x65   :  { %v300_v47 = vor.u32 %v299_v25, %v296_v22  ;;  %v7604_v25 = vshrl.u32 %v5499_v21, 16 }
  0x66   :  { %v463_v46 = vpack.c.b16 %v445_v17, %v444_v53  ;;  %v5519_v17 = vpack.c.bf16 %v106_v3, %v106_v3  ;;  %v724_v22 = vpack.c.b16 %v707_v60, %v706_v58  ;;  %v107_v58 = vld [vmem:[%s7582_s0 + $0xa8] sm:$0xff] }
  0x67   :  { %v301_v19 = vrot.slane %v300_v47, 4  ;;  %v5540_v3 = vpack.c.bf16 %v107_v58, %v107_v58  ;;  %v108_v58 = vld [vmem:[%s7582_s0 + $0xb0] sm:$0xff] }
  0x68   :  { %7677 = vst [vmem:[#allocation21_spill] sm:$0xff] %v5519_v17  ;;  %v7603_v47 = vshrl.u32 %v5519_v17, 16  ;;  %v7602_v56 = vshll.u32 %v5519_v17, 16 }
  0x69   :  { %4335 = vmatmul.msk.bf16.gmra.mxu2 %vm488_vm1, %v723_v51  ;;  %v306_v44 = vsel %vm5284_vm4, %v301_v19, %v305_v28  ;;  %7679 = vst [vmem:[#allocation23_spill] sm:$0xff] %v5540_v3 }
  0x6a   :  { %4347 = vmatmul.msk.bf16.gmra.mxu3 %vm488_vm1, %v723_v51  ;;  %v7597_v51 = vshll.u32 %v5499_v21, 16  ;;  %v446_v19 = vunpack.c.l.b16 %v306_v44  ;;  %v333_v27 = vrot.slane %v7602_v56, 5  ;;  %v708_v44 = vunpack.c.l.b16 %v5499_v21 }
  0x6c   :  { %v315_v53 = vrot.slane %v7597_v51, 5  ;;  %v330_v51 = vrot.slane %v7603_v47, 4 }
  0x6e   :  { %v316_v12 = vsel %vm5284_vm4, %v311_v18, %v315_v53  ;;  %v319_v18 = vrot.slane %v7604_v25, 4  ;;  %v7611_v25 = vshrl.u32 %v5540_v3, 16 }
  0x6f   :  { %v447_v28 = vunpack.c.l.b16 %v316_v12  ;;  %v7605_v12 = vshll.u32 %v5540_v3, 16 }
  0x70   :  { %v320_v7 = vor.u32 %v319_v18, %v315_v53 }
  0x71   :  { %v464_v36 = vpack.c.b16 %v447_v28, %v446_v19 }
  0x72   :  { %v321_v56 = vrot.slane %v320_v7, 4 }
  0x73   :  { %4295 = vmatmul.msk.bf16.gmra.mxu0 %vm488_vm1, %v463_v46  ;;  %4307 = vmatmul.msk.bf16.gmra.mxu1 %vm488_vm1, %v463_v46  ;;  %v105_v46 = vld [vmem:[%s7582_s0 + $0x98] sm:$0xf] }
  0x74   :  { %v5536_v60 = vpack.c.bf16 %v105_v46, %v105_v46  ;;  %v709_v46 = vunpack.c.l.b16 %v5519_v17 }
  0x76   :  { %7678 = vst [vmem:[#allocation22_spill] sm:$0xff] %v5536_v60  ;;  %v7606_v33 = vshll.u32 %v5536_v60, 16  ;;  %v725_v28 = vpack.c.b16 %v709_v46, %v708_v44 }
  0x78   :  { %v325_v53 = vrot.slane %v7606_v33, 5 }
  0x79   :  { %4336 = vmatmul.msk.bf16.gmra.mxu2 %vm488_vm1, %v724_v22 }
  0x7a   :  { %4348 = vmatmul.msk.bf16.gmra.mxu3 %vm488_vm1, %v724_v22  ;;  %v334_v22 = vor.u32 %v333_v27, %v330_v51  ;;  %v339_v27 = vrot.slane %v7605_v12, 5  ;;  %v5559_v51 = vpack.c.bf16 %v108_v58, %v108_v58  ;;  %v326_v18 = vsel %vm5284_vm4, %v321_v56, %v325_v53 }
  0x7b   :  { %v448_v44 = vunpack.c.l.b16 %v326_v18  ;;  %v343_v58 = vrot.slane %v7611_v25, 4 }
  0x7c   :  { %v335_v19 = vrot.slane %v334_v22, 4  ;;  %7680 = vst [vmem:[#allocation24_spill] sm:$0xff] %v5559_v51  ;;  %v7609_v7 = vshrl.u32 %v5559_v51, 16  ;;  %v109_v22 = vld [vmem:[%s7582_s0 + $0xb8] sm:$0xf]  ;;  %v711_v18 = vunpack.c.l.b16 %v5559_v51 }
  0x7d   :  { %v5573_v56 = vpack.c.bf16 %v109_v22, %v109_v22  ;;  %v344_v33 = vor.u32 %v343_v58, %v339_v27  ;;  %v111_v22 = vld [vmem:[%s7582_s0 + $0xc8] sm:$0xff] }
  0x7e   :  { %v340_v47 = vsel %vm5284_vm4, %v335_v19, %v339_v27  ;;  %v353_v19 = vrot.slane %v7609_v7, 4 }
  0x7f   :  { %v449_v46 = vunpack.c.l.b16 %v340_v47  ;;  %7681 = vst [vmem:[#allocation25_spill] sm:$0xff] %v5573_v56  ;;  %v7613_v49 = vshll.u32 %v5573_v56, 16  ;;  %v110_v47 = vld [vmem:[%s7582_s0 + $0xc0] sm:$0xff] }
  0x80   :  { %v5592_v27 = vpack.c.bf16 %v110_v47, %v110_v47 }
  0x81   :  { %v465_v12 = vpack.c.b16 %v449_v46, %v448_v44  ;;  %v345_v44 = vrot.slane %v344_v33, 4  ;;  %v359_v58 = vrot.slane %v7613_v49, 5  ;;  %v112_v33 = vld [vmem:[%s7582_s0 + $0xd0] sm:$0xff] }
  0x82   :  { %v7618_v25 = vshll.u32 %v5592_v27, 16 }
  0x83   :  { %4296 = vmatmul.msk.bf16.gmra.mxu0 %vm488_vm1, %v464_v36  ;;  %4308 = vmatmul.msk.bf16.gmra.mxu1 %vm488_vm1, %v464_v36  ;;  %v7610_v36 = vshll.u32 %v5559_v51, 16 }
  0x85   :  { %v349_v53 = vrot.slane %v7610_v36, 5  ;;  %v7617_v36 = vshrl.u32 %v5592_v27, 16 }
  0x87   :  { %v354_v30 = vor.u32 %v353_v19, %v349_v53  ;;  %v5596_v19 = vpack.c.bf16 %v111_v22, %v111_v22  ;;  %v350_v48 = vsel %vm5284_vm4, %v345_v44, %v349_v53  ;;  %v364_v53 = vrot.slane %v7617_v36, 4 }
  0x88   :  { %v367_v22 = vrot.slane %v7618_v25, 5  ;;  %v114_v25 = vld [vmem:[%s7582_s0 + $0xe0] sm:$0xff] }
  0x89   :  { %4337 = vmatmul.msk.bf16.gmra.mxu2 %vm488_vm1, %v725_v28  ;;  %v355_v46 = vrot.slane %v354_v30, 4  ;;  %v7620_v47 = vshll.u32 %v5596_v19, 16  ;;  %v7621_v30 = vshrl.u32 %v5596_v19, 16 }
  0x8a   :  { %4349 = vmatmul.msk.bf16.gmra.mxu3 %vm488_vm1, %v725_v28  ;;  %v710_v28 = vunpack.c.l.b16 %v5540_v3 }
  0x8b   :  { %v377_v49 = vrot.slane %v7621_v30, 4  ;;  %v713_v30 = vunpack.c.l.b16 %v5596_v19 }
  0x8c   :  { %v726_v7 = vpack.c.b16 %v711_v18, %v710_v28  ;;  %v450_v28 = vunpack.c.l.b16 %v350_v48 }
  0x93   :  { %4297 = vmatmul.msk.bf16.gmra.mxu0 %vm488_vm1, %v465_v12  ;;  %4309 = vmatmul.msk.bf16.gmra.mxu1 %vm488_vm1, %v465_v12  ;;  %v360_v12 = vsel %vm5284_vm4, %v355_v46, %v359_v58  ;;  %v5615_v46 = vpack.c.bf16 %v112_v33, %v112_v33  ;;  %v373_v58 = vrot.slane %v7620_v47, 5  ;;  %v712_v47 = vunpack.c.l.b16 %v5592_v27 }
  0x94   :  { %v451_v18 = vunpack.c.l.b16 %v360_v12 }
  0x95   :  { %v378_v43 = vor.u32 %v377_v49, %v373_v58  ;;  %v7623_v36 = vshll.u32 %v5615_v46, 16  ;;  %v5633_v49 = vpack.c.bf16 %v114_v25, %v114_v25 }
  0x96   :  { %v466_v8 = vpack.c.b16 %v451_v18, %v450_v28 }
  0x97   :  { %v7632_v25 = vshll.u32 %v5633_v49, 16 }
  0x99   :  { %4338 = vmatmul.msk.bf16.gmra.mxu2 %vm488_vm1, %v726_v7 }
  0x9a   :  { %4350 = vmatmul.msk.bf16.gmra.mxu3 %vm488_vm1, %v726_v7  ;;  %v368_v7 = vor.u32 %v367_v22, %v364_v53  ;;  %v379_v53 = vrot.slane %v378_v43, 4  ;;  %v383_v22 = vrot.slane %v7623_v36, 5 }
  0x9c   :  { %v799_v44 = vpop.f32.mrf.mxu2  ;;  %v369_v28 = vrot.slane %v368_v7, 4  ;;  %v384_v36 = vsel %vm5284_vm4, %v379_v53, %v383_v22 }
  0x9d   :  { %v868_v14 = vpop.f32.mrf.mxu3  ;;  %v453_v10 = vunpack.c.l.b16 %v384_v36 }
  0x9e   :  { %v374_v2 = vsel %vm5284_vm4, %v369_v28, %v373_v58 }
  0x9f   :  { %v452_v26 = vunpack.c.l.b16 %v374_v2  ;;  %v116_v2 = vld [vmem:[%s7582_s0 + $0xf0] sm:$0xff] }
  0xa0   :  { %v541_v48 = vpop.f32.mrf.mxu0  ;;  %v610_v12 = vpop.f32.mrf.mxu1 }
  0xa1   :  { %v5625_v33 = vadd.f32 %v799_v44, %v541_v48  ;;  %v5627_v11 = vadd.f32 %v868_v14, %v610_v12  ;;  %v727_v48 = vpack.c.b16 %v713_v30, %v712_v47  ;;  %v7630_v14 = vshrl.u32 %v5615_v46, 16  ;;  %v113_v12 = vld [vmem:[%s7582_s0 + $0xd8] sm:$0xf]  ;;  %v115_v47 = vld [vmem:[%s7582_s0 + $0xe8] sm:$0xff] }
  0xa2   :  { %v5655_v58 = vpack.c.bf16 %v113_v12, %v113_v12  ;;  %v5660_v53 = vpack.c.bf16 %v115_v47, %v115_v47  ;;  %v467_v50 = vpack.c.b16 %v453_v10, %v452_v26  ;;  %v714_v47 = vunpack.c.l.b16 %v5615_v46 }
  0xa3   :  { %4298 = vmatmul.msk.bf16.gmra.mxu0 %vm488_vm1, %v466_v8  ;;  %4310 = vmatmul.msk.bf16.gmra.mxu1 %vm488_vm1, %v466_v8  ;;  %v7631_v8 = vshrl.u32 %v5633_v49, 16  ;;  %v387_v28 = vrot.slane %v7630_v14, 4  ;;  %v1309_v10 = vrot.slane %v158_v38, 5  ;;  %v1310_v26 = vrot.slane %v161_v39, 6  ;;  %v117_v38 = vld [vmem:[%s7582_s0 + $0xf8] sm:$0xf] }
  0xa4   :  { %v801_v18 = vpop.f32.mrf.mxu2  ;;  %v7635_v12 = vshll.u32 %v5655_v58, 16  ;;  %v7634_v14 = vshll.u32 %v5660_v53, 16 }
  0xa5   :  { %v870_v44 = vpop.f32.mrf.mxu3  ;;  %v398_v35 = vrot.slane %v7631_v8, 4  ;;  %v715_v8 = vunpack.c.l.b16 %v5633_v49  ;;  %v1311_v39 = vor.u32 %v1310_v26, %v1309_v10 }
  0xa8   :  { %v543_v7 = vpop.f32.mrf.mxu0  ;;  %v612_v43 = vpop.f32.mrf.mxu1 }
  0xa9   :  { %v5650_v30 = vadd.f32 %v801_v18, %v543_v7  ;;  %v5652_v1 = vadd.f32 %v870_v44, %v612_v43  ;;  %4339 = vmatmul.msk.bf16.gmra.mxu2 %vm488_vm1, %v727_v48  ;;  %v401_v18 = vrot.slane %v7632_v25, 5  ;;  %v388_v43 = vor.u32 %v387_v28, %v383_v22 }
  0xaa   :  { %4351 = vmatmul.msk.bf16.gmra.mxu3 %vm488_vm1, %v727_v48  ;;  %v5683_v28 = vpack.c.bf16 %v116_v2, %v116_v2  ;;  %v1318_v2 = vrot.slane %v181_v5, 5 }
  0xab   :  { %7682 = vst [vmem:[#allocation26_spill] sm:$0xff] %v5650_v30  ;;  %v402_v34 = vor.u32 %v401_v18, %v398_v35  ;;  %v389_v22 = vrot.slane %v388_v43, 4  ;;  %v393_v35 = vrot.slane %v7635_v12, 5  ;;  %v1319_v18 = vrot.slane %v177_v45, 6  ;;  %v4420_v45 = vld [vmem:[%s7583_s1 + $0x70] sm:$0xf] }
  0xac   :  { %7683 = vst [vmem:[#allocation27_spill] sm:$0xff] %v5652_v1  ;;  %v804_v44 = vpop.f32.mrf.mxu2  ;;  %v7641_v6 = vshll.u32 %v5683_v28, 16  ;;  %v7640_v16 = vshrl.u32 %v5683_v28, 16 }
  0xad   :  { %v873_v7 = vpop.f32.mrf.mxu3 }
  0xb0   :  { %v546_v36 = vpop.f32.mrf.mxu0  ;;  %v615_v48 = vpop.f32.mrf.mxu1 }
  0xb1   :  { %v5673_v25 = vadd.f32 %v804_v44, %v546_v36  ;;  %v5675_v31 = vadd.f32 %v873_v7, %v615_v48  ;;  %v403_v44 = vrot.slane %v402_v34, 4  ;;  %v5691_v7 = vrot.slane %v7634_v14, 5  ;;  %v4896_v34 = vld [vmem:[%s7583_s1 + $0x74] sm:$0xf] }
  0xb2   :  { %v728_v48 = vpack.c.b16 %v715_v8, %v714_v47  ;;  %v394_v14 = vsel %vm5284_vm4, %v389_v22, %v393_v35  ;;  %v4425_v13 = vor.u32 %v4896_v34, %v4422_v9  ;;  %v7687_v8 = vshrl.u32 %v5660_v53, 16 }
  0xb3   :  { %7684 = vst [vmem:[#allocation28_spill] sm:$0xff] %v5673_v25  ;;  %4299 = vmatmul.msk.bf16.gmra.mxu0 %vm488_vm1, %v467_v50  ;;  %4311 = vmatmul.msk.bf16.gmra.mxu1 %vm488_vm1, %v467_v50  ;;  %v4897_v50 = vld [vmem:[%s7583_s1 + $0x74] sm:$0x30]  ;;  %v408_v5 = vsel %vm5284_vm4, %v403_v44, %v5691_v7  ;;  %v1312_v9 = vrot.slane %v1311_v39, 4  ;;  %v4412_v44 = vld [vmem:[%s7583_s1 + $0x60] sm:$0xf] }
  0xb4   :  { %7685 = vst [vmem:[#allocation29_spill] sm:$0xff] %v5675_v31  ;;  %v806_v43 = vpop.f32.mrf.mxu2  ;;  %v4421_v12 = vor.u32 %v4897_v50, %v4420_v45  ;;  %v5718_v31 = vpack.c.bf16 %v117_v38, %v117_v38  ;;  %v411_v47 = vrot.slane %v7687_v8, 4  ;;  %v1568_v50 = vsel %vm525_vm0, %v4425_v13, 0  ;;  %v4894_v13 = vld [vmem:[%s7583_s1 + $0x64] sm:$0xf] }
  0xb5   :  { %v875_v36 = vpop.f32.mrf.mxu3  ;;  %1645 = vmatpush.bf16.msrb.mxu3 %v1568_v50  ;;  %v5738_v38 = vor.u32 %v1319_v18, %v1318_v2  ;;  %v5743_v39 = vrot.slane %v7641_v6, 5  ;;  %v1317_v18 = vrot.slane %v5288_v62, 4  ;;  %v454_v2 = vunpack.c.l.b16 %v394_v14  ;;  %v4626_v8 = vld [vmem:[%s7585_s3 + $0xb0] sm:$0xf] }
  0xb6   :  { %7686 = vst [vmem:[#allocation30_spill] sm:$0xff] %v5718_v31  ;;  %v1565_v22 = vsel %vm525_vm0, %v4421_v12, 0  ;;  %v4895_v12 = vld [vmem:[%s7583_s1 + $0x64] sm:$0xf0]  ;;  %v412_v6 = vor.u32 %v411_v47, %v5691_v7  ;;  %v717_v7 = vunpack.c.l.b16 %v5683_v28  ;;  %v7695_v47 = vshll.u32 %v5295_v4, 16 }
  0xb7   :  { %1576 = vmatpush.bf16.msrb.mxu2 %v1565_v22  ;;  %v4413_v34 = vor.u32 %v4895_v12, %v4412_v44  ;;  %v1321_v50 = vsel %vm5752_vm7, %v1317_v18, %v5738_v38 }
  0xb8   :  { %v548_v35 = vpop.f32.mrf.mxu0  ;;  %v617_v45 = vpop.f32.mrf.mxu1 }
  0xb9   :  { %v5724_v10 = vadd.f32 %v806_v43, %v548_v35  ;;  %v5726_v26 = vadd.f32 %v875_v36, %v617_v45  ;;  %4340 = vmatmul.msk.bf16.gmra.mxu2 %vm488_vm1, %v728_v48  ;;  %v421_v43 = vrot.slane %v7640_v16, 4  ;;  %v4414_v36 = vld [vmem:[%s7583_s1 + $0x68] sm:$0xf0]  ;;  %v1316_v35 = vsel %vm5752_vm7, %v1312_v9, %v5288_v62 }
  0xba   :  { %4352 = vmatmul.msk.bf16.gmra.mxu3 %vm488_vm1, %v728_v48  ;;  %v455_v48 = vunpack.c.l.b16 %v408_v5  ;;  %v4417_v22 = vor.u32 %v4894_v13, %v4414_v36  ;;  %v1474_v44 = vunpack.c.l.b16 %v1316_v35  ;;  %v1475_v16 = vunpack.c.l.b16 %v1321_v50 }
  0xbb   :  { %7688 = vst [vmem:[#allocation31_spill] sm:$0xff] %v5724_v10  ;;  %1577 = vmatpush.bf16.msrb.mxu2 %v4413_v34  ;;  %v422_v14 = vor.u32 %v421_v43, %v5743_v39  ;;  %v7642_v5 = vshll.u32 %v5718_v31, 16  ;;  %v7692_v62 = vshll.u32 %v5292_v0, 16  ;;  %v1334_v43 = vrot.slane %v7695_v47, 6 }
  0xbc   :  { %7689 = vst [vmem:[#allocation32_spill] sm:$0xff] %v5726_v26  ;;  %v809_v45 = vpop.f32.mrf.mxu2  ;;  %1646 = vmatpush.bf16.msrb.mxu3 %v4417_v22  ;;  %v468_v13 = vpack.c.b16 %v455_v48, %v454_v2  ;;  %v5766_v36 = vpack.c.b16 %v1475_v16, %v1474_v44  ;;  %v716_v22 = vunpack.c.l.b16 %v5660_v53  ;;  %v413_v35 = vrot.slane %v412_v6, 4  ;;  %v4901_v48 = vld [vmem:[%s7583_s1 + $0x94] sm:$0x30]  ;;  %v4900_v6 = vld [vmem:[%s7583_s1 + $0x94] sm:$0xf] }
  0xbd   :  { %v878_v12 = vpop.f32.mrf.mxu3  ;;  %v1326_v9 = vrot.slane %v7692_v62, 6  ;;  %v423_v2 = vrot.slane %v422_v14, 4  ;;  %v427_v16 = vrot.slane %v7642_v5, 5  ;;  %v4474_v44 = vld [vmem:[%s7583_s1 + $0x98] sm:$0x30]  ;;  %v7696_v14 = vshrl.u32 %v5290_v63, 16 }
  0xbe   :  { %v7697_v62 = vshll.u32 %v5290_v63, 16  ;;  %v729_v5 = vpack.c.b16 %v717_v7, %v716_v22  ;;  %v418_v30 = vsel %vm5284_vm4, %v413_v35, %v5743_v39  ;;  %v1322_v7 = vrot.slane %v5738_v38, 4 }
  0xc0   :  { %v551_v34 = vpop.f32.mrf.mxu0  ;;  %v620_v26 = vpop.f32.mrf.mxu1 }
  0xc1   :  { %v5770_v10 = vadd.f32 %v809_v45, %v551_v34  ;;  %v5772_v18 = vadd.f32 %v878_v12, %v620_v26  ;;  %v4472_v26 = vld [vmem:[%s7583_s1 + $0x90] sm:$0xf]  ;;  %v1323_v12 = vshrl.u32 %v5292_v0, 16  ;;  %v1330_v34 = vrot.slane %v7697_v62, 6 }
  0xc2   :  { %v4473_v50 = vor.u32 %v4901_v48, %v4472_v26  ;;  %v7698_v26 = vshrl.u32 %v5295_v4, 16 }
  0xc3   :  { %7693 = vst [vmem:[#allocation33_spill] sm:$0xff] %v5770_v10  ;;  %4300 = vmatmul.msk.bf16.gmra.mxu0 %vm488_vm1, %v468_v13  ;;  %4312 = vmatmul.msk.bf16.gmra.mxu1 %vm488_vm1, %v468_v13  ;;  %v1329_v13 = vrot.slane %v7696_v14, 5  ;;  %v1325_v25 = vrot.slane %v1323_v12, 5  ;;  %v428_v14 = vsel %vm5284_vm4, %v423_v2, %v427_v16 }
  0xc4   :  { %7694 = vst [vmem:[#allocation34_spill] sm:$0xff] %v5772_v18  ;;  %v811_v45 = vpop.f32.mrf.mxu2  ;;  %v4477_v18 = vor.u32 %v4900_v6, %v4474_v44  ;;  %v1935_v10 = vsel %vm525_vm0, %v4473_v50, 0  ;;  %v1333_v48 = vrot.slane %v7698_v26, 5  ;;  %v457_v35 = vunpack.c.l.b16 %v428_v14 }
  0xc5   :  { %v880_v47 = vpop.f32.mrf.mxu3  ;;  %v1331_v1 = vor.u32 %v1330_v34, %v1329_v13  ;;  %1946 = vmatpush.bf16.msra.mxu0 %v1935_v10  ;;  %v1327_v6 = vor.u32 %v1326_v9, %v1325_v25  ;;  %v7700_v26 = vshll.u32 %v5337_v42, 16  ;;  %v4354_v14 = vrot.slane %v5222_v20, 9 }
  0xc6   :  { %v1938_v62 = vsel %vm525_vm0, %v4477_v18, 0  ;;  %v1335_v44 = vor.u32 %v1334_v43, %v1333_v48  ;;  %v456_v18 = vunpack.c.l.b16 %v418_v30  ;;  %v7699_v30 = vshll.u32 %v5323_v29, 16 }
  0xc7   :  { %2015 = vmatpush.bf16.msra.mxu1 %v1938_v62  ;;  %v1332_v50 = vrot.slane %v1331_v1, 4  ;;  %v1328_v10 = vsel %vm5752_vm7, %v1322_v7, %v1327_v6  ;;  %v1346_v48 = vrot.slane %v7700_v26, 6  ;;  %v944_v6 = vrot.slane %v5251_v37, 5 }
  0xc8   :  { %v553_v31 = vpop.f32.mrf.mxu0  ;;  %v622_v22 = vpop.f32.mrf.mxu1  ;;  %v1476_v38 = vunpack.c.l.b16 %v1328_v10  ;;  %v469_v43 = vpack.c.b16 %v457_v35, %v456_v18 }
  0xc9   :  { %v5809_v12 = vadd.f32 %v811_v45, %v553_v31  ;;  %v5811_v13 = vadd.f32 %v880_v47, %v622_v22  ;;  %4341 = vmatmul.msk.bf16.gmra.mxu2 %vm488_vm1, %v729_v5  ;;  %v1336_v39 = vsel %vm5752_vm7, %v1332_v50, %v1335_v44  ;;  %v941_v45 = vrot.slane %v5227_v24, 5 }
  0xca   :  { %4353 = vmatmul.msk.bf16.gmra.mxu3 %vm488_vm1, %v729_v5  ;;  %v1477_v25 = vunpack.c.l.b16 %v1336_v39  ;;  %v1339_v47 = vrot.slane %v7699_v30, 6  ;;  %v7703_v50 = vshrl.u32 %v5323_v29, 16  ;;  %v1343_v39 = vshrl.u32 %v5337_v42, 16 }
  0xcb   :  { %v943_v7 = vrot.slane %v941_v45, 4 }
  0xcc   :  { %v814_v1 = vpop.f32.mrf.mxu2  ;;  %v5819_v31 = vpack.c.b16 %v1477_v25, %v1476_v38  ;;  %v1338_v10 = vrot.slane %v7703_v50, 5  ;;  %v1345_v38 = vrot.slane %v1343_v39, 5  ;;  %v942_v25 = vsel %vm5834_vm10, %v4354_v14, %v941_v45 }
  0xcd   :  { %v883_v9 = vpop.f32.mrf.mxu3  ;;  %v1024_v14 = vunpack.c.l.b16 %v942_v25 }
  0xce   :  { %v1340_v35 = vor.u32 %v1339_v47, %v1338_v10  ;;  %v1347_v30 = vor.u32 %v1346_v48, %v1345_v38 }
  0xd0   :  { %v556_v2 = vpop.f32.mrf.mxu0  ;;  %v625_v16 = vpop.f32.mrf.mxu1 }
  0xd1   :  { %v5822_v5 = vadd.f32 %v814_v1, %v556_v2  ;;  %v5824_v34 = vadd.f32 %v883_v9, %v625_v16  ;;  %v1337_v2 = vrot.slane %v1335_v44, 4  ;;  %v1342_v16 = vrot.slane %v1340_v35, 4 }
  0xd3   :  { %4301 = vmatmul.msk.bf16.gmra.mxu0 %vm488_vm1, %v469_v43  ;;  %4313 = vmatmul.msk.bf16.gmra.mxu1 %vm488_vm1, %v469_v43  ;;  %v945_v43 = vsel %vm5834_vm10, %v943_v7, %v944_v6  ;;  %v1341_v45 = vsel %vm5752_vm7, %v1337_v2, %v1340_v35  ;;  %v1348_v47 = vsel %vm5752_vm7, %v1342_v16, %v1347_v30  ;;  %v7706_v35 = vshll.u32 %v5360_v59, 16 }
  0xd4   :  { %v816_v62 = vpop.f32.mrf.mxu2  ;;  %v1025_v44 = vunpack.c.l.b16 %v945_v43  ;;  %v1478_v7 = vunpack.c.l.b16 %v1341_v45  ;;  %v1479_v48 = vunpack.c.l.b16 %v1348_v47  ;;  %v7707_v2 = vshll.u32 %v5375_v15, 16 }
  0xd5   :  { %v885_v18 = vpop.f32.mrf.mxu3  ;;  %v946_v43 = vrot.slane %v944_v6, 4  ;;  %v947_v16 = vrot.slane %v5292_v0, 5  ;;  %v4355_v30 = vrot.slane %v5290_v63, 9  ;;  %v951_v47 = vrot.slane %v5295_v4, 5 }
  0xd6   :  { %v5858_v10 = vpack.c.b16 %v1479_v48, %v1478_v7  ;;  %v1048_v39 = vpack.c.b16 %v1025_v44, %v1024_v14  ;;  %v1359_v25 = vrot.slane %v7707_v2, 6  ;;  %v7708_v14 = vshrl.u32 %v5356_v55, 16 }
  0xd7   :  { %v7709_v7 = vshll.u32 %v5356_v55, 16  ;;  %v7711_v6 = vshrl.u32 %v5375_v15, 16  ;;  %v948_v2 = vsel %vm5834_vm10, %v946_v43, %v947_v16 }
  0xd8   :  { %v558_v1 = vpop.f32.mrf.mxu0  ;;  %v627_v9 = vpop.f32.mrf.mxu1  ;;  %v1349_v44 = vrot.slane %v7708_v14, 5  ;;  %v952_v14 = vsel %vm5834_vm10, %v4355_v30, %v951_v47  ;;  %v1026_v16 = vunpack.c.l.b16 %v948_v2  ;;  %v957_v2 = vrot.slane %v5337_v42, 5 }
  0xd9   :  { %v5846_v26 = vadd.f32 %v816_v62, %v558_v1  ;;  %v5848_v61 = vadd.f32 %v885_v18, %v627_v9  ;;  %4426 = vmatmul.msk.bf16.vlgmr.msrb.gmra.mxu2 %vm488_vm1, %v5766_v36  ;;  %v1354_v9 = vrot.slane %v7706_v35, 6  ;;  %v1350_v48 = vrot.slane %v7709_v7, 6 }
  0xda   :  { %4438 = vmatmul.msk.bf16.vlgmr.msrb.gmra.mxu3 %vm488_vm1, %v5766_v36  ;;  %v1358_v35 = vrot.slane %v7711_v6, 5  ;;  %v1027_v30 = vunpack.c.l.b16 %v952_v14  ;;  %v7717_v14 = vshll.u32 %v5416_v57, 16 }
  0xdc   :  { %v819_v62 = vpop.f32.mrf.mxu2  ;;  %v1360_v7 = vor.u32 %v1359_v25, %v1358_v35 }
  0xdd   :  { %v888_v50 = vpop.f32.mrf.mxu3 }
  0xe0   :  { %v561_v18 = vpop.f32.mrf.mxu0  ;;  %v630_v38 = vpop.f32.mrf.mxu1 }
  0xe1   :  { %v5860_v1 = vadd.f32 %v819_v62, %v561_v18  ;;  %v5862_v36 = vadd.f32 %v888_v50, %v630_v38  ;;  %v7710_v62 = vshrl.u32 %v5360_v59, 16  ;;  %v1351_v38 = vor.u32 %v1350_v48, %v1349_v44 }
  0xe2   :  { %v1049_v48 = vpack.c.b16 %v1027_v30, %v1026_v16  ;;  %v1363_v16 = vshrl.u32 %v5412_v54, 16  ;;  %v7718_v30 = vshrl.u32 %v5395_v40, 16 }
  0xe3   :  { %7704 = vst [vmem:[#allocation35_spill] sm:$0xff] %v5860_v1  ;;  %4382 = vmatmul.msk.bf16.vlgmr.msrb.gmra.mxu0 %vm488_vm1, %v1048_v39  ;;  %4394 = vmatmul.msk.bf16.vlgmr.msrb.gmra.mxu1 %vm488_vm1, %v1048_v39  ;;  %v1353_v50 = vrot.slane %v7710_v62, 5  ;;  %v1352_v0 = vrot.slane %v1351_v38, 4 }
  0xe4   :  { %7705 = vst [vmem:[#allocation36_spill] sm:$0xff] %v5862_v36  ;;  %v821_v45 = vpop.f32.mrf.mxu2 }
  0xe5   :  { %v890_v18 = vpop.f32.mrf.mxu3  ;;  %v1355_v39 = vor.u32 %v1354_v9, %v1353_v50  ;;  %v954_v50 = vrot.slane %v5323_v29, 5 }
  0xe7   :  { %v1357_v36 = vrot.slane %v1355_v39, 4  ;;  %v1356_v9 = vsel %vm5752_vm7, %v1352_v0, %v1355_v39  ;;  %v7716_v0 = vshll.u32 %v5412_v54, 16  ;;  %v953_v39 = vrot.slane %v951_v47, 4 }
  0xe8   :  { %v563_v63 = vpop.f32.mrf.mxu0  ;;  %v632_v4 = vpop.f32.mrf.mxu1  ;;  %v1480_v44 = vunpack.c.l.b16 %v1356_v9  ;;  %v956_v35 = vrot.slane %v954_v50, 4  ;;  %v1374_v9 = vrot.slane %v7717_v14, 6  ;;  %v7720_v47 = vshrl.u32 %v5416_v57, 16 }
  0xe9   :  { %v5885_v1 = vadd.f32 %v821_v45, %v563_v63  ;;  %v5887_v62 = vadd.f32 %v890_v18, %v632_v4  ;;  %4427 = vmatmul.msk.bf16.gmra.mxu2 %vm488_vm1, %v5819_v31  ;;  %v1361_v43 = vsel %vm5752_vm7, %v1357_v36, %v1360_v7  ;;  %v1366_v36 = vrot.slane %v7716_v0, 6 }
  0xea   :  { %4439 = vmatmul.msk.bf16.gmra.mxu3 %vm488_vm1, %v5819_v31  ;;  %v1481_v25 = vunpack.c.l.b16 %v1361_v43  ;;  %v955_v0 = vsel %vm5834_vm10, %v953_v39, %v954_v50  ;;  %v958_v14 = vsel %vm5834_vm10, %v956_v35, %v957_v2 }
  0xeb   :  { %7712 = vst [vmem:[#allocation37_spill] sm:$0xff] %v5885_v1 }
  0xec   :  { %7713 = vst [vmem:[#allocation38_spill] sm:$0xff] %v5887_v62  ;;  %v824_v63 = vpop.f32.mrf.mxu2  ;;  %v5897_v4 = vpack.c.b16 %v1481_v25, %v1480_v44  ;;  %v1369_v44 = vrot.slane %v7718_v30, 5  ;;  %v7719_v25 = vshll.u32 %v5395_v40, 16 }
  0xed   :  { %v893_v45 = vpop.f32.mrf.mxu3 }
  0xf0   :  { %v566_v18 = vpop.f32.mrf.mxu0  ;;  %v635_v38 = vpop.f32.mrf.mxu1 }
  0xf1   :  { %v5900_v31 = vadd.f32 %v824_v63, %v566_v18  ;;  %v5902_v6 = vadd.f32 %v893_v45, %v635_v38  ;;  %v1370_v63 = vrot.slane %v7719_v25, 6  ;;  %v1365_v18 = vrot.slane %v1363_v16, 5 }
  0xf3   :  { %7714 = vst [vmem:[#allocation39_spill] sm:$0xff] %v5900_v31  ;;  %4383 = vmatmul.msk.bf16.gmra.mxu0 %vm488_vm1, %v1049_v48  ;;  %4395 = vmatmul.msk.bf16.gmra.mxu1 %vm488_vm1, %v1049_v48  ;;  %v1371_v38 = vor.u32 %v1370_v63, %v1369_v44  ;;  %v1373_v48 = vrot.slane %v7720_v47, 5  ;;  %v1362_v31 = vrot.slane %v1360_v7, 4  ;;  %v1367_v29 = vor.u32 %v1366_v36, %v1365_v18 }
  0xf4   :  { %7715 = vst [vmem:[#allocation40_spill] sm:$0xff] %v5902_v6  ;;  %v826_v43 = vpop.f32.mrf.mxu2  ;;  %v1028_v7 = vunpack.c.l.b16 %v955_v0  ;;  %v1029_v36 = vunpack.c.l.b16 %v958_v14  ;;  %v961_v63 = vrot.slane %v5360_v59, 5  ;;  %v7722_v18 = vshll.u32 %v5451_v52, 16 }
  0xf5   :  { %v895_v45 = vpop.f32.mrf.mxu3  ;;  %v1372_v30 = vrot.slane %v1371_v38, 4  ;;  %v1375_v62 = vor.u32 %v1374_v9, %v1373_v48  ;;  %v1368_v50 = vsel %vm5752_vm7, %v1362_v31, %v1367_v29  ;;  %v7721_v29 = vshll.u32 %v5433_v23, 16 }
  0xf6   :  { %v1482_v35 = vunpack.c.l.b16 %v1368_v50  ;;  %v1386_v38 = vrot.slane %v7722_v18, 6  ;;  %v4356_v47 = vrot.slane %v5356_v55, 9  ;;  %v963_v0 = vrot.slane %v961_v63, 4 }
  0xf7   :  { %v1376_v39 = vsel %vm5752_vm7, %v1372_v30, %v1375_v62  ;;  %v1379_v31 = vrot.slane %v7721_v29, 6  ;;  %v964_v14 = vrot.slane %v5375_v15, 5  ;;  %v7723_v30 = vshrl.u32 %v5433_v23, 16 }
  0xf8   :  { %v568_v42 = vpop.f32.mrf.mxu0  ;;  %v637_v6 = vpop.f32.mrf.mxu1  ;;  %v1483_v2 = vunpack.c.l.b16 %v1376_v39  ;;  %v1383_v39 = vshrl.u32 %v5451_v52, 16 }
  0xf9   :  { %v5922_v1 = vadd.f32 %v826_v43, %v568_v42  ;;  %v5924_v25 = vadd.f32 %v895_v45, %v637_v6  ;;  %4428 = vmatmul.msk.bf16.gmra.mxu2 %vm488_vm1, %v5858_v10  ;;  %v1050_v43 = vpack.c.b16 %v1029_v36, %v1028_v7  ;;  %v1378_v50 = vrot.slane %v7723_v30, 5 }
  0xfa   :  { %4440 = vmatmul.msk.bf16.gmra.mxu3 %vm488_vm1, %v5858_v10  ;;  %v5934_v6 = vpack.c.b16 %v1483_v2, %v1482_v35  ;;  %v1385_v35 = vrot.slane %v1383_v39, 5  ;;  %v962_v2 = vsel %vm5834_vm10, %v4356_v47, %v961_v63 }
  0xfb   :  { %v1380_v36 = vor.u32 %v1379_v31, %v1378_v50  ;;  %v1030_v47 = vunpack.c.l.b16 %v962_v2 }
  0xfc   :  { %v829_v42 = vpop.f32.mrf.mxu2  ;;  %v1387_v29 = vor.u32 %v1386_v38, %v1385_v35 }
  0xfd   :  { %v898_v9 = vpop.f32.mrf.mxu3 }
 0x100   :  { %v571_v16 = vpop.f32.mrf.mxu0  ;;  %v640_v44 = vpop.f32.mrf.mxu1 }
 0x101   :  { %v5937_v10 = vadd.f32 %v829_v42, %v571_v16  ;;  %v5939_v45 = vadd.f32 %v898_v9, %v640_v44  ;;  %v1377_v16 = vrot.slane %v1375_v62, 4  ;;  %v1382_v44 = vrot.slane %v1380_v36, 4 }
 0x103   :  { %4384 = vmatmul.msk.bf16.gmra.mxu0 %vm488_vm1, %v1050_v43  ;;  %4396 = vmatmul.msk.bf16.gmra.mxu1 %vm488_vm1, %v1050_v43  ;;  %v965_v43 = vsel %vm5834_vm10, %v963_v0, %v964_v14  ;;  %v1381_v63 = vsel %vm5752_vm7, %v1377_v16, %v1380_v36  ;;  %v1388_v31 = vsel %vm5752_vm7, %v1382_v44, %v1387_v29  ;;  %v7728_v36 = vshll.u32 %v5478_v41, 16 }
 0x104   :  { %v831_v48 = vpop.f32.mrf.mxu2  ;;  %v1031_v62 = vunpack.c.l.b16 %v965_v43  ;;  %v1484_v0 = vunpack.c.l.b16 %v1381_v63  ;;  %v1485_v38 = vunpack.c.l.b16 %v1388_v31  ;;  %v7729_v16 = vshll.u32 %v5499_v21, 16 }
 0x105   :  { %v900_v7 = vpop.f32.mrf.mxu3  ;;  %v966_v43 = vrot.slane %v964_v14, 4  ;;  %v967_v44 = vrot.slane %v5412_v54, 5  ;;  %v4357_v29 = vrot.slane %v5395_v40, 9  ;;  %v971_v31 = vrot.slane %v5416_v57, 5 }
 0x106   :  { %v5968_v50 = vpack.c.b16 %v1485_v38, %v1484_v0  ;;  %v1051_v39 = vpack.c.b16 %v1031_v62, %v1030_v47  ;;  %v1399_v2 = vrot.slane %v7729_v16, 6  ;;  %v7730_v47 = vshrl.u32 %v5476_v32, 16 }
 0x107   :  { %v7731_v0 = vshll.u32 %v5476_v32, 16  ;;  %v7733_v14 = vshrl.u32 %v5499_v21, 16  ;;  %v968_v16 = vsel %vm5834_vm10, %v966_v43, %v967_v44 }
 0x108   :  { %v573_v42 = vpop.f32.mrf.mxu0  ;;  %v642_v9 = vpop.f32.mrf.mxu1  ;;  %v1389_v62 = vrot.slane %v7730_v47, 5  ;;  %v972_v47 = vsel %vm5834_vm10, %v4357_v29, %v971_v31  ;;  %v1032_v44 = vunpack.c.l.b16 %v968_v16  ;;  %v973_v16 = vrot.slane %v971_v31, 4 }
 0x109   :  { %v5956_v18 = vadd.f32 %v831_v48, %v573_v42  ;;  %v5958_v15 = vadd.f32 %v900_v7, %v642_v9  ;;  %4429 = vmatmul.msk.bf16.gmra.mxu2 %vm488_vm1, %v5897_v4  ;;  %v1394_v9 = vrot.slane %v7728_v36, 6  ;;  %v1390_v38 = vrot.slane %v7731_v0, 6 }
 0x10a   :  { %4441 = vmatmul.msk.bf16.gmra.mxu3 %vm488_vm1, %v5897_v4  ;;  %v1398_v36 = vrot.slane %v7733_v14, 5  ;;  %v1033_v29 = vunpack.c.l.b16 %v972_v47 }
 0x10b   :  { %7724 = vst [vmem:[#allocation41_spill] sm:$0xff] %v5956_v18 }
 0x10c   :  { %7725 = vst [vmem:[#allocation42_spill] sm:$0xff] %v5958_v15  ;;  %v834_v48 = vpop.f32.mrf.mxu2  ;;  %v1400_v0 = vor.u32 %v1399_v2, %v1398_v36 }
 0x10d   :  { %v903_v30 = vpop.f32.mrf.mxu3 }
 0x110   :  { %v576_v7 = vpop.f32.mrf.mxu0  ;;  %v645_v35 = vpop.f32.mrf.mxu1 }
 0x111   :  { %v5970_v42 = vadd.f32 %v834_v48, %v576_v7  ;;  %v5972_v4 = vadd.f32 %v903_v30, %v645_v35  ;;  %v7732_v48 = vshrl.u32 %v5478_v41, 16  ;;  %v1391_v35 = vor.u32 %v1390_v38, %v1389_v62 }
 0x112   :  { %v974_v38 = vrot.slane %v5433_v23, 5 }
 0x113   :  { %7726 = vst [vmem:[#allocation43_spill] sm:$0xff] %v5970_v42  ;;  %4385 = vmatmul.msk.bf16.gmra.mxu0 %vm488_vm1, %v1051_v39  ;;  %4397 = vmatmul.msk.bf16.gmra.mxu1 %vm488_vm1, %v1051_v39  ;;  %v1393_v30 = vrot.slane %v7732_v48, 5  ;;  %v1392_v54 = vrot.slane %v1391_v35, 4 }
 0x114   :  { %7727 = vst [vmem:[#allocation44_spill] sm:$0xff] %v5972_v4  ;;  %v836_v63 = vpop.f32.mrf.mxu2  ;;  %v976_v47 = vrot.slane %v974_v38, 4 }
 0x115   :  { %v905_v7 = vpop.f32.mrf.mxu3  ;;  %v1395_v39 = vor.u32 %v1394_v9, %v1393_v30  ;;  %v1052_v30 = vpack.c.b16 %v1033_v29, %v1032_v44  ;;  %v4899_v44 = vld [vmem:[%s7583_s1 + $0x84] sm:$0xf0]  ;;  %v4898_v29 = vld [vmem:[%s7583_s1 + $0x84] sm:$0xf] }
 0x117   :  { %v1397_v4 = vrot.slane %v1395_v39, 4  ;;  %v1396_v9 = vsel %vm5752_vm7, %v1392_v54, %v1395_v39 }
 0x118   :  { %v578_v40 = vpop.f32.mrf.mxu0  ;;  %v647_v57 = vpop.f32.mrf.mxu1  ;;  %v1486_v62 = vunpack.c.l.b16 %v1396_v9  ;;  %v977_v9 = vrot.slane %v5451_v52, 5 }
 0x119   :  { %v5995_v42 = vadd.f32 %v836_v63, %v578_v40  ;;  %v5997_v48 = vadd.f32 %v905_v7, %v647_v57  ;;  %4430 = vmatmul.msk.bf16.gmra.mxu2 %vm488_vm1, %v5934_v6  ;;  %v1401_v43 = vsel %vm5752_vm7, %v1397_v4, %v1400_v0  ;;  %v7739_v4 = vshll.u32 %v5540_v3, 16 }
 0x11a   :  { %4442 = vmatmul.msk.bf16.gmra.mxu3 %vm488_vm1, %v5934_v6  ;;  %v1487_v2 = vunpack.c.l.b16 %v1401_v43  ;;  %v7736_v6 = vshll.u32 %v5536_v60, 16  ;;  %v4464_v43 = vld [vmem:[%s7583_s1 + $0x80] sm:$0xf]  ;;  %v978_v23 = vsel %vm5834_vm10, %v976_v47, %v977_v9 }
 0x11b   :  { %7734 = vst [vmem:[#allocation45_spill] sm:$0xff] %v5995_v42  ;;  %v1414_v36 = vrot.slane %v7739_v4, 6  ;;  %v1402_v42 = vrot.slane %v1400_v0, 4 }
 0x11c   :  { %7735 = vst [vmem:[#allocation46_spill] sm:$0xff] %v5997_v48  ;;  %v839_v40 = vpop.f32.mrf.mxu2  ;;  %v6007_v57 = vpack.c.b16 %v1487_v2, %v1486_v62  ;;  %v1406_v14 = vrot.slane %v7736_v6, 6  ;;  %v4465_v62 = vor.u32 %v4899_v44, %v4464_v43  ;;  %v4466_v2 = vld [vmem:[%s7583_s1 + $0x88] sm:$0xf0]  ;;  %v975_v44 = vsel %vm5834_vm10, %v973_v16, %v974_v38 }
 0x11d   :  { %v908_v63 = vpop.f32.mrf.mxu3  ;;  %v4469_v4 = vor.u32 %v4898_v29, %v4466_v2  ;;  %v1034_v0 = vunpack.c.l.b16 %v975_v44  ;;  %v981_v2 = vrot.slane %v5478_v41, 5  ;;  %v7745_v44 = vshrl.u32 %v5559_v51, 16 }
 0x11e   :  { %1947 = vmatpush.bf16.msra.mxu0 %v4465_v62 }
 0x11f   :  { %2016 = vmatpush.bf16.msra.mxu1 %v4469_v4  ;;  %v983_v4 = vrot.slane %v981_v2, 4 }
 0x120   :  { %v581_v7 = vpop.f32.mrf.mxu0  ;;  %v650_v35 = vpop.f32.mrf.mxu1 }
 0x121   :  { %v6012_v54 = vadd.f32 %v839_v40, %v581_v7  ;;  %v6014_v39 = vadd.f32 %v908_v63, %v650_v35  ;;  %v1403_v40 = vshrl.u32 %v5536_v60, 16  ;;  %v7740_v63 = vshrl.u32 %v5519_v17, 16 }
 0x122   :  { %v7741_v7 = vshll.u32 %v5519_v17, 16 }
 0x123   :  { %7737 = vst [vmem:[#allocation47_spill] sm:$0xff] %v6012_v54  ;;  %4386 = vmatmul.msk.bf16.gmra.mxu0 %vm488_vm1, %v1052_v30  ;;  %4398 = vmatmul.msk.bf16.gmra.mxu1 %vm488_vm1, %v1052_v30  ;;  %v1409_v30 = vrot.slane %v7740_v63, 5  ;;  %v1405_v52 = vrot.slane %v1403_v40, 5  ;;  %v7742_v54 = vshrl.u32 %v5540_v3, 16 }
 0x124   :  { %7738 = vst [vmem:[#allocation48_spill] sm:$0xff] %v6014_v39  ;;  %v841_v31 = vpop.f32.mrf.mxu2  ;;  %v1410_v35 = vrot.slane %v7741_v7, 6 }
 0x125   :  { %v910_v6 = vpop.f32.mrf.mxu3  ;;  %v1413_v43 = vrot.slane %v7742_v54, 5  ;;  %v1407_v15 = vor.u32 %v1406_v14, %v1405_v52  ;;  %v1035_v52 = vunpack.c.l.b16 %v978_v23  ;;  %v7744_v23 = vshll.u32 %v5573_v56, 16 }
 0x126   :  { %v1411_v39 = vor.u32 %v1410_v35, %v1409_v30  ;;  %v4358_v35 = vrot.slane %v5476_v32, 9 }
 0x127   :  { %v1415_v18 = vor.u32 %v1414_v36, %v1413_v43  ;;  %v1408_v38 = vsel %vm5752_vm7, %v1402_v42, %v1407_v15  ;;  %v1053_v47 = vpack.c.b16 %v1035_v52, %v1034_v0  ;;  %v7743_v15 = vshll.u32 %v5559_v51, 16 }
 0x128   :  { %v583_v48 = vpop.f32.mrf.mxu0  ;;  %v652_v63 = vpop.f32.mrf.mxu1  ;;  %v1412_v7 = vrot.slane %v1411_v39, 4  ;;  %v1488_v14 = vunpack.c.l.b16 %v1408_v38  ;;  %v1426_v30 = vrot.slane %v7744_v23, 6  ;;  %v984_v43 = vrot.slane %v5499_v21, 5 }
 0x129   :  { %v6044_v29 = vadd.f32 %v841_v31, %v583_v48  ;;  %v6046_v62 = vadd.f32 %v910_v6, %v652_v63  ;;  %4431 = vmatmul.msk.bf16.gmra.mxu2 %vm488_vm1, %v5968_v50  ;;  %v1419_v42 = vrot.slane %v7743_v15, 6  ;;  %v1418_v63 = vrot.slane %v7745_v44, 5 }
 0x12a   :  { %4443 = vmatmul.msk.bf16.gmra.mxu3 %vm488_vm1, %v5968_v50  ;;  %v1416_v54 = vsel %vm5752_vm7, %v1412_v7, %v1415_v18  ;;  %v1423_v7 = vshrl.u32 %v5573_v56, 16  ;;  %v982_v52 = vsel %vm5834_vm10, %v4358_v35, %v981_v2 }
 0x12b   :  { %v1489_v39 = vunpack.c.l.b16 %v1416_v54  ;;  %v1420_v54 = vor.u32 %v1419_v42, %v1418_v63  ;;  %v1036_v23 = vunpack.c.l.b16 %v982_v52 }
 0x12c   :  { %v844_v48 = vpop.f32.mrf.mxu2  ;;  %v1425_v0 = vrot.slane %v1423_v7, 5 }
 0x12d   :  { %v913_v36 = vpop.f32.mrf.mxu3  ;;  %v6056_v16 = vpack.c.b16 %v1489_v39, %v1488_v14 }
 0x130   :  { %v586_v9 = vpop.f32.mrf.mxu0  ;;  %v655_v31 = vpop.f32.mrf.mxu1 }
 0x131   :  { %v6059_v50 = vadd.f32 %v844_v48, %v586_v9  ;;  %v6061_v40 = vadd.f32 %v913_v36, %v655_v31  ;;  %v985_v48 = vsel %vm5834_vm10, %v983_v4, %v984_v43  ;;  %v1417_v36 = vrot.slane %v1415_v18, 4 }
 0x132   :  { %v1427_v9 = vor.u32 %v1426_v30, %v1425_v0  ;;  %v1037_v18 = vunpack.c.l.b16 %v985_v48  ;;  %v986_v48 = vrot.slane %v984_v43, 4  ;;  %v7752_v43 = vshrl.u32 %v5615_v46, 16 }
 0x133   :  { %4387 = vmatmul.msk.bf16.gmra.mxu0 %vm488_vm1, %v1053_v47  ;;  %4399 = vmatmul.msk.bf16.gmra.mxu1 %vm488_vm1, %v1053_v47  ;;  %v1422_v47 = vrot.slane %v1420_v54, 4  ;;  %v1421_v2 = vsel %vm5752_vm7, %v1417_v36, %v1420_v54  ;;  %v7747_v54 = vshll.u32 %v5596_v19, 16  ;;  %v987_v36 = vrot.slane %v5536_v60, 5 }
 0x134   :  { %v846_v6 = vpop.f32.mrf.mxu2  ;;  %v1490_v35 = vunpack.c.l.b16 %v1421_v2  ;;  %v1054_v63 = vpack.c.b16 %v1037_v18, %v1036_v23  ;;  %v991_v2 = vrot.slane %v5540_v3, 5  ;;  %v7750_v18 = vshll.u32 %v5592_v27, 16 }
 0x135   :  { %v915_v38 = vpop.f32.mrf.mxu3  ;;  %v1428_v42 = vsel %vm5752_vm7, %v1422_v47, %v1427_v9  ;;  %v4359_v47 = vrot.slane %v5519_v17, 9 }
 0x136   :  { %v1491_v30 = vunpack.c.l.b16 %v1428_v42  ;;  %v7749_v42 = vshrl.u32 %v5592_v27, 16 }
 0x138   :  { %v588_v14 = vpop.f32.mrf.mxu0  ;;  %v657_v39 = vpop.f32.mrf.mxu1  ;;  %v6090_v44 = vpack.c.b16 %v1491_v30, %v1490_v35  ;;  %v1429_v23 = vrot.slane %v7749_v42, 5  ;;  %v1430_v35 = vrot.slane %v7750_v18, 6  ;;  %v7751_v30 = vshrl.u32 %v5596_v19, 16 }
 0x139   :  { %v6078_v31 = vadd.f32 %v846_v6, %v588_v14  ;;  %v6080_v15 = vadd.f32 %v915_v38, %v657_v39  ;;  %4432 = vmatmul.msk.bf16.gmra.mxu2 %vm488_vm1, %v6007_v57  ;;  %v1434_v14 = vrot.slane %v7747_v54, 6  ;;  %v7748_v39 = vshll.u32 %v5615_v46, 16 }
 0x13a   :  { %4444 = vmatmul.msk.bf16.gmra.mxu3 %vm488_vm1, %v6007_v57  ;;  %v988_v54 = vsel %vm5834_vm10, %v986_v48, %v987_v36  ;;  %v992_v42 = vsel %vm5834_vm10, %v4359_v47, %v991_v2 }
 0x13b   :  { %v1439_v52 = vrot.slane %v7748_v39, 6  ;;  %v1038_v36 = vunpack.c.l.b16 %v988_v54  ;;  %v1039_v47 = vunpack.c.l.b16 %v992_v42  ;;  %v7758_v42 = vshll.u32 %v5660_v53, 16 }
 0x13c   :  { %v849_v6 = vpop.f32.mrf.mxu2 }
 0x13d   :  { %v918_v4 = vpop.f32.mrf.mxu3 }
 0x140   :  { %v591_v7 = vpop.f32.mrf.mxu0  ;;  %v660_v38 = vpop.f32.mrf.mxu1 }
 0x141   :  { %v6092_v0 = vadd.f32 %v849_v6, %v591_v7  ;;  %v6094_v57 = vadd.f32 %v918_v4, %v660_v38  ;;  %v1433_v6 = vrot.slane %v7751_v30, 5  ;;  %v1431_v7 = vor.u32 %v1430_v35, %v1429_v23 }
 0x142   :  { %v1438_v38 = vrot.slane %v7752_v43, 5 }
 0x143   :  { %7746 = vst [vmem:[#allocation49_spill] sm:$0xff] %v6094_v57  ;;  %4388 = vmatmul.msk.bf16.gmra.mxu0 %vm488_vm1, %v1054_v63  ;;  %4400 = vmatmul.msk.bf16.gmra.mxu1 %vm488_vm1, %v1054_v63  ;;  %v1435_v63 = vor.u32 %v1434_v14, %v1433_v6  ;;  %v1432_v17 = vrot.slane %v1431_v7, 4  ;;  %v1055_v6 = vpack.c.b16 %v1039_v47, %v1038_v36  ;;  %v7759_v36 = vshrl.u32 %v5633_v49, 16 }
 0x144   :  { %v851_v9 = vpop.f32.mrf.mxu2  ;;  %v1440_v18 = vor.u32 %v1439_v52, %v1438_v38 }
 0x145   :  { %v920_v4 = vpop.f32.mrf.mxu3  ;;  %v1437_v60 = vrot.slane %v1435_v63, 4  ;;  %v1436_v14 = vsel %vm5752_vm7, %v1432_v17, %v1435_v63  ;;  %v7757_v17 = vshll.u32 %v5655_v58, 16  ;;  %v993_v63 = vrot.slane %v991_v2, 4 }
 0x146   :  { %v1492_v23 = vunpack.c.l.b16 %v1436_v14  ;;  %v1454_v14 = vrot.slane %v7758_v42, 6  ;;  %v1449_v47 = vrot.slane %v7759_v36, 5  ;;  %v7761_v2 = vshrl.u32 %v5660_v53, 16 }
 0x147   :  { %v1441_v48 = vsel %vm5752_vm7, %v1437_v60, %v1440_v18  ;;  %v1446_v60 = vrot.slane %v7757_v17, 6 }
 0x148   :  { %v593_v39 = vpop.f32.mrf.mxu0  ;;  %v662_v3 = vpop.f32.mrf.mxu1  ;;  %v1493_v52 = vunpack.c.l.b16 %v1441_v48  ;;  %v1443_v48 = vshrl.u32 %v5655_v58, 16 }
 0x149   :  { %v6117_v57 = vadd.f32 %v851_v9, %v593_v39  ;;  %v6119_v30 = vadd.f32 %v920_v4, %v662_v3  ;;  %4433 = vmatmul.msk.bf16.gmra.mxu2 %vm488_vm1, %v6056_v16  ;;  %v994_v4 = vrot.slane %v5559_v51, 5  ;;  %v997_v39 = vrot.slane %v5573_v56, 5 }
 0x14a   :  { %4445 = vmatmul.msk.bf16.gmra.mxu3 %vm488_vm1, %v6056_v16  ;;  %v6129_v3 = vpack.c.b16 %v1493_v52, %v1492_v23  ;;  %v7760_v23 = vshll.u32 %v5633_v49, 16 }
 0x14b   :  { %7753 = vst [vmem:[#allocation50_spill] sm:$0xff] %v6117_v57  ;;  %v996_v54 = vrot.slane %v994_v4, 4  ;;  %v995_v17 = vsel %vm5834_vm10, %v993_v63, %v994_v4 }
 0x14c   :  { %7754 = vst [vmem:[#allocation51_spill] sm:$0xff] %v6119_v30  ;;  %v854_v9 = vpop.f32.mrf.mxu2  ;;  %v1450_v52 = vrot.slane %v7760_v23, 6 }
 0x14d   :  { %v923_v35 = vpop.f32.mrf.mxu3  ;;  %v998_v42 = vsel %vm5834_vm10, %v996_v54, %v997_v39 }
 0x150   :  { %v596_v7 = vpop.f32.mrf.mxu0  ;;  %v665_v43 = vpop.f32.mrf.mxu1 }
 0x151   :  { %v6132_v16 = vadd.f32 %v854_v9, %v596_v7  ;;  %v6134_v38 = vadd.f32 %v923_v35, %v665_v43  ;;  %v1445_v7 = vrot.slane %v1443_v48, 5  ;;  %v1451_v43 = vor.u32 %v1450_v52, %v1449_v47 }
 0x152   :  { %v1001_v47 = vrot.slane %v5596_v19, 5 }
 0x153   :  { %7755 = vst [vmem:[#allocation52_spill] sm:$0xff] %v6132_v16  ;;  %4389 = vmatmul.msk.bf16.gmra.mxu0 %vm488_vm1, %v1055_v6  ;;  %4401 = vmatmul.msk.bf16.gmra.mxu1 %vm488_vm1, %v1055_v6  ;;  %v1453_v6 = vrot.slane %v7761_v2, 5  ;;  %v1442_v16 = vrot.slane %v1440_v18, 4  ;;  %v1447_v36 = vor.u32 %v1446_v60, %v1445_v7  ;;  %v1452_v51 = vrot.slane %v1451_v43, 4 }
 0x154   :  { %7756 = vst [vmem:[#allocation53_spill] sm:$0xff] %v6134_v38  ;;  %v856_v9 = vpop.f32.mrf.mxu2  ;;  %v1040_v18 = vunpack.c.l.b16 %v995_v17  ;;  %v1041_v60 = vunpack.c.l.b16 %v998_v42  ;;  %v4360_v43 = vrot.slane %v5592_v27, 9  ;;  %v1003_v2 = vrot.slane %v1001_v47, 4 }
 0x155   :  { %v925_v35 = vpop.f32.mrf.mxu3  ;;  %v1455_v30 = vor.u32 %v1454_v14, %v1453_v6  ;;  %v1448_v4 = vsel %vm5752_vm7, %v1442_v16, %v1447_v36  ;;  %v7762_v16 = vshll.u32 %v5683_v28, 16  ;;  %v1004_v6 = vrot.slane %v5615_v46, 5 }
 0x156   :  { %v1494_v54 = vunpack.c.l.b16 %v1448_v4  ;;  %v1056_v14 = vpack.c.b16 %v1041_v60, %v1040_v18  ;;  %v1002_v4 = vsel %vm5834_vm10, %v4360_v43, %v1001_v47 }
 0x157   :  { %v1456_v63 = vsel %vm5752_vm7, %v1452_v51, %v1455_v30  ;;  %v7763_v51 = vld [vmem:[#allocation30_spill] sm:$0xff]  ;;  %v1005_v60 = vsel %vm5834_vm10, %v1003_v2, %v1004_v6 }
 0x158   :  { %v598_v56 = vpop.f32.mrf.mxu0  ;;  %v667_v38 = vpop.f32.mrf.mxu1  ;;  %v1495_v39 = vunpack.c.l.b16 %v1456_v63 }
 0x159   :  { %v6154_v23 = vadd.f32 %v856_v9, %v598_v56  ;;  %v6156_v57 = vadd.f32 %v925_v35, %v667_v38  ;;  %4434 = vmatmul.msk.bf16.gmra.mxu2 %vm488_vm1, %v6090_v44  ;;  %v1459_v9 = vrot.slane %v7762_v16, 6  ;;  %v7764_v35 = vshll.u32 %v7763_v51, 16  ;;  %v7767_v16 = vld [vmem:[#allocation27_spill] sm:$0xff] }
 0x15a   :  { %4446 = vmatmul.msk.bf16.gmra.mxu3 %vm488_vm1, %v6090_v44  ;;  %v1508_v56 = vpack.c.b16 %v1495_v39, %v1494_v54  ;;  %v1457_v54 = vrot.slane %v1455_v30, 4 }
 0x15b   :  { %v1466_v7 = vrot.slane %v7764_v35, 6 }
 0x160   :  { %v1129_v38 = vpop.f32.mrf.mxu0  ;;  %v1198_v48 = vpop.f32.mrf.mxu1 }
 0x161   :  { %v6168_v52 = vadd.f32 %v1129_v38, %v5625_v33  ;;  %v6171_v44 = vadd.f32 %v1198_v48, %v5627_v11  ;;  %v7765_v33 = vshrl.u32 %v5683_v28, 16  ;;  %v1463_v11 = vshrl.u32 %v7763_v51, 16  ;;  %v7766_v38 = vld [vmem:[#allocation26_spill] sm:$0xff] }
 0x163   :  { %4390 = vmatmul.msk.bf16.gmra.mxu0 %vm488_vm1, %v1056_v14  ;;  %4402 = vmatmul.msk.bf16.gmra.mxu1 %vm488_vm1, %v1056_v14  ;;  %v1458_v17 = vrot.slane %v7765_v33, 5  ;;  %v1465_v36 = vrot.slane %v1463_v11, 5 }
 0x165   :  { %v1460_v42 = vor.u32 %v1459_v9, %v1458_v17  ;;  %v1467_v14 = vor.u32 %v1466_v7, %v1465_v36  ;;  %v1042_v9 = vunpack.c.l.b16 %v1002_v4  ;;  %v1043_v7 = vunpack.c.l.b16 %v1005_v60 }
 0x166   :  { %v4361_v4 = vrot.slane %v5633_v49, 9  ;;  %v1011_v60 = vrot.slane %v5660_v53, 5 }
 0x167   :  { %v1462_v39 = vrot.slane %v1460_v42, 4  ;;  %v1461_v47 = vsel %vm5752_vm7, %v1457_v54, %v1460_v42  ;;  %v1057_v17 = vpack.c.b16 %v1043_v7, %v1042_v9  ;;  %v1007_v42 = vrot.slane %v5655_v58, 5  ;;  %v7771_v7 = vld [vmem:[#allocation32_spill] sm:$0xff] }
 0x168   :  { %v1131_v63 = vpop.f32.mrf.mxu0  ;;  %v1200_v18 = vpop.f32.mrf.mxu1  ;;  %v1496_v43 = vunpack.c.l.b16 %v1461_v47  ;;  %v1012_v47 = vsel %vm5834_vm10, %v4361_v4, %v1011_v60 }
 0x169   :  { %v6189_v48 = vadd.f32 %v1131_v63, %v7766_v38  ;;  %v6192_v35 = vadd.f32 %v1200_v18, %v7767_v16  ;;  %4435 = vmatmul.msk.bf16.gmra.mxu2 %vm488_vm1, %v6129_v3  ;;  %v1468_v30 = vsel %vm5752_vm7, %v1462_v39, %v1467_v14  ;;  %v7768_v63 = vld [vmem:[#allocation28_spill] sm:$0xff]  ;;  %v7769_v38 = vld [vmem:[#allocation29_spill] sm:$0xff] }
 0x16a   :  { %4447 = vmatmul.msk.bf16.gmra.mxu3 %vm488_vm1, %v6129_v3  ;;  %v1497_v2 = vunpack.c.l.b16 %v1468_v30  ;;  %v1006_v3 = vrot.slane %v1004_v6, 4  ;;  %v7770_v30 = vld [vmem:[#allocation31_spill] sm:$0xff] }
 0x16c   :  { %v1509_v33 = vpack.c.b16 %v1497_v2, %v1496_v43  ;;  %v1008_v14 = vsel %vm5834_vm10, %v1006_v3, %v1007_v42  ;;  %v1045_v2 = vunpack.c.l.b16 %v1012_v47  ;;  %v7773_v42 = vld [vmem:[#allocation34_spill] sm:$0xff] }
 0x16d   :  { %v1044_v6 = vunpack.c.l.b16 %v1008_v14 }
 0x170   :  { %v1134_v11 = vpop.f32.mrf.mxu0  ;;  %v1203_v36 = vpop.f32.mrf.mxu1 }
 0x171   :  { %v6203_v18 = vadd.f32 %v1134_v11, %v7768_v63  ;;  %v6206_v16 = vadd.f32 %v1203_v36, %v7769_v38  ;;  %v1014_v63 = vrot.slane %v5683_v28, 5  ;;  %v7772_v38 = vld [vmem:[#allocation33_spill] sm:$0xff] }
 0x173   :  { %4391 = vmatmul.msk.bf16.gmra.mxu0 %vm488_vm1, %v1057_v17  ;;  %4403 = vmatmul.msk.bf16.gmra.mxu1 %vm488_vm1, %v1057_v17  ;;  %v1058_v17 = vpack.c.b16 %v1045_v2, %v1044_v6 }
 0x178   :  { %v1136_v54 = vpop.f32.mrf.mxu0  ;;  %v1205_v39 = vpop.f32.mrf.mxu1 }
 0x179   :  { %v6218_v9 = vadd.f32 %v1136_v54, %v7770_v30  ;;  %v6221_v43 = vadd.f32 %v1205_v39, %v7771_v7  ;;  %4436 = vmatmul.msk.bf16.gmra.mxu2 %vm488_vm1, %v1508_v56  ;;  %v1013_v54 = vrot.slane %v1011_v60, 4  ;;  %v1016_v39 = vrot.slane %v1014_v63, 4 }
 0x17a   :  { %4448 = vmatmul.msk.bf16.gmra.mxu3 %vm488_vm1, %v1508_v56  ;;  %v1017_v56 = vrot.slane %v7763_v51, 5 }
 0x17b   :  { %v1015_v30 = vsel %vm5834_vm10, %v1013_v54, %v1014_v63  ;;  %v1761_v63 = vrot.slane %v5227_v24, 6  ;;  %v1764_v54 = vrot.slane %v5251_v37, 6 }
 0x17c   :  { %v1018_v7 = vsel %vm5834_vm10, %v1016_v39, %v1017_v56  ;;  %v1046_v60 = vunpack.c.l.b16 %v1015_v30 }
 0x180   :  { %v1139_v11 = vpop.f32.mrf.mxu0  ;;  %v1208_v36 = vpop.f32.mrf.mxu1 }
 0x181   :  { %v6227_v3 = vadd.f32 %v1139_v11, %v7772_v38  ;;  %v6230_v4 = vadd.f32 %v1208_v36, %v7773_v42 }
 0x183   :  { %4392 = vmatmul.msk.bf16.gmra.mxu0 %vm488_vm1, %v1058_v17  ;;  %4404 = vmatmul.msk.bf16.gmra.mxu1 %vm488_vm1, %v1058_v17  ;;  %v1047_v17 = vunpack.c.l.b16 %v1018_v7 }
 0x185   :  { %v1059_v11 = vpack.c.b16 %v1047_v17, %v1046_v60  ;;  %v7778_v17 = vld [vmem:[#allocation35_spill] sm:$0xff] }
 0x188   :  { %v1141_v14 = vpop.f32.mrf.mxu0  ;;  %v1210_v47 = vpop.f32.mrf.mxu1 }
 0x189   :  { %v6240_v6 = vadd.f32 %v1141_v14, %v5809_v12  ;;  %v6243_v2 = vadd.f32 %v1210_v47, %v5811_v13  ;;  %4437 = vmatmul.msk.bf16.gmra.mxu2 %vm488_vm1, %v1509_v33  ;;  %v4450_v13 = vrot.slane %v5222_v20, 10 }
 0x18a   :  { %4449 = vmatmul.msk.bf16.gmra.mxu3 %vm488_vm1, %v1509_v33  ;;  %v1763_v33 = vrot.slane %v1761_v63, 4 }
 0x18c   :  { %v1765_v56 = vsel %vm6259_vm13, %v1763_v33, %v1764_v54 }
 0x18d   :  { %v1845_v47 = vunpack.c.l.b16 %v1765_v56 }
 0x190   :  { %v1144_v36 = vpop.f32.mrf.mxu0  ;;  %v1213_v38 = vpop.f32.mrf.mxu1 }
 0x191   :  { %v6249_v42 = vadd.f32 %v1144_v36, %v5822_v5  ;;  %v6252_v12 = vadd.f32 %v1213_v38, %v5824_v34  ;;  %v1762_v34 = vsel %vm6259_vm13, %v4450_v13, %v1761_v63  ;;  %v7780_v36 = vld [vmem:[#allocation36_spill] sm:$0xff]  ;;  %v7782_v63 = vld [vmem:[#allocation11_spill] sm:$0xff] }
 0x192   :  { %v1844_v37 = vunpack.c.l.b16 %v1762_v34  ;;  %v1767_v13 = vrot.slane %v7782_v63, 6 }
 0x193   :  { %4393 = vmatmul.msk.bf16.gmra.mxu0 %vm488_vm1, %v1059_v11  ;;  %4405 = vmatmul.msk.bf16.gmra.mxu1 %vm488_vm1, %v1059_v11 }
 0x194   :  { %v1868_v30 = vpack.c.b16 %v1845_v47, %v1844_v37 }
 0x198   :  { %v1146_v5 = vpop.f32.mrf.mxu0  ;;  %v1215_v39 = vpop.f32.mrf.mxu1 }
 0x199   :  { %v6268_v14 = vadd.f32 %v1146_v5, %v5846_v26  ;;  %v6271_v20 = vadd.f32 %v1215_v39, %v5848_v61  ;;  %v1766_v26 = vrot.slane %v1764_v54, 4  ;;  %v7783_v61 = vld [vmem:[#allocation10_spill] sm:$0xff]  ;;  %v7784_v5 = vld [vmem:[#allocation12_spill] sm:$0xff] }
 0x19a   :  { %v4451_v33 = vrot.slane %v7783_v61, 10  ;;  %v1771_v39 = vrot.slane %v7784_v5, 6  ;;  %v7787_v5 = vld [vmem:[#allocation13_spill] sm:$0xff] }
 0x19b   :  { %7776 = vst [vmem:[#allocation30_spill] sm:$0xff] %v6268_v14  ;;  %v1768_v37 = vsel %vm6259_vm13, %v1766_v26, %v1767_v13  ;;  %v7789_v26 = vld [vmem:[#allocation40_spill] sm:$0xff] }
 0x19c   :  { %7777 = vst [vmem:[#allocation26_spill] sm:$0xff] %v6271_v20  ;;  %v1772_v47 = vsel %vm6259_vm13, %v4451_v33, %v1771_v39  ;;  %v1846_v54 = vunpack.c.l.b16 %v1768_v37  ;;  %v7788_v20 = vld [vmem:[#allocation39_spill] sm:$0xff]  ;;  %v1773_v33 = vrot.slane %v1771_v39, 4 }
 0x1a0   :  { %v1149_v7 = vpop.f32.mrf.mxu0  ;;  %v1218_v60 = vpop.f32.mrf.mxu1 }
 0x1a1   :  { %v6274_v11 = vadd.f32 %v1149_v7, %v7778_v17  ;;  %v6277_v38 = vadd.f32 %v1218_v60, %v7780_v36  ;;  %v7785_v7 = vld [vmem:[#allocation37_spill] sm:$0xff]  ;;  %v7786_v17 = vld [vmem:[#allocation38_spill] sm:$0xff]  ;;  %v1847_v36 = vunpack.c.l.b16 %v1772_v47 }
 0x1a3   :  { %7779 = vst [vmem:[#allocation27_spill] sm:$0xff] %v6274_v11  ;;  %4478 = vmatmul.msk.bf16.vlgmr.msra.gmra.mxu0 %vm488_vm1, %v1868_v30  ;;  %4490 = vmatmul.msk.bf16.vlgmr.msra.gmra.mxu1 %vm488_vm1, %v1868_v30  ;;  %v1869_v63 = vpack.c.b16 %v1847_v36, %v1846_v54  ;;  %v1774_v11 = vrot.slane %v7787_v5, 6 }
 0x1a4   :  { %7781 = vst [vmem:[#allocation28_spill] sm:$0xff] %v6277_v38 }
 0x1a8   :  { %v1151_v34 = vpop.f32.mrf.mxu0  ;;  %v1220_v56 = vpop.f32.mrf.mxu1 }
 0x1a9   :  { %v6289_v60 = vadd.f32 %v1151_v34, %v7785_v7  ;;  %v6292_v30 = vadd.f32 %v1220_v56, %v7786_v17  ;;  %v1776_v34 = vrot.slane %v1774_v11, 4  ;;  %v7790_v56 = vld [vmem:[#allocation14_spill] sm:$0xff]  ;;  %v1775_v17 = vsel %vm6259_vm13, %v1773_v33, %v1774_v11  ;;  %v7794_v33 = vld [vmem:[#allocation15_spill] sm:$0xff] }
 0x1aa   :  { %v1777_v37 = vrot.slane %v7790_v56, 6  ;;  %v1848_v36 = vunpack.c.l.b16 %v1775_v17  ;;  %v7797_v17 = vld [vmem:[#allocation42_spill] sm:$0xff] }
 0x1b0   :  { %v1154_v61 = vpop.f32.mrf.mxu0  ;;  %v1223_v38 = vpop.f32.mrf.mxu1 }
 0x1b1   :  { %v6296_v14 = vadd.f32 %v1154_v61, %v7788_v20  ;;  %v6299_v13 = vadd.f32 %v1223_v38, %v7789_v26  ;;  %v1778_v20 = vsel %vm6259_vm13, %v1776_v34, %v1777_v37  ;;  %v1781_v26 = vrot.slane %v5360_v59, 6 }
 0x1b2   :  { %v1784_v34 = vrot.slane %v7794_v33, 6 }
 0x1b3   :  { %4479 = vmatmul.msk.bf16.gmra.mxu0 %vm488_vm1, %v1869_v63  ;;  %4491 = vmatmul.msk.bf16.gmra.mxu1 %vm488_vm1, %v1869_v63  ;;  %v1849_v63 = vunpack.c.l.b16 %v1778_v20 }
 0x1b5   :  { %v1870_v39 = vpack.c.b16 %v1849_v63, %v1848_v36 }
 0x1b8   :  { %v1156_v47 = vpop.f32.mrf.mxu0  ;;  %v1225_v7 = vpop.f32.mrf.mxu1 }
 0x1b9   :  { %v6309_v54 = vadd.f32 %v1156_v47, %v5922_v1  ;;  %v6312_v38 = vadd.f32 %v1225_v7, %v5924_v25  ;;  %v4452_v1 = vrot.slane %v5356_v55, 10  ;;  %v1783_v25 = vrot.slane %v1781_v26, 4  ;;  %v7795_v7 = vld [vmem:[#allocation41_spill] sm:$0xff] }
 0x1bb   :  { %7791 = vst [vmem:[#allocation29_spill] sm:$0xff] %v6312_v38  ;;  %v1782_v59 = vsel %vm6259_vm13, %v4452_v1, %v1781_v26  ;;  %v1786_v26 = vrot.slane %v1784_v34, 4  ;;  %v7803_v1 = vld [vmem:[#allocation17_spill] sm:$0xff] }
 0x1bc   :  { %v1850_v36 = vunpack.c.l.b16 %v1782_v59  ;;  %v7805_v59 = vld [vmem:[#allocation18_spill] sm:$0xff] }
 0x1c0   :  { %v1159_v61 = vpop.f32.mrf.mxu0  ;;  %v1228_v5 = vpop.f32.mrf.mxu1 }
 0x1c1   :  { %v6316_v56 = vadd.f32 %v1159_v61, %v5937_v10  ;;  %v6319_v11 = vadd.f32 %v1228_v5, %v5939_v45  ;;  %v1785_v10 = vsel %vm6259_vm13, %v1783_v25, %v1784_v34  ;;  %v7799_v5 = vld [vmem:[#allocation43_spill] sm:$0xff]  ;;  %v1787_v25 = vrot.slane %v7803_v1, 6  ;;  %v6356_v34 = vpop.f32.mrf.mxu2 }
 0x1c2   :  { %v1851_v63 = vunpack.c.l.b16 %v1785_v10  ;;  %v1791_v10 = vrot.slane %v7805_v59, 6 }
 0x1c3   :  { %7792 = vst [vmem:[#allocation31_spill] sm:$0xff] %v6316_v56  ;;  %4480 = vmatmul.msk.bf16.gmra.mxu0 %vm488_vm1, %v1870_v39  ;;  %4492 = vmatmul.msk.bf16.gmra.mxu1 %vm488_vm1, %v1870_v39 }
 0x1c4   :  { %7793 = vst [vmem:[#allocation32_spill] sm:$0xff] %v6319_v11  ;;  %v1871_v55 = vpack.c.b16 %v1851_v63, %v1850_v36  ;;  %v7801_v11 = vld [vmem:[#allocation44_spill] sm:$0xff]  ;;  %v1788_v36 = vsel %vm6259_vm13, %v1786_v26, %v1787_v25  ;;  %v7806_v63 = vld [vmem:[#allocation45_spill] sm:$0xff]  ;;  %v7811_v25 = vld [vmem:[#allocation47_spill] sm:$0xff] }
 0x1c8   :  { %v1161_v37 = vpop.f32.mrf.mxu0  ;;  %v1230_v47 = vpop.f32.mrf.mxu1 }
 0x1c9   :  { %v6330_v45 = vadd.f32 %v1161_v37, %v7795_v7  ;;  %v6333_v20 = vadd.f32 %v1230_v47, %v7797_v17  ;;  %v7804_v37 = vld [vmem:[#allocation16_spill] sm:$0xff] }
 0x1ca   :  { %v4453_v47 = vrot.slane %v7804_v37, 10  ;;  %v6358_v37 = vpop.f32.mrf.mxu3 }
 0x1cb   :  { %7796 = vst [vmem:[#allocation33_spill] sm:$0xff] %v6330_v45 }
 0x1cc   :  { %7798 = vst [vmem:[#allocation34_spill] sm:$0xff] %v6333_v20  ;;  %v7810_v20 = vld [vmem:[#allocation19_spill] sm:$0xff] }
 0x1cd   :  { %v1794_v26 = vrot.slane %v7810_v20, 6 }
 0x1d0   :  { %v1164_v39 = vpop.f32.mrf.mxu0  ;;  %v1233_v61 = vpop.f32.mrf.mxu1 }
 0x1d1   :  { %v6336_v33 = vadd.f32 %v1164_v39, %v7799_v5  ;;  %v6339_v56 = vadd.f32 %v1233_v61, %v7801_v11  ;;  %v1792_v11 = vsel %vm6259_vm13, %v4453_v47, %v1791_v10  ;;  %v7808_v61 = vld [vmem:[#allocation46_spill] sm:$0xff]  ;;  %v1852_v5 = vunpack.c.l.b16 %v1788_v36  ;;  %v7813_v47 = vld [vmem:[#allocation48_spill] sm:$0xff] }
 0x1d2   :  { %v1853_v1 = vunpack.c.l.b16 %v1792_v11  ;;  %v4510_v36 = vld [vmem:[%s7585_s3 + $0x88] sm:$0xff]  ;;  %v1796_v11 = vrot.slane %v1794_v26, 4 }
 0x1d3   :  { %7800 = vst [vmem:[#allocation35_spill] sm:$0xff] %v6336_v33  ;;  %4481 = vmatmul.msk.bf16.gmra.mxu0 %vm488_vm1, %v1871_v55  ;;  %4493 = vmatmul.msk.bf16.gmra.mxu1 %vm488_vm1, %v1871_v55  ;;  %v2803_v20 = vunpack.c.h.b16 %v4510_v36 }
 0x1d4   :  { %7802 = vst [vmem:[#allocation36_spill] sm:$0xff] %v6339_v56  ;;  %v1872_v59 = vpack.c.b16 %v1853_v1, %v1852_v5  ;;  %v2802_v5 = vunpack.c.l.b16 %v4510_v36  ;;  %v6373_v1 = vpop.f32.mrf.mxu2 }
 0x1d8   :  { %v1166_v7 = vpop.f32.mrf.mxu0  ;;  %v1235_v17 = vpop.f32.mrf.mxu1 }
 0x1d9   :  { %v6351_v39 = vadd.f32 %v1166_v7, %v7806_v63  ;;  %v6354_v55 = vadd.f32 %v1235_v17, %v7808_v61  ;;  %v1793_v17 = vrot.slane %v1791_v10, 4  ;;  %v7815_v63 = vld [vmem:[#allocation20_spill] sm:$0xff] }
 0x1da   :  { %v1797_v61 = vrot.slane %v7815_v63, 6 }
 0x1db   :  { %7807 = vst [vmem:[#allocation11_spill] sm:$0xff] %v6351_v39  ;;  %v1795_v10 = vsel %vm6259_vm13, %v1793_v17, %v1794_v26 }
 0x1dc   :  { %7809 = vst [vmem:[#allocation10_spill] sm:$0xff] %v6354_v55  ;;  %v6389_v39 = vpop.f32.mrf.mxu2 }
 0x1e0   :  { %v1169_v56 = vpop.f32.mrf.mxu0  ;;  %v1238_v33 = vpop.f32.mrf.mxu1 }
 0x1e1   :  { %v6362_v45 = vadd.f32 %v1169_v56, %v7811_v25  ;;  %v6365_v7 = vadd.f32 %v1238_v33, %v7813_v47  ;;  %v2812_v56 = vpack.c.b16 %v2802_v5, %v2802_v5  ;;  %v2813_v25 = vpack.c.b16 %v2803_v20, %v2803_v20  ;;  %v6375_v33 = vpop.f32.mrf.mxu3 }
 0x1e2   :  { %v1854_v20 = vunpack.c.l.b16 %v1795_v10 }
 0x1e3   :  { %7812 = vst [vmem:[#allocation12_spill] sm:$0xff] %v6362_v45  ;;  %4482 = vmatmul.msk.bf16.gmra.mxu0 %vm488_vm1, %v1872_v59  ;;  %4494 = vmatmul.msk.bf16.gmra.mxu1 %vm488_vm1, %v1872_v59  ;;  %v1798_v59 = vsel %vm6259_vm13, %v1796_v11, %v1797_v61  ;;  %v2836_v45 = vsel %vm2559_vm14, %v2812_v56, 0  ;;  %v2839_v63 = vsel %vm2559_vm14, %v2813_v25, 0  ;;  %v1801_v11 = vrot.slane %v5478_v41, 6 }
 0x1e4   :  { %7814 = vst [vmem:[#allocation37_spill] sm:$0xff] %v6365_v7  ;;  %2844 = vmatpush.bf16.msra.mxu2 %v2836_v45  ;;  %2873 = vmatpush.bf16.msra.mxu3 %v2839_v63  ;;  %v1855_v55 = vunpack.c.l.b16 %v1798_v59 }
 0x1e5   :  { %v1803_v45 = vrot.slane %v1801_v11, 4 }
 0x1e6   :  { %v1873_v26 = vpack.c.b16 %v1855_v55, %v1854_v20  ;;  %v1804_v55 = vrot.slane %v5499_v21, 6 }
 0x1e8   :  { %v1171_v47 = vpop.f32.mrf.mxu0  ;;  %v1240_v7 = vpop.f32.mrf.mxu1 }
 0x1e9   :  { %v6384_v36 = vadd.f32 %v1171_v47, %v6044_v29  ;;  %v6387_v5 = vadd.f32 %v1240_v7, %v6046_v62  ;;  %v6392_v61 = vpop.f32.mrf.mxu3  ;;  %v4454_v62 = vrot.slane %v5476_v32, 10  ;;  %v6408_v47 = vpop.f32.mrf.mxu2 }
 0x1eb   :  { %7816 = vst [vmem:[#allocation38_spill] sm:$0xff] %v6387_v5  ;;  %v1802_v41 = vsel %vm6259_vm13, %v4454_v62, %v1801_v11 }
 0x1ec   :  { %v1856_v10 = vunpack.c.l.b16 %v1802_v41  ;;  %v7826_v41 = vld [vmem:[#allocation23_spill] sm:$0xff] }
 0x1f0   :  { %v1174_v17 = vpop.f32.mrf.mxu0  ;;  %v1243_v38 = vpop.f32.mrf.mxu1 }
 0x1f1   :  { %v6395_v56 = vadd.f32 %v1174_v17, %v6059_v50  ;;  %v6398_v29 = vadd.f32 %v1243_v38, %v6061_v40  ;;  %v1805_v50 = vsel %vm6259_vm13, %v1803_v45, %v1804_v55  ;;  %v6416_v32 = vpop.f32.mrf.mxu3  ;;  %v7822_v17 = vld [vmem:[#allocation49_spill] sm:$0xff]  ;;  %v6424_v62 = vpop.f32.mrf.mxu2 }
 0x1f2   :  { %v1857_v21 = vunpack.c.l.b16 %v1805_v50  ;;  %v1811_v50 = vrot.slane %v7826_v41, 6 }
 0x1f3   :  { %7817 = vst [vmem:[#allocation13_spill] sm:$0xff] %v6395_v56  ;;  %4483 = vmatmul.msk.bf16.gmra.mxu0 %vm488_vm1, %v1873_v26  ;;  %4495 = vmatmul.msk.bf16.gmra.mxu1 %vm488_vm1, %v1873_v26  ;;  %v7830_v56 = vld [vmem:[#allocation24_spill] sm:$0xff] }
 0x1f4   :  { %7818 = vst [vmem:[#allocation39_spill] sm:$0xff] %v6398_v29  ;;  %v1874_v59 = vpack.c.b16 %v1857_v21, %v1856_v10 }
 0x1f8   :  { %v1176_v7 = vpop.f32.mrf.mxu0  ;;  %v1245_v25 = vpop.f32.mrf.mxu1 }
 0x1f9   :  { %v6411_v40 = vadd.f32 %v1176_v7, %v6078_v31  ;;  %v6414_v38 = vadd.f32 %v1245_v25, %v6080_v15  ;;  %v1806_v31 = vrot.slane %v1804_v55, 4  ;;  %v7824_v15 = vld [vmem:[#allocation22_spill] sm:$0xff]  ;;  %v7825_v7 = vld [vmem:[#allocation21_spill] sm:$0xff]  ;;  %v6431_v10 = vpop.f32.mrf.mxu3  ;;  %v7828_v55 = vld [vmem:[#allocation51_spill] sm:$0xff] }
 0x1fa   :  { %v1807_v45 = vrot.slane %v7824_v15, 6  ;;  %v4455_v25 = vrot.slane %v7825_v7, 10 }
 0x1fb   :  { %7819 = vst [vmem:[#allocation40_spill] sm:$0xff] %v6411_v40 }
 0x1fc   :  { %7820 = vst [vmem:[#allocation14_spill] sm:$0xff] %v6414_v38 }
 0x200   :  { %v1179_v63 = vpop.f32.mrf.mxu0  ;;  %v1248_v20 = vpop.f32.mrf.mxu1 }
 0x201   :  { %v6419_v26 = vadd.f32 %v1179_v63, %v6092_v0  ;;  %v6422_v11 = vadd.f32 %v1248_v20, %v7822_v17  ;;  %v1808_v63 = vsel %vm6259_vm13, %v1806_v31, %v1807_v45  ;;  %v1812_v20 = vsel %vm6259_vm13, %v4455_v25, %v1811_v50  ;;  %v7827_v17 = vld [vmem:[#allocation50_spill] sm:$0xff]  ;;  %v6445_v41 = vpop.f32.mrf.mxu3  ;;  %v7831_v45 = vld [vmem:[#allocation52_spill] sm:$0xff]  ;;  %v7833_v25 = vld [vmem:[#allocation53_spill] sm:$0xff] }
 0x202   :  { %v1858_v15 = vunpack.c.l.b16 %v1808_v63  ;;  %v1859_v7 = vunpack.c.l.b16 %v1812_v20  ;;  %v1814_v31 = vrot.slane %v7830_v56, 6  ;;  %v7835_v20 = vld [vmem:[#allocation25_spill] sm:$0xff] }
 0x203   :  { %7821 = vst [vmem:[#allocation15_spill] sm:$0xff] %v6419_v26  ;;  %4484 = vmatmul.msk.bf16.gmra.mxu0 %vm488_vm1, %v1874_v59  ;;  %4496 = vmatmul.msk.bf16.gmra.mxu1 %vm488_vm1, %v1874_v59  ;;  %v6443_v26 = vpop.f32.mrf.mxu2 }
 0x204   :  { %7823 = vst [vmem:[#allocation41_spill] sm:$0xff] %v6422_v11  ;;  %v1875_v38 = vpack.c.b16 %v1859_v7, %v1858_v15  ;;  %v1816_v63 = vrot.slane %v1814_v31, 4 }
 0x208   :  { %v1181_v0 = vpop.f32.mrf.mxu0  ;;  %v1250_v21 = vpop.f32.mrf.mxu1 }
 0x209   :  { %v6438_v11 = vadd.f32 %v1181_v0, %v7827_v17  ;;  %v6441_v59 = vadd.f32 %v1250_v21, %v7828_v55  ;;  %v1813_v21 = vrot.slane %v1811_v50, 4  ;;  %v1817_v17 = vrot.slane %v7835_v20, 6  ;;  %v2126_v50 = vld [vmem:[%s7584_s2] sm:$0x3] }
 0x20b   :  { %7829 = vst [vmem:[#allocation42_spill] sm:$0xff] %v6441_v59  ;;  %v6457_v55 = vpop.f32.mrf.mxu2  ;;  %v1815_v56 = vsel %vm6259_vm13, %v1813_v21, %v1814_v31  ;;  %v4537_v31 = vld [vmem:[%s7585_s3 + $0x78] sm:$0xf]  ;;  %v4917_v21 = vld [vmem:[%s7585_s3 + $0x7c] sm:$0xf0] }
 0x210   :  { %v1184_v40 = vpop.f32.mrf.mxu0  ;;  %v1253_v29 = vpop.f32.mrf.mxu1 }
 0x211   :  { %v6449_v5 = vadd.f32 %v1184_v40, %v7831_v45  ;;  %v6452_v0 = vadd.f32 %v1253_v29, %v7833_v25  ;;  %v1818_v40 = vsel %vm6259_vm13, %v1816_v63, %v1817_v17  ;;  %v6463_v29 = vpop.f32.mrf.mxu3  ;;  %v1860_v25 = vunpack.c.l.b16 %v1815_v56  ;;  %v4539_v63 = vld [vmem:[%s7585_s3 + $0x80] sm:$0xf0] }
 0x212   :  { %v1861_v20 = vunpack.c.l.b16 %v1818_v40  ;;  %v1708_v17 = vadd.f32 %v6356_v34, %v6168_v52  ;;  %v6490_v56 = vperm.slane %v2126_v50, 0  ;;  %v6492_v40 = vperm.slane %v2126_v50, 1 }
 0x213   :  { %7832 = vst [vmem:[#allocation43_spill] sm:$0xff] %v6449_v5  ;;  %4485 = vmatmul.msk.bf16.gmra.mxu0 %vm488_vm1, %v1875_v38  ;;  %4497 = vmatmul.msk.bf16.gmra.mxu1 %vm488_vm1, %v1875_v38  ;;  %v4456_v52 = vrot.slane %v5592_v27, 10  ;;  %v1824_v50 = vrot.slane %v5615_v46, 6  ;;  %v1711_v27 = vadd.f32 %v6375_v33, %v6192_v35  ;;  %v4457_v33 = vrot.slane %v5633_v49, 10 }
 0x214   :  { %7834 = vst [vmem:[#allocation44_spill] sm:$0xff] %v6452_v0  ;;  %v6495_v0 = vpop.f32.mrf.mxu2  ;;  %v6534_v49 = vadd.f32 %v6424_v62, %v6227_v3 }
 0x218   :  { %v1186_v15 = vpop.f32.mrf.mxu0  ;;  %v1255_v7 = vpop.f32.mrf.mxu1 }
 0x219   :  { %v6466_v45 = vadd.f32 %v1186_v15, %v6154_v23  ;;  %v6469_v38 = vadd.f32 %v1255_v7, %v6156_v57  ;;  %v4916_v23 = vld [vmem:[%s7585_s3 + $0x7c] sm:$0xf]  ;;  %v4538_v57 = vor.u32 %v4917_v21, %v4537_v31  ;;  %v1709_v15 = vadd.f32 %v6358_v37, %v6171_v44  ;;  %v6498_v34 = vpop.f32.mrf.mxu3 }
 0x21a   :  { %v4542_v7 = vor.u32 %v4916_v23, %v4539_v63  ;;  %v1710_v23 = vadd.f32 %v6373_v1, %v6189_v48  ;;  %v1712_v48 = vadd.f32 %v6389_v39, %v6203_v18  ;;  %v6530_v18 = vadd.f32 %v6416_v32, %v6221_v43 }
 0x21b   :  { %7836 = vst [vmem:[#allocation17_spill] sm:$0xff] %v6466_v45  ;;  %2845 = vmatpush.bf16.msra.mxu2 %v4538_v57  ;;  %v1821_v45 = vrot.slane %v5596_v19, 6  ;;  %v6538_v39 = vadd.f32 %v6431_v10, %v6230_v4  ;;  %v6550_v43 = vadd.f32 %v6445_v41, %v6243_v2  ;;  %v6554_v4 = vadd.f32 %v6457_v55, %v6249_v42 }
 0x21c   :  { %7837 = vst [vmem:[#allocation16_spill] sm:$0xff] %v6469_v38  ;;  %v1876_v38 = vpack.c.b16 %v1861_v20, %v1860_v25  ;;  %2874 = vmatpush.bf16.msra.mxu3 %v4542_v7  ;;  %v1834_v55 = vrot.slane %v5683_v28, 6 }
 0x21d   :  { %v1823_v19 = vrot.slane %v1821_v45, 4 }
 0x220   :  { %v1949_v31 = vpop.f32.mrf.mxu0  ;;  %v2018_v21 = vpop.f32.mrf.mxu1 }
 0x221   :  { %v2078_v5 = vadd.f32 %v1949_v31, %v1708_v17  ;;  %v2079_v59 = vadd.f32 %v2018_v21, %v1709_v15  ;;  %v1826_v17 = vrot.slane %v1824_v50, 4  ;;  %v1827_v31 = vrot.slane %v5655_v58, 6  ;;  %v6517_v21 = vpop.f32.mrf.mxu2 }
 0x222   :  { %v6526_v58 = vadd.f32 %v6408_v47, %v6218_v9 }
 0x223   :  { %v2132_v44 = vadd.f32 %v6490_v56, %v2078_v5  ;;  %v2133_v37 = vadd.f32 %v6492_v40, %v2079_v59  ;;  %4486 = vmatmul.msk.bf16.gmra.mxu0 %vm488_vm1, %v1876_v38  ;;  %4498 = vmatmul.msk.bf16.gmra.mxu1 %vm488_vm1, %v1876_v38  ;;  %v1822_v5 = vsel %vm6259_vm13, %v4456_v52, %v1821_v45 }
 0x224   :  { %v1825_v59 = vsel %vm6259_vm13, %v1823_v19, %v1824_v50  ;;  %v1862_v1 = vunpack.c.l.b16 %v1822_v5  ;;  %v1713_v19 = vadd.f32 %v6392_v61, %v6206_v16  ;;  %v1828_v9 = vsel %vm6259_vm13, %v1826_v17, %v1827_v31 }
 0x225   :  { %v2180_v25 = vmax.f32 %v2132_v44, 0.0  ;;  %v2181_v20 = vmax.f32 %v2133_v37, 0.0  ;;  %v1863_v35 = vunpack.c.l.b16 %v1825_v59  ;;  %v1831_v37 = vrot.slane %v5660_v53, 6  ;;  %v6540_v53 = vpop.f32.mrf.mxu3 }
 0x226   :  { %v6546_v61 = vadd.f32 %v6443_v26, %v6240_v6  ;;  %v4656_v6 = vld [vmem:[%s7585_s3 + $0x118] sm:$0xff]  ;;  %v1864_v41 = vunpack.c.l.b16 %v1828_v9 }
 0x227   :  { %v2228_v57 = vmax.f32 %v2180_v25, %v2181_v20  ;;  %v1877_v47 = vpack.c.b16 %v1863_v35, %v1862_v1  ;;  %v1832_v32 = vsel %vm6259_vm13, %v4457_v33, %v1831_v37  ;;  %v3367_v5 = vunpack.c.h.b16 %v4656_v6 }
 0x228   :  { %v1951_v63 = vpop.f32.mrf.mxu0  ;;  %v2020_v38 = vpop.f32.mrf.mxu1  ;;  %v1833_v17 = vrot.slane %v1831_v37, 4  ;;  %v6572_v33 = vrot.slane %v1834_v55, 4  ;;  %v4683_v37 = vld [vmem:[%s7585_s3 + $0x108] sm:$0xf] }
 0x229   :  { %v2260_v15 = vrot.slane %v2228_v57, 1  ;;  %v2080_v46 = vadd.f32 %v1951_v63, %v1710_v23  ;;  %v2081_v7 = vadd.f32 %v2020_v38, %v1711_v27  ;;  %v1865_v27 = vunpack.c.l.b16 %v1832_v32 }
 0x22a   :  { %v3377_v31 = vpack.c.b16 %v3367_v5, %v3367_v5 }
 0x22b   :  { %v2276_v45 = vmax.f32 %v2228_v57, %v2260_v15  ;;  %v2134_v52 = vadd.f32 %v6490_v56, %v2080_v46  ;;  %v2135_v44 = vadd.f32 %v6492_v40, %v2081_v7  ;;  %v3366_v57 = vunpack.c.l.b16 %v4656_v6  ;;  %v4933_v6 = vld [vmem:[%s7585_s3 + $0x10c] sm:$0xf0] }
 0x22c   :  { %v3402_v32 = vsel %vm2559_vm14, %v3377_v31, 0 }
 0x22d   :  { %v2356_v50 = vrot.slane %v2276_v45, 1  ;;  %v2182_v16 = vmax.f32 %v2134_v52, 0.0  ;;  %v2183_v3 = vmax.f32 %v2135_v44, 0.0  ;;  %v2372_v26 = vrot.slane %v2276_v45, 2  ;;  %3436 = vmatpush.bf16.msrb.mxu1 %v3402_v32  ;;  %v4913_v32 = vld [vmem:[%s7585_s3 + $0x5c] sm:$0xf0] }
 0x22e   :  { %v2388_v59 = vrot.slane %v2276_v45, 3  ;;  %v3376_v7 = vpack.c.b16 %v3366_v57, %v3366_v57  ;;  %v4684_v57 = vor.u32 %v4933_v6, %v4683_v37  ;;  %v4677_v37 = vld [vmem:[%s7585_s3 + $0x100] sm:$0xf0]  ;;  %v4912_v6 = vld [vmem:[%s7585_s3 + $0x5c] sm:$0xf] }
 0x22f   :  { %v2229_v62 = vmax.f32 %v2182_v16, %v2183_v3  ;;  %v2533_v25 = vsel %vm2532_vm15, %v2276_v45, %v2356_v50  ;;  %v1837_v45 = vrot.slane %v7763_v51, 6  ;;  %v6578_v16 = vpop.f32.mrf.mxu3 }
 0x230   :  { %v1954_v2 = vpop.f32.mrf.mxu0  ;;  %v2023_v10 = vpop.f32.mrf.mxu1  ;;  %v2542_v15 = vsel %vm1756_vm11, %v2533_v25, %v2372_v26  ;;  %v4932_v26 = vld [vmem:[%s7585_s3 + $0x10c] sm:$0xf]  ;;  %v6590_v25 = vpack.c.b16 %v1865_v27, %v1864_v41 }
 0x231   :  { %v2082_v20 = vadd.f32 %v1954_v2, %v1712_v48  ;;  %v2083_v42 = vadd.f32 %v2023_v10, %v1713_v19  ;;  %v2292_v23 = vrot.slane %v2229_v62, 1  ;;  %v6568_v48 = vpop.f32.mrf.mxu2  ;;  %v2551_v9 = vsel %vm936_vm8, %v2542_v15, %v2388_v59 }
 0x233   :  { %v2136_v63 = vadd.f32 %v6490_v56, %v2082_v20  ;;  %v2137_v38 = vadd.f32 %v6492_v40, %v2083_v42  ;;  %4487 = vmatmul.msk.bf16.gmra.mxu0 %vm488_vm1, %v1877_v47  ;;  %4499 = vmatmul.msk.bf16.gmra.mxu1 %vm488_vm1, %v1877_v47  ;;  %v2308_v46 = vmax.f32 %v2229_v62, %v2292_v23  ;;  %v3399_v47 = vsel %vm2559_vm14, %v3376_v7, 0  ;;  %v4529_v20 = vld [vmem:[%s7585_s3 + $0x68] sm:$0xf]  ;;  %v4915_v42 = vld [vmem:[%s7585_s3 + $0x6c] sm:$0xf0] }
 0x234   :  { %v4914_v23 = vld [vmem:[%s7585_s3 + $0x6c] sm:$0xf]  ;;  %3407 = vmatpush.bf16.msrb.mxu0 %v3399_v47  ;;  %v6632_v47 = vsel %vm6259_vm13, %v1833_v17, %v1834_v55  ;;  %v4523_v17 = vld [vmem:[%s7585_s3 + $0x60] sm:$0xf0] }
 0x235   :  { %v2184_v1 = vmax.f32 %v2136_v63, 0.0  ;;  %v2185_v35 = vmax.f32 %v2137_v38, 0.0  ;;  %v2412_v52 = vrot.slane %v2308_v46, 4  ;;  %v2428_v44 = vrot.slane %v2308_v46, 5  ;;  %v4531_v63 = vld [vmem:[%s7585_s3 + $0x70] sm:$0xf0] }
 0x236   :  { %v2444_v19 = vrot.slane %v2308_v46, 6  ;;  %v2460_v50 = vrot.slane %v2308_v46, 7  ;;  %v4685_v38 = vld [vmem:[%s7585_s3 + $0x110] sm:$0xf0]  ;;  %v4530_v46 = vor.u32 %v4915_v42, %v4529_v20  ;;  %v4534_v7 = vor.u32 %v4914_v23, %v4531_v63  ;;  %v4667_v42 = vld [vmem:[%s7585_s3 + $0xe8] sm:$0xf] }
 0x237   :  { %v2230_v3 = vmax.f32 %v2184_v1, %v2185_v35  ;;  %v2560_v62 = vsel %vm2559_vm14, %v2551_v9, %v2412_v52  ;;  %v4688_v31 = vor.u32 %v4932_v26, %v4685_v38  ;;  %v4675_v1 = vld [vmem:[%s7585_s3 + $0xf8] sm:$0xf]  ;;  %v4526_v20 = vor.u32 %v4912_v6, %v4523_v17  ;;  %v4929_v23 = vld [vmem:[%s7585_s3 + $0xec] sm:$0xf0]  ;;  %v4928_v63 = vld [vmem:[%s7585_s3 + $0xec] sm:$0xf] }
 0x238   :  { %v1956_v2 = vpop.f32.mrf.mxu0  ;;  %v2025_v10 = vpop.f32.mrf.mxu1  ;;  %v2569_v5 = vsel %vm2568_vm2, %v2560_v62, %v2428_v44  ;;  %2846 = vmatpush.bf16.msra.mxu2 %v4530_v46  ;;  %2875 = vmatpush.bf16.msra.mxu3 %v4534_v7  ;;  %v4669_v38 = vld [vmem:[%s7585_s3 + $0xf0] sm:$0xf0] }
 0x239   :  { %v2324_v59 = vrot.slane %v2230_v3, 1  ;;  %v2084_v41 = vadd.f32 %v1956_v2, %v6526_v58  ;;  %v2085_v27 = vadd.f32 %v2025_v10, %v6530_v18  ;;  %v2577_v15 = vsel %vm525_vm0, %v2569_v5, %v2444_v19  ;;  %v4931_v58 = vld [vmem:[%s7585_s3 + $0xfc] sm:$0xf0]  ;;  %v4930_v18 = vld [vmem:[%s7585_s3 + $0xfc] sm:$0xf]  ;;  %3408 = vmatpush.bf16.msrb.mxu0 %v4684_v57  ;;  %3437 = vmatpush.bf16.msrb.mxu1 %v4688_v31  ;;  %v6653_v57 = vpop.f32.mrf.mxu2 }
 0x23a   :  { %v2586_v35 = vsel %vm2585_vm3, %v2577_v15, %v2460_v50  ;;  %v4676_v50 = vor.u32 %v4931_v58, %v4675_v1  ;;  %v4680_v55 = vor.u32 %v4930_v18, %v4677_v37  ;;  %v4672_v58 = vor.u32 %v4928_v63, %v4669_v38  ;;  %v4513_v18 = vld [vmem:[%s7585_s3 + $0x48] sm:$0xf] }
 0x23b   :  { %v2340_v52 = vmax.f32 %v2230_v3, %v2324_v59  ;;  %v2138_v44 = vadd.f32 %v6490_v56, %v2084_v41  ;;  %v2139_v19 = vadd.f32 %v6492_v40, %v2085_v27  ;;  %v6626_v9 = vpack.c.bf16 %v2586_v35, %v2586_v35  ;;  %v4521_v3 = vld [vmem:[%s7585_s3 + $0x58] sm:$0xf]  ;;  %v4911_v35 = vld [vmem:[%s7585_s3 + $0x4c] sm:$0xf0] }
 0x23c   :  { %v4522_v10 = vor.u32 %v4913_v32, %v4521_v3  ;;  %v4668_v27 = vor.u32 %v4929_v23, %v4667_v42  ;;  %2876 = vmatpush.bf16.msra.mxu3 %v4526_v20  ;;  %v4515_v32 = vld [vmem:[%s7585_s3 + $0x50] sm:$0xf0]  ;;  %v4661_v20 = vld [vmem:[%s7585_s3 + $0xe0] sm:$0xf0] }
 0x23d   :  { %v2484_v26 = vrot.slane %v2340_v52, 1  ;;  %v2500_v62 = vrot.slane %v2340_v52, 2  ;;  %v2186_v28 = vmax.f32 %v2138_v44, 0.0  ;;  %v2187_v2 = vmax.f32 %v2139_v19, 0.0  ;;  %v6673_v44 = vpop.f32.mrf.mxu3  ;;  %3409 = vmatpush.bf16.msrb.mxu0 %v4676_v50  ;;  %3438 = vmatpush.bf16.msrb.mxu1 %v4680_v55 }
 0x23e   :  { %v2644_v5 = vshrl.u32 %v6626_v9, 16  ;;  %v2516_v59 = vrot.slane %v2340_v52, 3  ;;  %v2647_v15 = vshll.u32 %v6626_v9, 16  ;;  %2847 = vmatpush.bf16.msra.mxu2 %v4522_v10  ;;  %v4926_v10 = vld [vmem:[%s7585_s3 + $0xdc] sm:$0xf] }
 0x23f   :  { %v2594_v41 = vsel %vm2532_vm15, %v2340_v52, %v2484_v26  ;;  %v2231_v7 = vmax.f32 %v2186_v28, %v2187_v2  ;;  %v4910_v52 = vld [vmem:[%s7585_s3 + $0x4c] sm:$0xf]  ;;  %v4514_v28 = vor.u32 %v4911_v35, %v4513_v18  ;;  %v4659_v2 = vld [vmem:[%s7585_s3 + $0xd8] sm:$0xf] }
 0x240   :  { %v2602_v46 = vsel %vm1756_vm11, %v2594_v41, %v2500_v62  ;;  %v1959_v31 = vpop.f32.mrf.mxu0  ;;  %v2028_v1 = vpop.f32.mrf.mxu1  ;;  %v2646_v6 = vrot.slane %v2644_v5, 4  ;;  %v4518_v17 = vor.u32 %v4910_v52, %v4515_v32  ;;  %v2649_v42 = vrot.slane %v2647_v15, 5 }
 0x241   :  { %v2610_v19 = vsel %vm936_vm8, %v2602_v46, %v2516_v59  ;;  %v2086_v37 = vadd.f32 %v1959_v31, %v6534_v49  ;;  %v2087_v3 = vadd.f32 %v2028_v1, %v6538_v39  ;;  %v2261_v62 = vrot.slane %v2231_v7, 1  ;;  %v4927_v49 = vld [vmem:[%s7585_s3 + $0xdc] sm:$0xf0]  ;;  %3410 = vmatpush.bf16.msrb.mxu0 %v4668_v27  ;;  %3439 = vmatpush.bf16.msrb.mxu1 %v4672_v58 }
 0x242   :  { %v6681_v26 = vpack.c.bf16 %v2610_v19, %v2610_v19  ;;  %v4660_v55 = vor.u32 %v4927_v49, %v4659_v2  ;;  %2848 = vmatpush.bf16.msra.mxu2 %v4514_v28  ;;  %2877 = vmatpush.bf16.msra.mxu3 %v4518_v17  ;;  %v4664_v59 = vor.u32 %v4926_v10, %v4661_v20  ;;  %v3239_v63 = vrot.slane %v2644_v5, 5 }
 0x243   :  { %v2140_v39 = vadd.f32 %v6490_v56, %v2086_v37  ;;  %v2141_v50 = vadd.f32 %v6492_v40, %v2087_v3  ;;  %4488 = vmatmul.msk.bf16.gmra.mxu0 %vm488_vm1, %v6590_v25  ;;  %4500 = vmatmul.msk.bf16.gmra.mxu1 %vm488_vm1, %v6590_v25  ;;  %v2277_v23 = vmax.f32 %v2231_v7, %v2261_v62  ;;  %v3240_v31 = vrot.slane %v2647_v15, 6 }
 0x244   :  { %v2653_v41 = vshll.u32 %v6681_v26, 16  ;;  %v2650_v25 = vor.u32 %v2649_v42, %v2646_v6  ;;  %v1838_v7 = vsel %vm6259_vm13, %v6572_v33, %v1837_v45  ;;  %v1721_v52 = vadd.f32 %v6463_v29, %v6252_v12  ;;  %v6716_v6 = vpop.f32.mrf.mxu2 }
 0x245   :  { %v2188_v38 = vmax.f32 %v2140_v39, 0.0  ;;  %v2189_v46 = vmax.f32 %v2141_v50, 0.0  ;;  %v2357_v1 = vrot.slane %v2277_v23, 1  ;;  %v2373_v18 = vrot.slane %v2277_v23, 2  ;;  %3411 = vmatpush.bf16.msrb.mxu0 %v4660_v55  ;;  %3440 = vmatpush.bf16.msrb.mxu1 %v4664_v59  ;;  %v6725_v49 = vpop.f32.mrf.mxu3 }
 0x246   :  { %v6707_v35 = vrot.slane %v2653_v41, 5  ;;  %v1866_v19 = vunpack.c.l.b16 %v6632_v47  ;;  %v3243_v27 = vshrl.u32 %v6681_v26, 16  ;;  %v6714_v3 = vrot.slane %v2650_v25, 4 }
 0x247   :  { %v2232_v5 = vmax.f32 %v2188_v38, %v2189_v46  ;;  %v2534_v15 = vsel %vm2532_vm15, %v2277_v23, %v2357_v1  ;;  %v3241_v51 = vor.u32 %v3240_v31, %v3239_v63  ;;  %v3246_v32 = vrot.slane %v2653_v41, 6 }
 0x248   :  { %v1961_v58 = vpop.f32.mrf.mxu0  ;;  %v2030_v37 = vpop.f32.mrf.mxu1  ;;  %v1867_v29 = vunpack.c.l.b16 %v1838_v7  ;;  %v2389_v47 = vrot.slane %v2277_v23, 3  ;;  %v2543_v62 = vsel %vm1756_vm11, %v2534_v15, %v2373_v18  ;;  %v2656_v17 = vsel %vm5284_vm4, %v6714_v3, %v6707_v35 }
 0x249   :  { %v2293_v33 = vrot.slane %v2232_v5, 1  ;;  %v2088_v45 = vadd.f32 %v1961_v58, %v6546_v61  ;;  %v2089_v12 = vadd.f32 %v2030_v37, %v6550_v43  ;;  %v3245_v2 = vrot.slane %v3243_v27, 5 }
 0x24a   :  { %v4591_v43 = vrot.slane %v6626_v9, 9  ;;  %v3242_v55 = vrot.slane %v3241_v51, 4  ;;  %v3050_v20 = vrot.slane %v6681_v26, 5  ;;  %v3480_v42 = vrot.slane %v6681_v26, 6 }
 0x24b   :  { %v2309_v39 = vmax.f32 %v2232_v5, %v2293_v33  ;;  %v2142_v50 = vadd.f32 %v6490_v56, %v2088_v45  ;;  %v2143_v61 = vadd.f32 %v6492_v40, %v2089_v12  ;;  %v3247_v10 = vor.u32 %v3246_v32, %v3245_v2  ;;  %v7839_v2 = vld [vmem:[#allocation30_spill] sm:$0xff] }
 0x24c   :  { %v2552_v23 = vsel %vm936_vm8, %v2543_v62, %v2389_v47  ;;  %v4697_v63 = vrot.slane %v6626_v9, 10  ;;  %v6740_v31 = vsel %vm5834_vm10, %v4591_v43, %v3050_v20  ;;  %v1879_v26 = vpack.c.b16 %v1867_v29, %v1866_v19  ;;  %v6751_v47 = vpop.f32.mrf.mxu2 }
 0x24d   :  { %v2413_v59 = vrot.slane %v2309_v39, 4  ;;  %v2429_v41 = vrot.slane %v2309_v39, 5  ;;  %v2190_v38 = vmax.f32 %v2142_v50, 0.0  ;;  %v2191_v46 = vmax.f32 %v2143_v61, 0.0  ;;  %v7841_v50 = vld [vmem:[#allocation27_spill] sm:$0xff] }
 0x24e   :  { %v6736_v25 = vsel %vm5752_vm7, %v3242_v55, %v3247_v10  ;;  %v2445_v1 = vrot.slane %v2309_v39, 6  ;;  %v6745_v7 = vsel %vm6259_vm13, %v4697_v63, %v3480_v42  ;;  %v2461_v5 = vrot.slane %v2309_v39, 7  ;;  %v6765_v55 = vpop.f32.mrf.mxu3 }
 0x24f   :  { %v2561_v18 = vsel %vm2559_vm14, %v2552_v23, %v2413_v59  ;;  %v2233_v15 = vmax.f32 %v2190_v38, %v2191_v46  ;;  %v1722_v39 = vadd.f32 %v6495_v0, %v7839_v2  ;;  %v1724_v61 = vadd.f32 %v6517_v21, %v7841_v50 }
 0x250   :  { %v2570_v27 = vsel %vm2568_vm2, %v2561_v18, %v2429_v41  ;;  %v1964_v58 = vpop.f32.mrf.mxu0  ;;  %v2033_v37 = vpop.f32.mrf.mxu1  ;;  %v2907_v63 = vunpack.c.l.b16 %v6626_v9  ;;  %v7842_v9 = vld [vmem:[#allocation28_spill] sm:$0xff] }
 0x251   :  { %v2578_v51 = vsel %vm525_vm0, %v2570_v27, %v2445_v1  ;;  %v2090_v32 = vadd.f32 %v1964_v58, %v6554_v4  ;;  %v2091_v33 = vadd.f32 %v2033_v37, %v1721_v52  ;;  %v2325_v12 = vrot.slane %v2233_v15, 1  ;;  %v7840_v4 = vld [vmem:[#allocation26_spill] sm:$0xff] }
 0x252   :  { %v2587_v45 = vsel %vm2585_vm3, %v2578_v51, %v2461_v5  ;;  %v1723_v52 = vadd.f32 %v6498_v34, %v7840_v4 }
 0x253   :  { %v6753_v19 = vpack.c.bf16 %v2587_v45, %v2587_v45  ;;  %v2144_v29 = vadd.f32 %v6490_v56, %v2090_v32  ;;  %v2145_v62 = vadd.f32 %v6492_v40, %v2091_v33  ;;  %4489 = vmatmul.msk.bf16.gmra.mxu0 %vm488_vm1, %v1879_v26  ;;  %4501 = vmatmul.msk.bf16.gmra.mxu1 %vm488_vm1, %v1879_v26  ;;  %vm2822_vm1 = vcmask 588800  }
 0x254   :  { %v2341_v43 = vmax.f32 %v2233_v15, %v2325_v12  ;;  %v1725_v33 = vadd.f32 %v6540_v53, %v7842_v9  ;;  %v6779_v45 = vadd.f32 %v6568_v48, %v6289_v60  ;;  %v3090_v60 = vunpack.c.l.b16 %v6740_v31 }
 0x255   :  { %v2192_v10 = vmax.f32 %v2144_v29, 0.0  ;;  %v2193_v20 = vmax.f32 %v2145_v62, 0.0  ;;  %v2658_v42 = vshrl.u32 %v6753_v19, 16  ;;  %v2661_v23 = vshll.u32 %v6753_v19, 16 }
 0x256   :  { %v2485_v59 = vrot.slane %v2341_v43, 1  ;;  %v2501_v41 = vrot.slane %v2341_v43, 2  ;;  %v2908_v0 = vunpack.c.l.b16 %v6753_v19  ;;  %v2517_v38 = vrot.slane %v2341_v43, 3 }
 0x257   :  { %v2234_v34 = vmax.f32 %v2192_v10, %v2193_v20  ;;  %v2660_v46 = vrot.slane %v2658_v42, 4  ;;  %v2663_v1 = vrot.slane %v2661_v23, 5  ;;  %v3249_v5 = vrot.slane %v2658_v42, 5 }
 0x258   :  { %v2595_v21 = vsel %vm2532_vm15, %v2341_v43, %v2485_v59  ;;  %v1966_v18 = vpop.f32.mrf.mxu0  ;;  %v2035_v26 = vpop.f32.mrf.mxu1  ;;  %v3250_v27 = vrot.slane %v2661_v23, 6  ;;  %v6772_v15 = vpack.c.b16 %v2908_v0, %v2907_v63  ;;  %v3520_v48 = vunpack.c.l.b16 %v6745_v7 }
 0x259   :  { %v2603_v58 = vsel %vm1756_vm11, %v2595_v21, %v2501_v41  ;;  %v2262_v37 = vrot.slane %v2234_v34, 1  ;;  %v2092_v51 = vadd.f32 %v1966_v18, %v1722_v39  ;;  %v2093_v32 = vadd.f32 %v2035_v26, %v1723_v52  ;;  %v6791_v52 = vpop.f32.mrf.mxu2  ;;  %v6794_v0 = vpop.f32.mrf.mxu3 }
 0x25a   :  { %v2611_v12 = vsel %vm936_vm8, %v2603_v58, %v2517_v38  ;;  %v2664_v29 = vor.u32 %v2663_v1, %v2660_v46  ;;  %v2765_v39 = vunpack.c.l.b16 %v2656_v17  ;;  %v3251_v53 = vor.u32 %v3250_v27, %v3249_v5 }
 0x25b   :  { %v2621_v62 = vpack.c.bf16 %v2611_v12, %v2611_v12  ;;  %v2278_v2 = vmax.f32 %v2234_v34, %v2262_v37  ;;  %v2146_v4 = vadd.f32 %v6490_v56, %v2092_v51  ;;  %v2147_v50 = vadd.f32 %v6492_v40, %v2093_v32 }
 0x25c   :  { %v4592_v42 = vrot.slane %v6753_v19, 9  ;;  %v2665_v3 = vrot.slane %v2664_v29, 4  ;;  %v4698_v17 = vrot.slane %v6753_v19, 10  ;;  %v3252_v1 = vrot.slane %v3251_v53, 4 }
 0x25d   :  { %v2358_v43 = vrot.slane %v2278_v2, 1  ;;  %v2374_v10 = vrot.slane %v2278_v2, 2  ;;  %v2194_v20 = vmax.f32 %v2146_v4, 0.0  ;;  %v2195_v23 = vmax.f32 %v2147_v50, 0.0 }
 0x25e   :  { %v2667_v59 = vshll.u32 %v2621_v62, 16  ;;  %v3253_v41 = vshrl.u32 %v2621_v62, 16  ;;  %v3054_v63 = vrot.slane %v2621_v62, 5  ;;  %v3484_v31 = vrot.slane %v2621_v62, 6 }
 0x25f   :  { %v2535_v35 = vsel %vm2532_vm15, %v2278_v2, %v2358_v43  ;;  %v2235_v7 = vmax.f32 %v2194_v20, %v2195_v23  ;;  %v2390_v62 = vrot.slane %v2278_v2, 3 }
 0x260   :  { %v1969_v38 = vpop.f32.mrf.mxu0  ;;  %v2038_v34 = vpop.f32.mrf.mxu1  ;;  %v2669_v46 = vrot.slane %v2667_v59, 5  ;;  %v3255_v21 = vrot.slane %v3253_v41, 5  ;;  %v2544_v18 = vsel %vm1756_vm11, %v2535_v35, %v2374_v10  ;;  %v3256_v27 = vrot.slane %v2667_v59, 6 }
 0x261   :  { %v2094_v26 = vadd.f32 %v1969_v38, %v1724_v61  ;;  %v2095_v5 = vadd.f32 %v2038_v34, %v1725_v33  ;;  %v2294_v58 = vrot.slane %v2235_v7, 1  ;;  %v3055_v51 = vsel %vm5834_vm10, %v4592_v42, %v3054_v63  ;;  %v6811_v41 = vpop.f32.mrf.mxu2  ;;  %v6822_v34 = vpop.f32.mrf.mxu3 }
 0x262   :  { %v2670_v37 = vsel %vm5284_vm4, %v2665_v3, %v2669_v46  ;;  %v3485_v19 = vsel %vm6259_vm13, %v4698_v17, %v3484_v31  ;;  %v3257_v29 = vor.u32 %v3256_v27, %v3255_v21  ;;  %v3091_v33 = vunpack.c.l.b16 %v3055_v51 }
 0x263   :  { %v2148_v32 = vadd.f32 %v6490_v56, %v2094_v26  ;;  %v2149_v9 = vadd.f32 %v6492_v40, %v2095_v5  ;;  %v2766_v12 = vunpack.c.l.b16 %v2670_v37  ;;  %v2310_v61 = vmax.f32 %v2235_v7, %v2294_v58 }
 0x264   :  { %v3521_v4 = vunpack.c.l.b16 %v3485_v19  ;;  %v3258_v10 = vsel %vm5752_vm7, %v3252_v1, %v3257_v29  ;;  %v2553_v20 = vsel %vm936_vm8, %v2544_v18, %v2390_v62  ;;  %v3329_v59 = vunpack.c.l.b16 %v6736_v25 }
 0x265   :  { %v2196_v50 = vmax.f32 %v2148_v32, 0.0  ;;  %v2197_v53 = vmax.f32 %v2149_v9, 0.0  ;;  %v2773_v43 = vpack.c.b16 %v2766_v12, %v2765_v39  ;;  %v2414_v42 = vrot.slane %v2310_v61, 4 }
 0x266   :  { %v2430_v23 = vrot.slane %v2310_v61, 5  ;;  %v3330_v2 = vunpack.c.l.b16 %v3258_v10  ;;  %v6815_v35 = vpack.c.b16 %v3091_v33, %v3090_v60  ;;  %v6817_v39 = vpack.c.b16 %v3521_v4, %v3520_v48 }
 0x267   :  { %v2236_v63 = vmax.f32 %v2196_v50, %v2197_v53  ;;  %4543 = vmatmul.msk.bf16.vlgmr.msra.gmra.mxu2 %vm2822_vm1, %v2773_v43  ;;  %4547 = vmatmul.msk.bf16.vlgmr.msra.gmra.mxu3 %vm2822_vm1, %v2773_v43  ;;  %v1727_v3 = vadd.f32 %v6578_v16, %v6292_v30  ;;  %v2446_v17 = vrot.slane %v2310_v61, 6  ;;  %v2462_v31 = vrot.slane %v2310_v61, 7 }
 0x268   :  { %v2562_v7 = vsel %vm2559_vm14, %v2553_v20, %v2414_v42  ;;  %v1971_v25 = vpop.f32.mrf.mxu0  ;;  %v2040_v38 = vpop.f32.mrf.mxu1  ;;  %v3337_v21 = vpack.c.b16 %v3330_v2, %v3329_v59  ;;  %v1728_v9 = vadd.f32 %v6653_v57, %v6296_v14  ;;  %v1729_v12 = vadd.f32 %v6673_v44, %v6299_v13 }
 0x269   :  { %v2571_v46 = vsel %vm2568_vm2, %v2562_v7, %v2430_v23  ;;  %v2326_v1 = vrot.slane %v2236_v63, 1  ;;  %v2096_v60 = vadd.f32 %v1971_v25, %v6779_v45  ;;  %v2097_v18 = vadd.f32 %v2040_v38, %v1727_v3  ;;  %v6842_v10 = vpop.f32.mrf.mxu2  ;;  %v6847_v2 = vpop.f32.mrf.mxu3 }
 0x26a   :  { %v2579_v48 = vsel %vm525_vm0, %v2571_v46, %v2446_v17  ;;  %4689 = vmatmul.msk.bf16.vlgmr.msrb.gmra.mxu0 %vm2822_vm1, %v3337_v21  ;;  %4693 = vmatmul.msk.bf16.vlgmr.msrb.gmra.mxu1 %vm2822_vm1, %v3337_v21 }
 0x26b   :  { %v2588_v26 = vsel %vm2585_vm3, %v2579_v48, %v2462_v31  ;;  %v2342_v30 = vmax.f32 %v2236_v63, %v2326_v1  ;;  %v2150_v16 = vadd.f32 %v6490_v56, %v2096_v60  ;;  %v2151_v27 = vadd.f32 %v6492_v40, %v2097_v18 }
 0x26c   :  { %v6831_v5 = vpack.c.bf16 %v2588_v26, %v2588_v26  ;;  %v1730_v63 = vadd.f32 %v6716_v6, %v6309_v54  ;;  %v7843_v6 = vld [vmem:[#allocation29_spill] sm:$0xff] }
 0x26d   :  { %v2486_v58 = vrot.slane %v2342_v30, 1  ;;  %v2502_v37 = vrot.slane %v2342_v30, 2  ;;  %v2198_v51 = vmax.f32 %v2150_v16, 0.0  ;;  %v2199_v45 = vmax.f32 %v2151_v27, 0.0 }
 0x26e   :  { %v2672_v19 = vshrl.u32 %v6831_v5, 16  ;;  %v2675_v32 = vshll.u32 %v6831_v5, 16  ;;  %v2518_v29 = vrot.slane %v2342_v30, 3  ;;  %v4593_v38 = vrot.slane %v6831_v5, 9 }
 0x26f   :  { %v2596_v62 = vsel %vm2532_vm15, %v2342_v30, %v2486_v58  ;;  %v2237_v33 = vmax.f32 %v2198_v51, %v2199_v45  ;;  %v1731_v30 = vadd.f32 %v6725_v49, %v7843_v6 }
 0x270   :  { %v2604_v61 = vsel %vm1756_vm11, %v2596_v62, %v2502_v37  ;;  %v1974_v4 = vpop.f32.mrf.mxu0  ;;  %v2043_v50 = vpop.f32.mrf.mxu1  ;;  %v2674_v53 = vrot.slane %v2672_v19, 4  ;;  %v2677_v43 = vrot.slane %v2675_v32, 5  ;;  %v3259_v14 = vrot.slane %v2672_v19, 5 }
 0x271   :  { %v2612_v20 = vsel %vm936_vm8, %v2604_v61, %v2518_v29  ;;  %v2098_v42 = vadd.f32 %v1974_v4, %v1728_v9  ;;  %v2099_v23 = vadd.f32 %v2043_v50, %v1729_v12  ;;  %v2263_v59 = vrot.slane %v2237_v33, 1  ;;  %v6869_v50 = vpop.f32.mrf.mxu2 }
 0x272   :  { %v2623_v57 = vpack.c.bf16 %v2612_v20, %v2612_v20  ;;  %v2678_v13 = vor.u32 %v2677_v43, %v2674_v53  ;;  %v3260_v44 = vrot.slane %v2675_v32, 6  ;;  %v4699_v62 = vrot.slane %v6831_v5, 10 }
 0x273   :  { %v2152_v3 = vadd.f32 %v6490_v56, %v2098_v42  ;;  %v2153_v17 = vadd.f32 %v6492_v40, %v2099_v23  ;;  %v2279_v31 = vmax.f32 %v2237_v33, %v2263_v59 }
 0x274   :  { %v6851_v7 = vrot.slane %v2678_v13, 4  ;;  %v2681_v25 = vshll.u32 %v2623_v57, 16  ;;  %v3263_v21 = vshrl.u32 %v2623_v57, 16  ;;  %v3058_v60 = vrot.slane %v2623_v57, 5 }
 0x275   :  { %v2200_v46 = vmax.f32 %v2152_v3, 0.0  ;;  %v2201_v1 = vmax.f32 %v2153_v17, 0.0  ;;  %v2359_v48 = vrot.slane %v2279_v31, 1  ;;  %v2375_v18 = vrot.slane %v2279_v31, 2  ;;  %v7844_v17 = vld [vmem:[#allocation31_spill] sm:$0xff] }
 0x276   :  { %v6854_v26 = vrot.slane %v2681_v25, 5  ;;  %v3261_v54 = vor.u32 %v3260_v44, %v3259_v14  ;;  %v3265_v27 = vrot.slane %v3263_v21, 5  ;;  %v3266_v58 = vrot.slane %v2681_v25, 6 }
 0x277   :  { %v2238_v16 = vmax.f32 %v2200_v46, %v2201_v1  ;;  %v2536_v37 = vsel %vm2532_vm15, %v2279_v31, %v2359_v48  ;;  %v6865_v32 = vsel %vm5834_vm10, %v4593_v38, %v3058_v60  ;;  %v3488_v9 = vrot.slane %v2623_v57, 6  ;;  %v6881_v57 = vpop.f32.mrf.mxu3  ;;  %v7845_v38 = vld [vmem:[#allocation32_spill] sm:$0xff] }
 0x278   :  { %v1976_v51 = vpop.f32.mrf.mxu0  ;;  %v2045_v45 = vpop.f32.mrf.mxu1  ;;  %v2684_v19 = vsel %vm5284_vm4, %v6851_v7, %v6854_v26  ;;  %v2545_v61 = vsel %vm1756_vm11, %v2536_v37, %v2375_v18  ;;  %v3262_v33 = vrot.slane %v3261_v54, 4  ;;  %v3267_v4 = vor.u32 %v3266_v58, %v3265_v27 }
 0x279   :  { %v2295_v12 = vrot.slane %v2238_v16, 1  ;;  %v2100_v29 = vadd.f32 %v1976_v51, %v1730_v63  ;;  %v2101_v49 = vadd.f32 %v2045_v45, %v1731_v30  ;;  %v6875_v42 = vsel %vm6259_vm13, %v4699_v62, %v3488_v9  ;;  %v7846_v51 = vld [vmem:[#allocation33_spill] sm:$0xff]  ;;  %v7847_v9 = vld [vmem:[#allocation34_spill] sm:$0xff] }
 0x27a   :  { %v2391_v23 = vrot.slane %v2279_v31, 3  ;;  %v6879_v14 = vsel %vm5752_vm7, %v3262_v33, %v3267_v4  ;;  %v1732_v25 = vadd.f32 %v6751_v47, %v7844_v17  ;;  %v1733_v46 = vadd.f32 %v6765_v55, %v7845_v38 }
 0x27b   :  { %v2311_v53 = vmax.f32 %v2238_v16, %v2295_v12  ;;  %v2154_v43 = vadd.f32 %v6490_v56, %v2100_v29  ;;  %v2155_v20 = vadd.f32 %v6492_v40, %v2101_v49  ;;  %v1734_v45 = vadd.f32 %v6791_v52, %v7846_v51  ;;  %v7848_v29 = vld [vmem:[#allocation35_spill] sm:$0xff] }
 0x27c   :  { %v2554_v44 = vsel %vm936_vm8, %v2545_v61, %v2391_v23  ;;  %v1735_v12 = vadd.f32 %v6794_v0, %v7847_v9  ;;  %v1736_v49 = vadd.f32 %v6811_v41, %v7848_v29  ;;  %v6902_v61 = vpop.f32.mrf.mxu2  ;;  %v2767_v51 = vunpack.c.l.b16 %v2684_v19 }
 0x27d   :  { %v2415_v59 = vrot.slane %v2311_v53, 4  ;;  %v2431_v13 = vrot.slane %v2311_v53, 5  ;;  %v2202_v63 = vmax.f32 %v2154_v43, 0.0  ;;  %v2203_v3 = vmax.f32 %v2155_v20, 0.0 }
 0x27e   :  { %v2447_v1 = vrot.slane %v2311_v53, 6  ;;  %v2463_v21 = vrot.slane %v2311_v53, 7 }
 0x27f   :  { %v2563_v31 = vsel %vm2559_vm14, %v2554_v44, %v2415_v59  ;;  %v2239_v48 = vmax.f32 %v2202_v63, %v2203_v3  ;;  %v2909_v59 = vunpack.c.l.b16 %v6831_v5 }
 0x280   :  { %v2572_v60 = vsel %vm2568_vm2, %v2563_v31, %v2431_v13  ;;  %v1979_v18 = vpop.f32.mrf.mxu0  ;;  %v2048_v54 = vpop.f32.mrf.mxu1 }
 0x281   :  { %v2580_v6 = vsel %vm525_vm0, %v2572_v60, %v2447_v1  ;;  %v2102_v30 = vadd.f32 %v1979_v18, %v1732_v25  ;;  %v2103_v16 = vadd.f32 %v2048_v54, %v1733_v46  ;;  %v2327_v58 = vrot.slane %v2239_v48, 1  ;;  %v6908_v13 = vpop.f32.mrf.mxu3  ;;  %v7850_v54 = vld [vmem:[#allocation11_spill] sm:$0xff] }
 0x282   :  { %v2589_v27 = vsel %vm2585_vm3, %v2580_v6, %v2463_v21  ;;  %v6918_v6 = vadd.f32 %v6842_v10, %v7850_v54  ;;  %v3522_v10 = vunpack.c.l.b16 %v6875_v42 }
 0x283   :  { %v6892_v47 = vpack.c.bf16 %v2589_v27, %v2589_v27  ;;  %v2156_v55 = vadd.f32 %v6490_v56, %v2102_v30  ;;  %v2157_v37 = vadd.f32 %v6492_v40, %v2103_v16  ;;  %v2343_v62 = vmax.f32 %v2239_v48, %v2327_v58  ;;  %v7849_v48 = vld [vmem:[#allocation36_spill] sm:$0xff] }
 0x284   :  { %v1737_v18 = vadd.f32 %v6822_v34, %v7849_v48 }
 0x285   :  { %v2204_v33 = vmax.f32 %v2156_v55, 0.0  ;;  %v2205_v4 = vmax.f32 %v2157_v37, 0.0  ;;  %v2686_v53 = vshrl.u32 %v6892_v47, 16  ;;  %v2689_v43 = vshll.u32 %v6892_v47, 16 }
 0x286   :  { %v2487_v20 = vrot.slane %v2343_v62, 1  ;;  %v2503_v23 = vrot.slane %v2343_v62, 2  ;;  %v2910_v52 = vunpack.c.l.b16 %v6892_v47  ;;  %v2519_v0 = vrot.slane %v2343_v62, 3 }
 0x287   :  { %v2240_v44 = vmax.f32 %v2204_v33, %v2205_v4  ;;  %v2688_v41 = vrot.slane %v2686_v53, 4  ;;  %v2691_v63 = vrot.slane %v2689_v43, 5  ;;  %v3269_v38 = vrot.slane %v2686_v53, 5 }
 0x288   :  { %v2597_v3 = vsel %vm2532_vm15, %v2343_v62, %v2487_v20  ;;  %v1981_v17 = vpop.f32.mrf.mxu0  ;;  %v2050_v25 = vpop.f32.mrf.mxu1  ;;  %v3270_v46 = vrot.slane %v2689_v43, 6  ;;  %v6911_v1 = vpack.c.b16 %v2910_v52, %v2909_v59  ;;  %v4594_v62 = vrot.slane %v6892_v47, 9 }
 0x289   :  { %v2605_v31 = vsel %vm1756_vm11, %v2597_v3, %v2503_v23  ;;  %v2264_v21 = vrot.slane %v2240_v44, 1  ;;  %v2104_v5 = vadd.f32 %v1981_v17, %v1734_v45  ;;  %v2105_v60 = vadd.f32 %v2050_v25, %v1735_v12  ;;  %v6931_v20 = vpop.f32.mrf.mxu2 }
 0x28a   :  { %v2613_v30 = vsel %vm936_vm8, %v2605_v31, %v2519_v0  ;;  %v2692_v16 = vor.u32 %v2691_v63, %v2688_v41  ;;  %v3271_v34 = vor.u32 %v3270_v46, %v3269_v38  ;;  %v3092_v45 = vunpack.c.l.b16 %v6865_v32  ;;  %v6935_v41 = vpop.f32.mrf.mxu3 }
 0x28b   :  { %v2625_v27 = vpack.c.bf16 %v2613_v30, %v2613_v30  ;;  %v2280_v58 = vmax.f32 %v2240_v44, %v2264_v21  ;;  %v2158_v55 = vadd.f32 %v6490_v56, %v2104_v5  ;;  %v2159_v37 = vadd.f32 %v6492_v40, %v2105_v60 }
 0x28c   :  { %v2693_v7 = vrot.slane %v2692_v16, 4  ;;  %v4700_v26 = vrot.slane %v6892_v47, 10  ;;  %v3272_v0 = vrot.slane %v3271_v34, 4 }
 0x28d   :  { %v2360_v9 = vrot.slane %v2280_v58, 1  ;;  %v2376_v12 = vrot.slane %v2280_v58, 2  ;;  %v2206_v29 = vmax.f32 %v2158_v55, 0.0  ;;  %v2207_v33 = vmax.f32 %v2159_v37, 0.0 }
 0x28e   :  { %v2695_v4 = vshll.u32 %v2625_v27, 16  ;;  %v3273_v53 = vshrl.u32 %v2625_v27, 16  ;;  %v3062_v43 = vrot.slane %v2625_v27, 5  ;;  %v3492_v19 = vrot.slane %v2625_v27, 6 }
 0x28f   :  { %v2537_v23 = vsel %vm2532_vm15, %v2280_v58, %v2360_v9  ;;  %v2241_v32 = vmax.f32 %v2206_v29, %v2207_v33  ;;  %v2392_v54 = vrot.slane %v2280_v58, 3  ;;  %v3331_v29 = vunpack.c.l.b16 %v6879_v14 }
 0x290   :  { %v1984_v59 = vpop.f32.mrf.mxu0  ;;  %v2053_v42 = vpop.f32.mrf.mxu1  ;;  %v2697_v52 = vrot.slane %v2695_v4, 5  ;;  %v3275_v44 = vrot.slane %v3273_v53, 5  ;;  %v2546_v63 = vsel %vm1756_vm11, %v2537_v23, %v2376_v12  ;;  %v3276_v25 = vrot.slane %v2695_v4, 6 }
 0x291   :  { %v2106_v3 = vadd.f32 %v1984_v59, %v1736_v49  ;;  %v2107_v17 = vadd.f32 %v2053_v42, %v1737_v18  ;;  %v2296_v38 = vrot.slane %v2241_v32, 1  ;;  %v3063_v47 = vsel %vm5834_vm10, %v4594_v62, %v3062_v43 }
 0x292   :  { %v2698_v46 = vsel %vm5284_vm4, %v2693_v7, %v2697_v52  ;;  %v3493_v31 = vsel %vm6259_vm13, %v4700_v26, %v3492_v19  ;;  %v3277_v48 = vor.u32 %v3276_v25, %v3275_v44  ;;  %v3093_v18 = vunpack.c.l.b16 %v3063_v47  ;;  %v6961_v52 = vpop.f32.mrf.mxu2 }
 0x293   :  { %v2160_v21 = vadd.f32 %v6490_v56, %v2106_v3  ;;  %v2161_v5 = vadd.f32 %v6492_v40, %v2107_v17  ;;  %v2768_v60 = vunpack.c.l.b16 %v2698_v46  ;;  %v2312_v49 = vmax.f32 %v2241_v32, %v2296_v38 }
 0x294   :  { %v3523_v30 = vunpack.c.l.b16 %v3493_v31  ;;  %v3278_v37 = vsel %vm5752_vm7, %v3272_v0, %v3277_v48  ;;  %v2555_v34 = vsel %vm936_vm8, %v2546_v63, %v2392_v54  ;;  %v6952_v33 = vpack.c.b16 %v3093_v18, %v3092_v45  ;;  %v6964_v0 = vpop.f32.mrf.mxu3 }
 0x295   :  { %v2208_v16 = vmax.f32 %v2160_v21, 0.0  ;;  %v2209_v27 = vmax.f32 %v2161_v5, 0.0  ;;  %v2774_v55 = vpack.c.b16 %v2768_v60, %v2767_v51  ;;  %v2416_v9 = vrot.slane %v2312_v49, 4  ;;  %v7851_v51 = vld [vmem:[#allocation10_spill] sm:$0xff]  ;;  %v7852_v21 = vld [vmem:[#allocation12_spill] sm:$0xff]  ;;  %v7853_v60 = vld [vmem:[#allocation37_spill] sm:$0xff] }
 0x296   :  { %v2432_v12 = vrot.slane %v2312_v49, 5  ;;  %v3332_v58 = vunpack.c.l.b16 %v3278_v37  ;;  %v6954_v4 = vpack.c.b16 %v3523_v30, %v3522_v10  ;;  %v1739_v53 = vadd.f32 %v6847_v2, %v7851_v51 }
 0x297   :  { %v2242_v62 = vmax.f32 %v2208_v16, %v2209_v27  ;;  %4544 = vmatmul.msk.bf16.gmra.mxu2 %vm2822_vm1, %v2774_v55  ;;  %4548 = vmatmul.msk.bf16.gmra.mxu3 %vm2822_vm1, %v2774_v55  ;;  %v2448_v43 = vrot.slane %v2312_v49, 6  ;;  %v2464_v23 = vrot.slane %v2312_v49, 7  ;;  %v2564_v7 = vsel %vm2559_vm14, %v2555_v34, %v2416_v9 }
 0x298   :  { %v1986_v26 = vpop.f32.mrf.mxu0  ;;  %v2055_v19 = vpop.f32.mrf.mxu1  ;;  %v2573_v14 = vsel %vm2568_vm2, %v2564_v7, %v2432_v12  ;;  %v3338_v59 = vpack.c.b16 %v3332_v58, %v3331_v29  ;;  %v1740_v5 = vadd.f32 %v6869_v50, %v7852_v21  ;;  %v1741_v48 = vadd.f32 %v6881_v57, %v7853_v60 }
 0x299   :  { %v2328_v32 = vrot.slane %v2242_v62, 1  ;;  %v2108_v42 = vadd.f32 %v1986_v26, %v6918_v6  ;;  %v2581_v45 = vsel %vm525_vm0, %v2573_v14, %v2448_v43  ;;  %v2109_v10 = vadd.f32 %v2055_v19, %v1739_v53 }
 0x29a   :  { %v2590_v2 = vsel %vm2585_vm3, %v2581_v45, %v2464_v23  ;;  %4690 = vmatmul.msk.bf16.gmra.mxu0 %vm2822_vm1, %v3338_v59  ;;  %4694 = vmatmul.msk.bf16.gmra.mxu1 %vm2822_vm1, %v3338_v59  ;;  %v1742_v57 = vadd.f32 %v6902_v61, %v6384_v36  ;;  %v1629_v23 = vpop.f32.mrf.mxu2  ;;  %v7854_v61 = vld [vmem:[#allocation38_spill] sm:$0xff] }
 0x29b   :  { %v2344_v44 = vmax.f32 %v2242_v62, %v2328_v32  ;;  %v2162_v63 = vadd.f32 %v6490_v56, %v2108_v42  ;;  %v6970_v3 = vpack.c.bf16 %v2590_v2, %v2590_v2  ;;  %v2163_v6 = vadd.f32 %v6492_v40, %v2109_v10 }
 0x29c   :  { %v1698_v32 = vpop.f32.mrf.mxu3 }
 0x29d   :  { %v2488_v17 = vrot.slane %v2344_v44, 1  ;;  %v2504_v25 = vrot.slane %v2344_v44, 2  ;;  %v2210_v38 = vmax.f32 %v2162_v63, 0.0  ;;  %v2211_v46 = vmax.f32 %v2163_v6, 0.0 }
 0x29e   :  { %v2700_v47 = vshrl.u32 %v6970_v3, 16  ;;  %v2703_v31 = vshll.u32 %v6970_v3, 16  ;;  %v2520_v54 = vrot.slane %v2344_v44, 3  ;;  %v4595_v14 = vrot.slane %v6970_v3, 9 }
 0x29f   :  { %v2598_v49 = vsel %vm2532_vm15, %v2344_v44, %v2488_v17  ;;  %v2243_v30 = vmax.f32 %v2210_v38, %v2211_v46  ;;  %v1743_v6 = vadd.f32 %v6908_v13, %v7854_v61  ;;  %v4701_v13 = vrot.slane %v6970_v3, 10 }
 0x2a0   :  { %v2606_v18 = vsel %vm1756_vm11, %v2598_v49, %v2504_v25  ;;  %v1989_v16 = vpop.f32.mrf.mxu0  ;;  %v2058_v27 = vpop.f32.mrf.mxu1  ;;  %v2702_v55 = vrot.slane %v2700_v47, 4  ;;  %v2705_v37 = vrot.slane %v2703_v31, 5  ;;  %v3279_v29 = vrot.slane %v2700_v47, 5 }
 0x2a1   :  { %v2614_v34 = vsel %vm936_vm8, %v2606_v18, %v2520_v54  ;;  %v2110_v9 = vadd.f32 %v1989_v16, %v1740_v5  ;;  %v2111_v12 = vadd.f32 %v2058_v27, %v1741_v48  ;;  %v2265_v50 = vrot.slane %v2243_v30, 1 }
 0x2a2   :  { %v2627_v62 = vpack.c.bf16 %v2614_v34, %v2614_v34  ;;  %v2706_v58 = vor.u32 %v2705_v37, %v2702_v55  ;;  %v3280_v51 = vrot.slane %v2703_v31, 6 }
 0x2a3   :  { %v2164_v53 = vadd.f32 %v6490_v56, %v2110_v9  ;;  %v2165_v43 = vadd.f32 %v6492_v40, %v2111_v12  ;;  %v2281_v7 = vmax.f32 %v2243_v30, %v2265_v50  ;;  %v7856_v50 = vld [vmem:[#allocation39_spill] sm:$0xff] }
 0x2a4   :  { %v6986_v26 = vrot.slane %v2706_v58, 4  ;;  %v2709_v19 = vshll.u32 %v2627_v62, 16  ;;  %v3283_v45 = vshrl.u32 %v2627_v62, 16  ;;  %v3066_v10 = vrot.slane %v2627_v62, 5 }
 0x2a5   :  { %v2212_v59 = vmax.f32 %v2164_v53, 0.0  ;;  %v2213_v42 = vmax.f32 %v2165_v43, 0.0  ;;  %v2361_v2 = vrot.slane %v2281_v7, 1  ;;  %v2377_v44 = vrot.slane %v2281_v7, 2  ;;  %v7857_v53 = vld [vmem:[#allocation40_spill] sm:$0xff] }
 0x2a6   :  { %v2711_v63 = vrot.slane %v2709_v19, 5  ;;  %v3281_v36 = vor.u32 %v3280_v51, %v3279_v29  ;;  %v3285_v25 = vrot.slane %v3283_v45, 5  ;;  %v3286_v38 = vrot.slane %v2709_v19, 6  ;;  %v7855_v29 = vld [vmem:[#allocation13_spill] sm:$0xff]  ;;  %v7859_v45 = vld [vmem:[#allocation15_spill] sm:$0xff] }
 0x2a7   :  { %v2244_v17 = vmax.f32 %v2212_v59, %v2213_v42  ;;  %v2538_v46 = vsel %vm2532_vm15, %v2281_v7, %v2361_v2  ;;  %v6997_v5 = vsel %vm5834_vm10, %v4595_v14, %v3066_v10  ;;  %v3496_v60 = vrot.slane %v2627_v62, 6  ;;  %v7858_v59 = vld [vmem:[#allocation14_spill] sm:$0xff] }
 0x2a8   :  { %v1991_v47 = vpop.f32.mrf.mxu0  ;;  %v2060_v31 = vpop.f32.mrf.mxu1  ;;  %v2712_v21 = vsel %vm5284_vm4, %v6986_v26, %v2711_v63  ;;  %v2547_v18 = vsel %vm1756_vm11, %v2538_v46, %v2377_v44  ;;  %v3282_v30 = vrot.slane %v3281_v36, 4  ;;  %v3287_v16 = vor.u32 %v3286_v38, %v3285_v25  ;;  %v7860_v44 = vld [vmem:[#allocation41_spill] sm:$0xff]  ;;  %v7861_v46 = vld [vmem:[#allocation42_spill] sm:$0xff] }
 0x2a9   :  { %v2297_v48 = vrot.slane %v2244_v17, 1  ;;  %v2112_v54 = vadd.f32 %v1991_v47, %v1742_v57  ;;  %v2113_v49 = vadd.f32 %v2060_v31, %v1743_v6  ;;  %v7005_v34 = vsel %vm6259_vm13, %v4701_v13, %v3496_v60  ;;  %v1631_v26 = vpop.f32.mrf.mxu2  ;;  %v2642_v60 = vld [vmem:[%s7585_s3 + $0x40] sm:$0xff] }
 0x2aa   :  { %v2393_v9 = vrot.slane %v2281_v7, 3  ;;  %v7009_v12 = vsel %vm5752_vm7, %v3282_v30, %v3287_v16  ;;  %v1744_v62 = vadd.f32 %v6931_v20, %v7855_v29  ;;  %v1745_v58 = vadd.f32 %v6935_v41, %v7856_v50  ;;  %v1700_v20 = vpop.f32.mrf.mxu3 }
 0x2ab   :  { %v2313_v27 = vmax.f32 %v2244_v17, %v2297_v48  ;;  %v2166_v55 = vadd.f32 %v6490_v56, %v2112_v54  ;;  %v2167_v37 = vadd.f32 %v6492_v40, %v2113_v49  ;;  %v1746_v43 = vadd.f32 %v6961_v52, %v7857_v53 }
 0x2ac   :  { %v2556_v19 = vsel %vm936_vm8, %v2547_v18, %v2393_v9  ;;  %v1747_v42 = vadd.f32 %v6964_v0, %v7858_v59  ;;  %v7021_v10 = vadd.f32 %v1629_v23, %v7859_v45  ;;  %v7025_v63 = vadd.f32 %v1698_v32, %v7860_v44 }
 0x2ad   :  { %v2417_v51 = vrot.slane %v2313_v27, 4  ;;  %v2433_v57 = vrot.slane %v2313_v27, 5  ;;  %v2214_v14 = vmax.f32 %v2166_v55, 0.0  ;;  %v2215_v7 = vmax.f32 %v2167_v37, 0.0 }
 0x2ae   :  { %v2449_v2 = vrot.slane %v2313_v27, 6  ;;  %v2465_v36 = vrot.slane %v2313_v27, 7  ;;  %v7029_v25 = vadd.f32 %v1631_v26, %v6438_v11  ;;  %v7033_v47 = vadd.f32 %v1700_v20, %v7861_v46 }
 0x2af   :  { %v2565_v41 = vsel %vm2559_vm14, %v2556_v19, %v2417_v51  ;;  %v2245_v61 = vmax.f32 %v2214_v14, %v2215_v7  ;;  %v2911_v48 = vunpack.c.l.b16 %v6970_v3  ;;  %v2944_v13 = vunpack.c.l.b16 %v2642_v60 }
 0x2b0   :  { %v2574_v52 = vsel %vm2568_vm2, %v2565_v41, %v2433_v57  ;;  %v1994_v6 = vpop.f32.mrf.mxu0  ;;  %v2063_v17 = vpop.f32.mrf.mxu1  ;;  %v7044_v30 = vunpack.c.l.b16 %v2712_v21  ;;  %v2945_v16 = vunpack.c.h.b16 %v2642_v60  ;;  %v3094_v27 = vunpack.c.l.b16 %v6997_v5 }
 0x2b1   :  { %v2582_v0 = vsel %vm525_vm0, %v2574_v52, %v2449_v2  ;;  %v2114_v23 = vadd.f32 %v1994_v6, %v1744_v62  ;;  %v2115_v38 = vadd.f32 %v2063_v17, %v1745_v58  ;;  %v2329_v32 = vrot.slane %v2245_v61, 1 }
 0x2b2   :  { %v2591_v31 = vsel %vm2585_vm3, %v2582_v0, %v2465_v36  ;;  %v2954_v58 = vpack.c.b16 %v2944_v13, %v2944_v13  ;;  %v2955_v26 = vpack.c.b16 %v2945_v16, %v2945_v16 }
 0x2b3   :  { %v7040_v54 = vpack.c.bf16 %v2591_v31, %v2591_v31  ;;  %v2168_v11 = vadd.f32 %v6490_v56, %v2114_v23  ;;  %v2169_v49 = vadd.f32 %v6492_v40, %v2115_v38  ;;  %v2345_v18 = vmax.f32 %v2245_v61, %v2329_v32 }
 0x2b4   :  { %v2977_v7 = vsel %vm2559_vm14, %v2954_v58, 0  ;;  %v2980_v61 = vsel %vm2559_vm14, %v2955_v26, 0 }
 0x2b5   :  { %v2216_v55 = vmax.f32 %v2168_v11, 0.0  ;;  %v2217_v37 = vmax.f32 %v2169_v49, 0.0  ;;  %v2714_v9 = vshrl.u32 %v7040_v54, 16  ;;  %v2717_v29 = vshll.u32 %v7040_v54, 16  ;;  %2985 = vmatpush.bf16.msrb.mxu2 %v2977_v7  ;;  %3014 = vmatpush.bf16.msrb.mxu3 %v2980_v61 }
 0x2b6   :  { %v2489_v3 = vrot.slane %v2345_v18, 1  ;;  %v2505_v62 = vrot.slane %v2345_v18, 2  ;;  %v2521_v50 = vrot.slane %v2345_v18, 3  ;;  %v2912_v32 = vunpack.c.l.b16 %v7040_v54 }
 0x2b7   :  { %v2246_v51 = vmax.f32 %v2216_v55, %v2217_v37  ;;  %v2716_v57 = vrot.slane %v2714_v9, 4  ;;  %v2719_v53 = vrot.slane %v2717_v29, 5  ;;  %v3289_v59 = vrot.slane %v2714_v9, 5 }
 0x2b8   :  { %v2599_v21 = vsel %vm2532_vm15, %v2345_v18, %v2489_v3  ;;  %v1996_v19 = vpop.f32.mrf.mxu0  ;;  %v2065_v14 = vpop.f32.mrf.mxu1  ;;  %v3290_v45 = vrot.slane %v2717_v29, 6  ;;  %v4596_v49 = vrot.slane %v7040_v54, 9  ;;  %v7059_v55 = vpack.c.b16 %v2912_v32, %v2911_v48 }
 0x2b9   :  { %v2607_v20 = vsel %vm1756_vm11, %v2599_v21, %v2505_v62  ;;  %v2266_v2 = vrot.slane %v2246_v51, 1  ;;  %v2116_v41 = vadd.f32 %v1996_v19, %v1746_v43  ;;  %v2117_v44 = vadd.f32 %v2065_v14, %v1747_v42 }
 0x2ba   :  { %v2615_v36 = vsel %vm936_vm8, %v2607_v20, %v2521_v50  ;;  %v2720_v52 = vor.u32 %v2719_v53, %v2716_v57  ;;  %v3291_v6 = vor.u32 %v3290_v45, %v3289_v59  ;;  %v3524_v43 = vunpack.c.l.b16 %v7005_v34 }
 0x2bb   :  { %v2629_v17 = vpack.c.bf16 %v2615_v36, %v2615_v36  ;;  %v2282_v0 = vmax.f32 %v2246_v51, %v2266_v2  ;;  %v2170_v23 = vadd.f32 %v6490_v56, %v2116_v41  ;;  %v2171_v38 = vadd.f32 %v6492_v40, %v2117_v44  ;;  %v4908_v36 = vld [vmem:[%s7585_s3 + $0x34] sm:$0xf] }
 0x2bc   :  { %v2721_v46 = vrot.slane %v2720_v52, 4  ;;  %v3292_v31 = vrot.slane %v3291_v6, 4  ;;  %v4702_v57 = vrot.slane %v7040_v54, 10  ;;  %v4579_v52 = vld [vmem:[%s7585_s3 + $0x38] sm:$0xf0] }
 0x2bd   :  { %v2362_v42 = vrot.slane %v2282_v0, 1  ;;  %v2378_v60 = vrot.slane %v2282_v0, 2  ;;  %v2218_v11 = vmax.f32 %v2170_v23, 0.0  ;;  %v2219_v13 = vmax.f32 %v2171_v38, 0.0 }
 0x2be   :  { %v2723_v18 = vshll.u32 %v2629_v17, 16  ;;  %v3293_v16 = vshrl.u32 %v2629_v17, 16  ;;  %v2394_v37 = vrot.slane %v2282_v0, 3  ;;  %v3070_v29 = vrot.slane %v2629_v17, 5 }
 0x2bf   :  { %v2539_v9 = vsel %vm2532_vm15, %v2282_v0, %v2362_v42  ;;  %v3500_v3 = vrot.slane %v2629_v17, 6  ;;  %v2247_v62 = vmax.f32 %v2218_v11, %v2219_v13  ;;  %v1634_v17 = vpop.f32.mrf.mxu2  ;;  %v3333_v11 = vunpack.c.l.b16 %v7009_v12 }
 0x2c0   :  { %v1999_v50 = vpop.f32.mrf.mxu0  ;;  %v2068_v58 = vpop.f32.mrf.mxu1  ;;  %v2725_v51 = vrot.slane %v2723_v18, 5  ;;  %v3295_v34 = vrot.slane %v3293_v16, 5  ;;  %v2548_v53 = vsel %vm1756_vm11, %v2539_v9, %v2378_v60  ;;  %v3296_v48 = vrot.slane %v2723_v18, 6 }
 0x2c1   :  { %v2118_v26 = vadd.f32 %v1999_v50, %v7021_v10  ;;  %v2119_v21 = vadd.f32 %v2068_v58, %v7025_v63  ;;  %v2298_v19 = vrot.slane %v2247_v62, 1  ;;  %v3071_v7 = vsel %vm5834_vm10, %v4596_v49, %v3070_v29  ;;  %v4577_v10 = vld [vmem:[%s7585_s3 + $0x30] sm:$0xf]  ;;  %v4909_v63 = vld [vmem:[%s7585_s3 + $0x34] sm:$0xf0] }
 0x2c2   :  { %v2726_v14 = vsel %vm5284_vm4, %v2721_v46, %v2725_v51  ;;  %v3501_v59 = vsel %vm6259_vm13, %v4702_v57, %v3500_v3  ;;  %v3297_v2 = vor.u32 %v3296_v48, %v3295_v34  ;;  %v4578_v44 = vor.u32 %v4909_v63, %v4577_v10  ;;  %v1703_v51 = vpop.f32.mrf.mxu3 }
 0x2c3   :  { %v2172_v45 = vadd.f32 %v6490_v56, %v2118_v26  ;;  %v2173_v54 = vadd.f32 %v6492_v40, %v2119_v21  ;;  %v2770_v20 = vunpack.c.l.b16 %v2726_v14  ;;  %v2314_v41 = vmax.f32 %v2247_v62, %v2298_v19  ;;  %v7862_v26 = vld [vmem:[#allocation43_spill] sm:$0xff] }
 0x2c4   :  { %v3095_v61 = vunpack.c.l.b16 %v3071_v7  ;;  %v3525_v6 = vunpack.c.l.b16 %v3501_v59  ;;  %v3298_v46 = vsel %vm5752_vm7, %v3292_v31, %v3297_v2  ;;  %v2557_v32 = vsel %vm936_vm8, %v2548_v53, %v2394_v37  ;;  %2986 = vmatpush.bf16.msrb.mxu2 %v4578_v44  ;;  %v4569_v53 = vld [vmem:[%s7585_s3 + $0x20] sm:$0xf]  ;;  %v4571_v7 = vld [vmem:[%s7585_s3 + $0x28] sm:$0xf0]  ;;  %v4561_v59 = vld [vmem:[%s7585_s3 + $0x10] sm:$0xf] }
 0x2c5   :  { %v2220_v0 = vmax.f32 %v2172_v45, 0.0  ;;  %v2221_v23 = vmax.f32 %v2173_v54, 0.0  ;;  %v2775_v38 = vpack.c.b16 %v2770_v20, %v7044_v30  ;;  %v2418_v42 = vrot.slane %v2314_v41, 4  ;;  %v4905_v45 = vld [vmem:[%s7585_s3 + $0x14] sm:$0xf0] }
 0x2c6   :  { %v2434_v60 = vrot.slane %v2314_v41, 5  ;;  %v3334_v13 = vunpack.c.l.b16 %v3298_v46  ;;  %v4582_v18 = vor.u32 %v4908_v36, %v4579_v52  ;;  %v7095_v30 = vpack.c.b16 %v3095_v61, %v3094_v27  ;;  %v7863_v54 = vld [vmem:[#allocation44_spill] sm:$0xff] }
 0x2c7   :  { %v2248_v49 = vmax.f32 %v2220_v0, %v2221_v23  ;;  %4545 = vmatmul.msk.bf16.gmra.mxu2 %vm2822_vm1, %v2775_v38  ;;  %4549 = vmatmul.msk.bf16.gmra.mxu3 %vm2822_vm1, %v2775_v38  ;;  %v2450_v16 = vrot.slane %v2314_v41, 6  ;;  %v2466_v31 = vrot.slane %v2314_v41, 7  ;;  %v2566_v37 = vsel %vm2559_vm14, %v2557_v32, %v2418_v42  ;;  %v4904_v41 = vld [vmem:[%s7585_s3 + $0x14] sm:$0xf]  ;;  %v4563_v61 = vld [vmem:[%s7585_s3 + $0x18] sm:$0xf0] }
 0x2c8   :  { %v2001_v9 = vpop.f32.mrf.mxu0  ;;  %v2070_v29 = vpop.f32.mrf.mxu1  ;;  %v7098_v3 = vpack.c.b16 %v3525_v6, %v3524_v43  ;;  %v2575_v12 = vsel %vm2568_vm2, %v2566_v37, %v2434_v60  ;;  %v3339_v50 = vpack.c.b16 %v3334_v13, %v3333_v11  ;;  %3015 = vmatpush.bf16.msrb.mxu3 %v4582_v18  ;;  %v1752_v21 = vadd.f32 %v1634_v17, %v7862_v26 }
 0x2c9   :  { %v2330_v62 = vrot.slane %v2248_v49, 1  ;;  %v2120_v58 = vadd.f32 %v2001_v9, %v7029_v25  ;;  %v2583_v5 = vsel %vm525_vm0, %v2575_v12, %v2450_v16  ;;  %v2121_v27 = vadd.f32 %v2070_v29, %v7033_v47  ;;  %v4907_v25 = vld [vmem:[%s7585_s3 + $0x24] sm:$0xf0]  ;;  %v4906_v47 = vld [vmem:[%s7585_s3 + $0x24] sm:$0xf]  ;;  %v1636_v17 = vpop.f32.mrf.mxu2 }
 0x2ca   :  { %v2592_v34 = vsel %vm2585_vm3, %v2583_v5, %v2466_v31  ;;  %4691 = vmatmul.msk.bf16.gmra.mxu0 %vm2822_vm1, %v3339_v50  ;;  %4695 = vmatmul.msk.bf16.gmra.mxu1 %vm2822_vm1, %v3339_v50  ;;  %v4570_v14 = vor.u32 %v4907_v25, %v4569_v53  ;;  %v1753_v20 = vadd.f32 %v1703_v51, %v7863_v54 }
 0x2cb   :  { %v2346_v57 = vmax.f32 %v2248_v49, %v2330_v62  ;;  %v2174_v43 = vadd.f32 %v6490_v56, %v2120_v58  ;;  %v7118_v48 = vpack.c.bf16 %v2592_v34, %v2592_v34  ;;  %v2175_v19 = vadd.f32 %v6492_v40, %v2121_v27  ;;  %v7864_v62 = vld [vmem:[#allocation17_spill] sm:$0xff]  ;;  %v1705_v27 = vpop.f32.mrf.mxu3 }
 0x2cc   :  { %2987 = vmatpush.bf16.msrb.mxu2 %v4570_v14  ;;  %v4574_v36 = vor.u32 %v4906_v47, %v4571_v7  ;;  %v4562_v52 = vor.u32 %v4905_v45, %v4561_v59  ;;  %v4566_v38 = vor.u32 %v4904_v41, %v4563_v61  ;;  %v1754_v50 = vadd.f32 %v1636_v17, %v7864_v62  ;;  %v7865_v45 = vld [vmem:[#allocation16_spill] sm:$0xff]  ;;  %v4903_v61 = vld [vmem:[%s7585_s3 + $0x4] sm:$0xf0] }
 0x2cd   :  { %v2490_v2 = vrot.slane %v2346_v57, 1  ;;  %v2506_v10 = vrot.slane %v2346_v57, 2  ;;  %v2222_v63 = vmax.f32 %v2174_v43, 0.0  ;;  %v2223_v44 = vmax.f32 %v2175_v19, 0.0 }
 0x2ce   :  { %v2728_v6 = vshrl.u32 %v7118_v48, 16  ;;  %v2522_v0 = vrot.slane %v2346_v57, 3  ;;  %v2731_v46 = vshll.u32 %v7118_v48, 16  ;;  %3016 = vmatpush.bf16.msrb.mxu3 %v4574_v36  ;;  %v4597_v53 = vrot.slane %v7118_v48, 9 }
 0x2cf   :  { %v2600_v23 = vsel %vm2532_vm15, %v2346_v57, %v2490_v2  ;;  %v2249_v42 = vmax.f32 %v2222_v63, %v2223_v44  ;;  %v1755_v54 = vadd.f32 %v1705_v27, %v7865_v45 }
 0x2d0   :  { %v2608_v32 = vsel %vm1756_vm11, %v2600_v23, %v2506_v10  ;;  %v2004_v60 = vpop.f32.mrf.mxu0  ;;  %v2073_v11 = vpop.f32.mrf.mxu1  ;;  %v2730_v49 = vrot.slane %v2728_v6, 4  ;;  %v3299_v13 = vrot.slane %v2728_v6, 5  ;;  %v2733_v37 = vrot.slane %v2731_v46, 5  ;;  %2988 = vmatpush.bf16.msrb.mxu2 %v4562_v52  ;;  %v4553_v52 = vld [vmem:[%s7585_s3] sm:$0xf] }
 0x2d1   :  { %v2616_v18 = vsel %vm936_vm8, %v2608_v32, %v2522_v0  ;;  %v2122_v16 = vadd.f32 %v2004_v60, %v1752_v21  ;;  %v2123_v31 = vadd.f32 %v2073_v11, %v1753_v20  ;;  %v2267_v29 = vrot.slane %v2249_v42, 1  ;;  %v4902_v6 = vld [vmem:[%s7585_s3 + $0x4] sm:$0xf] }
 0x2d2   :  { %v2631_v9 = vpack.c.bf16 %v2616_v18, %v2616_v18  ;;  %v3300_v12 = vrot.slane %v2731_v46, 6  ;;  %v2734_v5 = vor.u32 %v2733_v37, %v2730_v49  ;;  %3017 = vmatpush.bf16.msrb.mxu3 %v4566_v38  ;;  %v4555_v46 = vld [vmem:[%s7585_s3 + $0x8] sm:$0xf0]  ;;  %v4554_v11 = vor.u32 %v4903_v61, %v4553_v52 }
 0x2d3   :  { %v2176_v58 = vadd.f32 %v6490_v56, %v2122_v16  ;;  %v2177_v51 = vadd.f32 %v6492_v40, %v2123_v31  ;;  %v2283_v34 = vmax.f32 %v2249_v42, %v2267_v29  ;;  %v4558_v16 = vor.u32 %v4902_v6, %v4555_v46 }
 0x2d4   :  { %v2737_v57 = vshll.u32 %v2631_v9, 16  ;;  %v3303_v43 = vshrl.u32 %v2631_v9, 16  ;;  %v3301_v26 = vor.u32 %v3300_v12, %v3299_v13  ;;  %v3074_v21 = vrot.slane %v2631_v9, 5  ;;  %2989 = vmatpush.bf16.msrb.mxu2 %v4554_v11 }
 0x2d5   :  { %v2224_v25 = vmax.f32 %v2176_v58, 0.0  ;;  %v2225_v47 = vmax.f32 %v2177_v51, 0.0  ;;  %v2363_v19 = vrot.slane %v2283_v34, 1  ;;  %v2379_v14 = vrot.slane %v2283_v34, 2 }
 0x2d6   :  { %v7146_v7 = vrot.slane %v2734_v5, 4  ;;  %v7148_v59 = vrot.slane %v2737_v57, 5  ;;  %v3305_v2 = vrot.slane %v3303_v43, 5  ;;  %v3306_v10 = vrot.slane %v2737_v57, 6  ;;  %3018 = vmatpush.bf16.msrb.mxu3 %v4558_v16 }
 0x2d7   :  { %v2250_v20 = vmax.f32 %v2224_v25, %v2225_v47  ;;  %v2540_v63 = vsel %vm2532_vm15, %v2283_v34, %v2363_v19  ;;  %v7167_v17 = vsel %vm5834_vm10, %v4597_v53, %v3074_v21  ;;  %v3302_v42 = vrot.slane %v3301_v26, 4 }
 0x2d8   :  { %v2006_v41 = vpop.f32.mrf.mxu0  ;;  %v2075_v44 = vpop.f32.mrf.mxu1  ;;  %v2740_v36 = vsel %vm5284_vm4, %v7146_v7, %v7148_v59  ;;  %v2549_v32 = vsel %vm1756_vm11, %v2540_v63, %v2379_v14  ;;  %v3307_v60 = vor.u32 %v3306_v10, %v3305_v2  ;;  %v2395_v31 = vrot.slane %v2283_v34, 3  ;;  %v4923_v7 = vld [vmem:[%s7585_s3 + $0xb4] sm:$0xf0]  ;;  %v4922_v59 = vld [vmem:[%s7585_s3 + $0xb4] sm:$0xf] }
 0x2d9   :  { %v2299_v0 = vrot.slane %v2250_v20, 1  ;;  %v2124_v23 = vadd.f32 %v2006_v41, %v1754_v50  ;;  %v2125_v38 = vadd.f32 %v2075_v44, %v1755_v54  ;;  %v4703_v29 = vrot.slane %v7118_v48, 10  ;;  %v4607_v54 = vld [vmem:[%s7585_s3 + $0xd0] sm:$0xff] }
 0x2da   :  { %v7177_v37 = vsel %vm5752_vm7, %v3302_v42, %v3307_v60  ;;  %v3504_v12 = vrot.slane %v2631_v9, 6  ;;  %v2558_v58 = vsel %vm936_vm8, %v2549_v32, %v2395_v31  ;;  %v3127_v6 = vunpack.c.l.b16 %v4607_v54  ;;  %v4924_v32 = vld [vmem:[%s7585_s3 + $0xc4] sm:$0xf]  ;;  %v4636_v42 = vld [vmem:[%s7585_s3 + $0xc8] sm:$0xf0] }
 0x2db   :  { %v2315_v49 = vmax.f32 %v2250_v20, %v2299_v0  ;;  %v2178_v13 = vadd.f32 %v6490_v56, %v2124_v23  ;;  %v2179_v18 = vadd.f32 %v6492_v40, %v2125_v38  ;;  %v2913_v20 = vunpack.c.l.b16 %v7118_v48  ;;  %v4634_v23 = vld [vmem:[%s7585_s3 + $0xc0] sm:$0xf]  ;;  %v4925_v38 = vld [vmem:[%s7585_s3 + $0xc4] sm:$0xf0] }
 0x2dc   :  { %v7183_v56 = vsel %vm6259_vm13, %v4703_v29, %v3504_v12  ;;  %v3128_v0 = vunpack.c.h.b16 %v4607_v54  ;;  %v3137_v11 = vpack.c.b16 %v3127_v6, %v3127_v6  ;;  %v4635_v16 = vor.u32 %v4925_v38, %v4634_v23  ;;  %v4919_v38 = vld [vmem:[%s7585_s3 + $0x94] sm:$0xf0] }
 0x2dd   :  { %v2419_v62 = vrot.slane %v2315_v49, 4  ;;  %v2435_v50 = vrot.slane %v2315_v49, 5  ;;  %v2226_v51 = vmax.f32 %v2178_v13, 0.0  ;;  %v2227_v5 = vmax.f32 %v2179_v18, 0.0 }
 0x2de   :  { %v2451_v40 = vrot.slane %v2315_v49, 6  ;;  %v2467_v34 = vrot.slane %v2315_v49, 7  ;;  %v3138_v49 = vpack.c.b16 %v3128_v0, %v3128_v0  ;;  %v3160_v12 = vsel %vm2559_vm14, %v3137_v11, 0  ;;  %v4620_v0 = vld [vmem:[%s7585_s3 + $0xa8] sm:$0xf0] }
 0x2df   :  { %v2567_v27 = vsel %vm2559_vm14, %v2558_v58, %v2419_v62  ;;  %v2251_v43 = vmax.f32 %v2226_v51, %v2227_v5  ;;  %3168 = vmatpush.bf16.msra.mxu2 %v3160_v12  ;;  %v2771_v22 = vunpack.c.l.b16 %v2740_v36  ;;  %v4627_v36 = vor.u32 %v4923_v7, %v4626_v8  ;;  %v4940_v12 = vld [vmem:[%s7585_s3 + $0x154] sm:$0xf] }
 0x2e0   :  { %v2576_v57 = vsel %vm2568_vm2, %v2567_v27, %v2435_v50  ;;  %v3163_v62 = vsel %vm2559_vm14, %v3138_v49, 0  ;;  %v4639_v50 = vor.u32 %v4924_v32, %v4636_v42  ;;  %v4612_v32 = vld [vmem:[%s7585_s3 + $0x98] sm:$0xf0] }
 0x2e1   :  { %v2584_v9 = vsel %vm525_vm0, %v2576_v57, %v2451_v40  ;;  %v2331_v25 = vrot.slane %v2251_v43, 1  ;;  %3197 = vmatpush.bf16.msra.mxu3 %v3163_v62  ;;  %vm3835_vm0 = vcmask 523264  }
 0x2e2   :  { %v2593_v53 = vsel %vm2585_vm3, %v2584_v9, %v2467_v34 }
 0x2e3   :  { %v2632_v47 = vpack.c.bf16 %v2593_v53, %v2593_v53  ;;  %v2347_v26 = vmax.f32 %v2251_v43, %v2331_v25  ;;  %v3096_v25 = vunpack.c.l.b16 %v7167_v17  ;;  %3169 = vmatpush.bf16.msra.mxu2 %v4635_v16 }
 0x2e5   :  { %v2742_v21 = vshrl.u32 %v2632_v47, 16  ;;  %v2745_v19 = vshll.u32 %v2632_v47, 16  ;;  %v2491_v14 = vrot.slane %v2347_v26, 1  ;;  %v2507_v45 = vrot.slane %v2347_v26, 2  ;;  %3198 = vmatpush.bf16.msra.mxu3 %v4639_v50  ;;  %v4742_v50 = vld [vmem:[%s7585_s3 + $0x158] sm:$0xf0] }
 0x2e6   :  { %v2914_v2 = vunpack.c.l.b16 %v2632_v47  ;;  %v2523_v10 = vrot.slane %v2347_v26, 3  ;;  %v4598_v31 = vrot.slane %v2632_v47, 9  ;;  %v4704_v34 = vrot.slane %v2632_v47, 10 }
 0x2e7   :  { %v2744_v63 = vrot.slane %v2742_v21, 4  ;;  %v2747_v41 = vrot.slane %v2745_v19, 5  ;;  %v3309_v44 = vrot.slane %v2742_v21, 5  ;;  %v2601_v52 = vsel %vm2532_vm15, %v2347_v26, %v2491_v14  ;;  %3170 = vmatpush.bf16.msra.mxu2 %v4627_v36 }
 0x2e8   :  { %v3310_v61 = vrot.slane %v2745_v19, 6  ;;  %v2609_v48 = vsel %vm1756_vm11, %v2601_v52, %v2507_v45  ;;  %v7208_v13 = vpack.c.b16 %v2914_v2, %v2913_v20  ;;  %v3526_v19 = vunpack.c.l.b16 %v7183_v56  ;;  %v4921_v52 = vld [vmem:[%s7585_s3 + $0xa4] sm:$0xf0] }
 0x2e9   :  { %v2748_v46 = vor.u32 %v2747_v41, %v2744_v63  ;;  %v2617_v60 = vsel %vm936_vm8, %v2609_v48, %v2523_v10  ;;  %v3335_v10 = vunpack.c.l.b16 %v7177_v37  ;;  %v4628_v37 = vld [vmem:[%s7585_s3 + $0xb8] sm:$0xf0]  ;;  %v4918_v48 = vld [vmem:[%s7585_s3 + $0x94] sm:$0xf]  ;;  %vm3949_vm8 = vcmask 1045509  }
 0x2ea   :  { %v2633_v18 = vpack.c.bf16 %v2617_v60, %v2617_v60  ;;  %v3311_v29 = vor.u32 %v3310_v61, %v3309_v44  ;;  %v4631_v41 = vor.u32 %v4922_v59, %v4628_v37  ;;  %v4618_v44 = vld [vmem:[%s7585_s3 + $0xa0] sm:$0xf]  ;;  %v4920_v61 = vld [vmem:[%s7585_s3 + $0xa4] sm:$0xf]  ;;  %v4615_v42 = vor.u32 %v4918_v48, %v4612_v32 }
 0x2eb   :  { %v2749_v27 = vrot.slane %v2748_v46, 4  ;;  %v4619_v6 = vor.u32 %v4921_v52, %v4618_v44  ;;  %v4623_v23 = vor.u32 %v4920_v61, %v4620_v0 }
 0x2ec   :  { %v2751_v58 = vshll.u32 %v2633_v18, 16  ;;  %v3313_v51 = vshrl.u32 %v2633_v18, 16  ;;  %v3078_v5 = vrot.slane %v2633_v18, 5  ;;  %v3508_v40 = vrot.slane %v2633_v18, 6  ;;  %3199 = vmatpush.bf16.msra.mxu3 %v4631_v41 }
 0x2ed   :  { %v3312_v45 = vrot.slane %v3311_v29, 4  ;;  %3171 = vmatpush.bf16.msra.mxu2 %v4619_v6  ;;  %v4740_v29 = vld [vmem:[%s7585_s3 + $0x150] sm:$0xf] }
 0x2ee   :  { %v2753_v57 = vrot.slane %v2751_v58, 5  ;;  %v3315_v43 = vrot.slane %v3313_v51, 5  ;;  %v3316_v9 = vrot.slane %v2751_v58, 6  ;;  %v3079_v53 = vsel %vm5834_vm10, %v4598_v31, %v3078_v5  ;;  %v4732_v51 = vld [vmem:[%s7585_s3 + $0x140] sm:$0xf] }
 0x2ef   :  { %v3097_v26 = vunpack.c.l.b16 %v3079_v53  ;;  %v3509_v21 = vsel %vm6259_vm13, %v4704_v34, %v3508_v40  ;;  %v4745_v58 = vor.u32 %v4940_v12, %v4742_v50  ;;  %v4939_v5 = vld [vmem:[%s7585_s3 + $0x144] sm:$0xf0]  ;;  %v4938_v40 = vld [vmem:[%s7585_s3 + $0x144] sm:$0xf]  ;;  %v4734_v34 = vld [vmem:[%s7585_s3 + $0x148] sm:$0xf0] }
 0x2f0   :  { %v2754_v14 = vsel %vm5284_vm4, %v2749_v27, %v2753_v57  ;;  %v3317_v54 = vor.u32 %v3316_v9, %v3315_v43  ;;  %v3527_v47 = vunpack.c.l.b16 %v3509_v21  ;;  %3200 = vmatpush.bf16.msra.mxu3 %v4623_v23  ;;  %v4733_v27 = vor.u32 %v4939_v5, %v4732_v51  ;;  %v7319_v43 = vpop.f32.mrf.mxu3  ;;  %v4724_v9 = vld [vmem:[%s7585_s3 + $0x130] sm:$0xf]  ;;  %v4937_v53 = vld [vmem:[%s7585_s3 + $0x134] sm:$0xf0]  ;;  %v4726_v21 = vld [vmem:[%s7585_s3 + $0x138] sm:$0xf0] }
 0x2f1   :  { %v2772_v17 = vunpack.c.l.b16 %v2754_v14  ;;  %v7225_v20 = vpack.c.b16 %v3097_v26, %v3096_v25  ;;  %v4737_v57 = vor.u32 %v4938_v40, %v4734_v34  ;;  %v4936_v25 = vld [vmem:[%s7585_s3 + $0x134] sm:$0xf]  ;;  %v4725_v26 = vor.u32 %v4937_v53, %v4724_v9 }
 0x2f2   :  { %v3318_v24 = vsel %vm5752_vm7, %v3312_v45, %v3317_v54  ;;  %v7229_v56 = vpack.c.b16 %v3527_v47, %v3526_v19  ;;  %v4729_v19 = vor.u32 %v4936_v25, %v4726_v21  ;;  %v4716_v47 = vld [vmem:[%s7585_s3 + $0x120] sm:$0xf]  ;;  %v3413_v25 = vpop.f32.mrf.mxu0  ;;  %vm3937_vm4 = vcmask 1041409  }
 0x2f3   :  { %v2776_v2 = vpack.c.b16 %v2772_v17, %v2771_v22  ;;  %v3336_v63 = vunpack.c.l.b16 %v3318_v24  ;;  %v4935_v22 = vld [vmem:[%s7585_s3 + $0x124] sm:$0xf0]  ;;  %v4934_v17 = vld [vmem:[%s7585_s3 + $0x124] sm:$0xf]  ;;  %vm3946_vm7 = vcmask 1044484   ;;  %vm3955_vm10 = vcmask 1047559  }
 0x2f4   :  { %3201 = vmatpush.bf16.msra.mxu3 %v4615_v42  ;;  %v4717_v24 = vor.u32 %v4935_v22, %v4716_v47  ;;  %v3669_v47 = vld [vmem:[%s7586_s4] sm:$0x3] }
 0x2f5   :  { %4546 = vmatmul.msk.bf16.gmra.mxu2 %vm2822_vm1, %v2776_v2  ;;  %4550 = vmatmul.msk.bf16.gmra.mxu3 %vm2822_vm1, %v2776_v2  ;;  %v3340_v28 = vpack.c.b16 %v3336_v63, %v3335_v10  ;;  %v4718_v2 = vld [vmem:[%s7585_s3 + $0x128] sm:$0xf0] }
 0x2f6   :  { %v4721_v10 = vor.u32 %v4934_v17, %v4718_v2  ;;  %v7438_v2 = vperm.slane %v3669_v47, 0 }
 0x2f7   :  { %4692 = vmatmul.msk.bf16.gmra.mxu0 %vm2822_vm1, %v3340_v28  ;;  %4696 = vmatmul.msk.bf16.gmra.mxu1 %vm2822_vm1, %v3340_v28 }
 0x2f8   :  { %v7339_v14 = vpop.f32.mrf.mxu3 }
 0x2fa   :  { %v3415_v22 = vpop.f32.mrf.mxu0 }
 0x305   :  { %4583 = vmatmul.msk.bf16.vlgmr.msrb.gmra.mxu2 %vm2822_vm1, %v6772_v15  ;;  %4587 = vmatmul.msk.bf16.vlgmr.msrb.gmra.mxu3 %vm2822_vm1, %v6772_v15  ;;  %v4610_v15 = vld [vmem:[%s7585_s3 + $0x90] sm:$0xf] }
 0x306   :  { %v4611_v46 = vor.u32 %v4919_v38, %v4610_v15 }
 0x308   :  { %3172 = vmatpush.bf16.msra.mxu2 %v4611_v46 }
 0x315   :  { %4584 = vmatmul.msk.bf16.gmra.mxu2 %vm2822_vm1, %v6911_v1  ;;  %4588 = vmatmul.msk.bf16.gmra.mxu3 %vm2822_vm1, %v6911_v1  ;;  %v4713_v1 = vld [vmem:[%s7585_s3 + $0x160] sm:$0xff] }
 0x316   :  { %v3557_v60 = vunpack.c.l.b16 %v4713_v1  ;;  %v3558_v11 = vunpack.c.h.b16 %v4713_v1 }
 0x318   :  { %v3567_v49 = vpack.c.b16 %v3557_v60, %v3557_v60  ;;  %v3568_v18 = vpack.c.b16 %v3558_v11, %v3558_v11 }
 0x31a   :  { %v3590_v16 = vsel %vm2559_vm14, %v3567_v49, 0  ;;  %v3593_v31 = vsel %vm2559_vm14, %v3568_v18, 0  ;;  %v7343_v54 = vpop.f32.mrf.mxu3 }
 0x31b   :  { %3598 = vmatpush.bf16.msrb.mxu2 %v3590_v16  ;;  %3627 = vmatpush.bf16.msrb.mxu3 %v3593_v31 }
 0x31f   :  { %3628 = vmatpush.bf16.msrb.mxu3 %v4745_v58 }
 0x322   :  { %v7363_v63 = vpop.f32.mrf.mxu3 }
 0x323   :  { %3629 = vmatpush.bf16.msrb.mxu3 %v4737_v57 }
 0x325   :  { %4585 = vmatmul.msk.bf16.gmra.mxu2 %vm2822_vm1, %v7059_v55  ;;  %4589 = vmatmul.msk.bf16.gmra.mxu3 %vm2822_vm1, %v7059_v55  ;;  %v4941_v55 = vld [vmem:[%s7585_s3 + $0x154] sm:$0xf0] }
 0x326   :  { %v4741_v62 = vor.u32 %v4941_v55, %v4740_v29 }
 0x327   :  { %3630 = vmatpush.bf16.msrb.mxu3 %v4729_v19 }
 0x328   :  { %3599 = vmatpush.bf16.msrb.mxu2 %v4741_v62 }
 0x32b   :  { %3631 = vmatpush.bf16.msrb.mxu3 %v4721_v10 }
 0x32c   :  { %3600 = vmatpush.bf16.msrb.mxu2 %v4733_v27 }
 0x330   :  { %3601 = vmatpush.bf16.msrb.mxu2 %v4725_v26  ;;  %v3442_v26 = vpop.f32.mrf.mxu1 }
 0x334   :  { %3602 = vmatpush.bf16.msrb.mxu2 %v4717_v24 }
 0x335   :  { %4586 = vmatmul.msk.bf16.gmra.mxu2 %vm2822_vm1, %v7208_v13  ;;  %4590 = vmatmul.msk.bf16.gmra.mxu3 %vm2822_vm1, %v7208_v13  ;;  %v7317_v13 = vpop.f32.mrf.mxu2 }
 0x338   :  { %v3444_v17 = vpop.f32.mrf.mxu1 }
 0x345   :  { %4640 = vmatmul.msk.bf16.vlgmr.msra.gmra.mxu2 %vm2822_vm1, %v6815_v35  ;;  %4644 = vmatmul.msk.bf16.vlgmr.msra.gmra.mxu3 %vm2822_vm1, %v6815_v35  ;;  %v7337_v35 = vpop.f32.mrf.mxu2 }
 0x34a   :  { %v7371_v8 = vpop.f32.mrf.mxu3 }
 0x34d   :  { %v7341_v45 = vpop.f32.mrf.mxu2 }
 0x352   :  { %v2891_v59 = vpop.f32.mrf.mxu3 }
 0x355   :  { %4641 = vmatmul.msk.bf16.gmra.mxu2 %vm2822_vm1, %v6952_v33  ;;  %4645 = vmatmul.msk.bf16.gmra.mxu3 %vm2822_vm1, %v6952_v33  ;;  %v7361_v33 = vpop.f32.mrf.mxu2 }
 0x35d   :  { %v7369_v28 = vpop.f32.mrf.mxu2 }
 0x365   :  { %4642 = vmatmul.msk.bf16.gmra.mxu2 %vm2822_vm1, %v7095_v30  ;;  %4646 = vmatmul.msk.bf16.gmra.mxu3 %vm2822_vm1, %v7095_v30  ;;  %v2862_v7 = vpop.f32.mrf.mxu2 }
 0x375   :  { %4643 = vmatmul.msk.bf16.gmra.mxu2 %vm2822_vm1, %v7225_v20  ;;  %4647 = vmatmul.msk.bf16.gmra.mxu3 %vm2822_vm1, %v7225_v20 }
 0x378   :  { %v2865_v36 = vpop.f32.mrf.mxu2  ;;  %v2894_v37 = vpop.f32.mrf.mxu3 }
 0x380   :  { %v2867_v41 = vpop.f32.mrf.mxu2  ;;  %v2896_v44 = vpop.f32.mrf.mxu3 }
 0x385   :  { %4746 = vmatmul.msk.bf16.vlgmr.msrb.gmra.mxu2 %vm2822_vm1, %v6817_v39  ;;  %4750 = vmatmul.msk.bf16.vlgmr.msrb.gmra.mxu3 %vm2822_vm1, %v6817_v39 }
 0x388   :  { %v2991_v30 = vpop.f32.mrf.mxu2  ;;  %v3020_v52 = vpop.f32.mrf.mxu3 }
 0x389   :  { %v2992_v31 = vadd.f32 %v2991_v30, %v7317_v13  ;;  %v3021_v29 = vadd.f32 %v3020_v52, %v7319_v43 }
 0x390   :  { %v2993_v61 = vpop.f32.mrf.mxu2  ;;  %v3022_v6 = vpop.f32.mrf.mxu3 }
 0x395   :  { %4747 = vmatmul.msk.bf16.gmra.mxu2 %vm2822_vm1, %v6954_v4  ;;  %4751 = vmatmul.msk.bf16.gmra.mxu3 %vm2822_vm1, %v6954_v4 }
 0x398   :  { %v7385_v20 = vpop.f32.mrf.mxu2  ;;  %v7387_v0 = vpop.f32.mrf.mxu3 }
 0x3a0   :  { %v7389_v23 = vpop.f32.mrf.mxu2  ;;  %v7391_v15 = vpop.f32.mrf.mxu3 }
 0x3a5   :  { %4748 = vmatmul.msk.bf16.gmra.mxu2 %vm2822_vm1, %v7098_v3  ;;  %4752 = vmatmul.msk.bf16.gmra.mxu3 %vm2822_vm1, %v7098_v3 }
 0x3a8   :  { %v7397_v39 = vpop.f32.mrf.mxu2  ;;  %v7399_v38 = vpop.f32.mrf.mxu3 }
 0x3b0   :  { %v3003_v48 = vpop.f32.mrf.mxu2  ;;  %v3032_v4 = vpop.f32.mrf.mxu3 }
 0x3b1   :  { %v7401_v46 = vadd.f32 %v3003_v48, %v2862_v7  ;;  %v7403_v32 = vadd.f32 %v3032_v4, %v2891_v59  ;;  %v7440_v7 = vperm.slane %v3669_v47, 1 }
 0x3b5   :  { %4749 = vmatmul.msk.bf16.gmra.mxu2 %vm2822_vm1, %v7229_v56  ;;  %4753 = vmatmul.msk.bf16.gmra.mxu3 %vm2822_vm1, %v7229_v56 }
 0x3b8   :  { %v3006_v42 = vpop.f32.mrf.mxu2  ;;  %v3035_v1 = vpop.f32.mrf.mxu3 }
 0x3b9   :  { %v7409_v60 = vadd.f32 %v3006_v42, %v2865_v36  ;;  %v7411_v3 = vadd.f32 %v3035_v1, %v2894_v37  ;;  %v2994_v37 = vadd.f32 %v2993_v61, %v7337_v35  ;;  %v2997_v35 = vadd.f32 %v7385_v20, %v7341_v45 }
 0x3ba   :  { %v2999_v45 = vadd.f32 %v7389_v23, %v7361_v33  ;;  %v3002_v33 = vadd.f32 %v7397_v39, %v7369_v28 }
 0x3c0   :  { %v3008_v11 = vpop.f32.mrf.mxu2  ;;  %v3037_v49 = vpop.f32.mrf.mxu3 }
 0x3c1   :  { %v7413_v18 = vadd.f32 %v3008_v11, %v2867_v41  ;;  %v7415_v16 = vadd.f32 %v3037_v49, %v2896_v44  ;;  %v3023_v41 = vadd.f32 %v3022_v6, %v7339_v14  ;;  %v3418_v49 = vpop.f32.mrf.mxu0  ;;  %v3026_v14 = vadd.f32 %v7387_v0, %v7343_v54 }
 0x3c2   :  { %v3028_v54 = vadd.f32 %v7391_v15, %v7363_v63  ;;  %v3031_v63 = vadd.f32 %v7399_v38, %v7371_v8 }
 0x3c8   :  { %v3174_v55 = vpop.f32.mrf.mxu2  ;;  %v3203_v12 = vpop.f32.mrf.mxu3 }
 0x3c9   :  { %v3223_v62 = vadd.f32 %v3174_v55, %v2992_v31  ;;  %v3224_v56 = vadd.f32 %v3203_v12, %v3021_v29  ;;  %v3447_v31 = vpop.f32.mrf.mxu1 }
 0x3cb   :  { %v3462_v24 = vadd.f32 %v3413_v25, %v3223_v62  ;;  %v3463_v10 = vadd.f32 %v3442_v26, %v3224_v56 }
 0x3d0   :  { %v3176_v50 = vpop.f32.mrf.mxu2  ;;  %v3205_v58 = vpop.f32.mrf.mxu3 }
 0x3d1   :  { %v3225_v52 = vadd.f32 %v3176_v50, %v2994_v37  ;;  %v3226_v48 = vadd.f32 %v3205_v58, %v3023_v41 }
 0x3d3   :  { %v3464_v55 = vadd.f32 %v3415_v22, %v3225_v52  ;;  %v3465_v12 = vadd.f32 %v3444_v17, %v3226_v48 }
 0x3d8   :  { %v3179_v51 = vpop.f32.mrf.mxu2  ;;  %v3208_v5 = vpop.f32.mrf.mxu3 }
 0x3d9   :  { %v3227_v50 = vadd.f32 %v3179_v51, %v2997_v35  ;;  %v3228_v58 = vadd.f32 %v3208_v5, %v3026_v14  ;;  %v3420_v51 = vpop.f32.mrf.mxu0  ;;  %v3449_v5 = vpop.f32.mrf.mxu1 }
 0x3db   :  { %v3466_v17 = vadd.f32 %v3418_v49, %v3227_v50 }
 0x3e0   :  { %v3181_v40 = vpop.f32.mrf.mxu2  ;;  %v3210_v27 = vpop.f32.mrf.mxu3 }
 0x3e1   :  { %v3229_v37 = vadd.f32 %v3181_v40, %v2999_v45  ;;  %v3230_v41 = vadd.f32 %v3210_v27, %v3028_v54 }
 0x3e8   :  { %v7419_v34 = vpop.f32.mrf.mxu2  ;;  %v7421_v57 = vpop.f32.mrf.mxu3 }
 0x3f0   :  { %v7423_v9 = vpop.f32.mrf.mxu2  ;;  %v7425_v53 = vpop.f32.mrf.mxu3 }
 0x3f8   :  { %v7427_v13 = vpop.f32.mrf.mxu2  ;;  %v7429_v43 = vpop.f32.mrf.mxu3 }
 0x400   :  { %v7431_v21 = vpop.f32.mrf.mxu2  ;;  %v7433_v19 = vpop.f32.mrf.mxu3 }
 0x408   :  { %v3604_v59 = vpop.f32.mrf.mxu2  ;;  %v3633_v36 = vpop.f32.mrf.mxu3 }
 0x409   :  { %v3653_v44 = vadd.f32 %v3604_v59, %v3462_v24  ;;  %v3654_v30 = vadd.f32 %v3633_v36, %v3463_v10  ;;  %v3467_v10 = vadd.f32 %v3447_v31, %v3228_v58 }
 0x40b   :  { %v3675_v4 = vadd.f32 %v7438_v2, %v3653_v44  ;;  %v3676_v42 = vadd.f32 %v7440_v7, %v3654_v30 }
 0x40d   :  { %v3691_v1 = vmax.f32 %v3675_v4, 0.0  ;;  %v3692_v11 = vmax.f32 %v3676_v42, 0.0 }
 0x40f   :  { %v3707_v29 = vmax.f32 %v3691_v1, %v3692_v11  ;;  %v3468_v1 = vadd.f32 %v3420_v51, %v3229_v37  ;;  %v3469_v11 = vadd.f32 %v3449_v5, %v3230_v41 }
 0x410   :  { %v3606_v62 = vpop.f32.mrf.mxu2  ;;  %v3635_v56 = vpop.f32.mrf.mxu3 }
 0x411   :  { %v3655_v61 = vadd.f32 %v3606_v62, %v3464_v55  ;;  %v3656_v6 = vadd.f32 %v3635_v56, %v3465_v12  ;;  %v3423_v55 = vpop.f32.mrf.mxu0  ;;  %v3452_v12 = vpop.f32.mrf.mxu1  ;;  %v3231_v62 = vadd.f32 %v7419_v34, %v3002_v33  ;;  %v3232_v56 = vadd.f32 %v7421_v57, %v3031_v63 }
 0x412   :  { %v3723_v8 = vrot.slane %v3707_v29, 1  ;;  %v3236_v33 = vadd.f32 %v7429_v43, %v7411_v3 }
 0x413   :  { %v3677_v25 = vadd.f32 %v7438_v2, %v3655_v61  ;;  %v3678_v26 = vadd.f32 %v7440_v7, %v3656_v6  ;;  %v3470_v58 = vadd.f32 %v3423_v55, %v3231_v62 }
 0x414   :  { %v7472_v34 = vmax.f32 %v3707_v29, %v3723_v8 }
 0x415   :  { %v3693_v47 = vmax.f32 %v3677_v25, 0.0  ;;  %v3694_v24 = vmax.f32 %v3678_v26, 0.0  ;;  %v3471_v25 = vadd.f32 %v3452_v12, %v3232_v56 }
 0x416   :  { %v3755_v51 = vrot.slane %v7472_v34, 2 }
 0x417   :  { %v3708_v22 = vmax.f32 %v3693_v47, %v3694_v24 }
 0x418   :  { %v3609_v59 = vpop.f32.mrf.mxu2  ;;  %v3638_v36 = vpop.f32.mrf.mxu3 }
 0x419   :  { %v3657_v20 = vadd.f32 %v3609_v59, %v3466_v17  ;;  %v3658_v0 = vadd.f32 %v3638_v36, %v3467_v10  ;;  %v3724_v52 = vrot.slane %v3708_v22, 1  ;;  %v3233_v10 = vadd.f32 %v7423_v9, %v7401_v46  ;;  %v3425_v54 = vpop.f32.mrf.mxu0 }
 0x41a   :  { %v3234_v59 = vadd.f32 %v7425_v53, %v7403_v32 }
 0x41b   :  { %v3679_v44 = vadd.f32 %v7438_v2, %v3657_v20  ;;  %v3680_v30 = vadd.f32 %v7440_v7, %v3658_v0  ;;  %v7462_v40 = vmax.f32 %v3708_v22, %v3724_v52  ;;  %v3454_v20 = vpop.f32.mrf.mxu1  ;;  %v3803_v0 = vrot.slane %v7472_v34, 6 }
 0x41c   :  { %v3472_v9 = vadd.f32 %v3425_v54, %v3233_v10  ;;  %v3473_v53 = vadd.f32 %v3454_v20, %v3234_v59 }
 0x41d   :  { %v3695_v48 = vmax.f32 %v3679_v44, 0.0  ;;  %v3696_v4 = vmax.f32 %v3680_v30, 0.0  ;;  %v3756_v61 = vrot.slane %v7462_v40, 2  ;;  %v3804_v62 = vrot.slane %v7462_v40, 6 }
 0x41f   :  { %v3709_v42 = vmax.f32 %v3695_v48, %v3696_v4 }
 0x420   :  { %v3611_v23 = vpop.f32.mrf.mxu2  ;;  %v3640_v15 = vpop.f32.mrf.mxu3 }
 0x421   :  { %v3725_v27 = vrot.slane %v3709_v42, 1  ;;  %v3659_v49 = vadd.f32 %v3611_v23, %v3468_v1  ;;  %v3660_v31 = vadd.f32 %v3640_v15, %v3469_v11  ;;  %v3235_v11 = vadd.f32 %v7427_v13, %v7409_v60 }
 0x423   :  { %v7466_v35 = vmax.f32 %v3709_v42, %v3725_v27  ;;  %v3681_v28 = vadd.f32 %v7438_v2, %v3659_v49  ;;  %v3682_v39 = vadd.f32 %v7440_v7, %v3660_v31  ;;  %v3428_v27 = vpop.f32.mrf.mxu0  ;;  %v3457_v49 = vpop.f32.mrf.mxu1 }
 0x424   :  { %v3475_v60 = vadd.f32 %v3457_v49, %v3236_v33  ;;  %v4947_v33 = vld [vmem:[#allocation2 + $0x28] sm:$0xff]  ;;  %v4945_v49 = vld [vmem:[#allocation2 + $0x18] sm:$0xff] }
 0x425   :  { %v3697_v38 = vmax.f32 %v3681_v28, 0.0  ;;  %v3698_v14 = vmax.f32 %v3682_v39, 0.0  ;;  %v3757_v6 = vrot.slane %v7466_v35, 2  ;;  %v3474_v28 = vadd.f32 %v3428_v27, %v3235_v11  ;;  %v4956_v11 = vld [vmem:[#allocation2 + $0x70] sm:$0xff]  ;;  %v4954_v27 = vld [vmem:[#allocation2 + $0x60] sm:$0xff] }
 0x427   :  { %v3710_v50 = vmax.f32 %v3697_v38, %v3698_v14  ;;  %v4979_v26 = vpack.i.bf16 %v3757_v6, %v3756_v61  ;;  %v3237_v14 = vadd.f32 %v7431_v21, %v7413_v18  ;;  %v3238_v61 = vadd.f32 %v7433_v19, %v7415_v16 }
 0x428   :  { %v3614_v57 = vpop.f32.mrf.mxu2  ;;  %v3643_v47 = vpop.f32.mrf.mxu3 }
 0x429   :  { %v3726_v24 = vrot.slane %v3710_v50, 1  ;;  %v3661_v22 = vadd.f32 %v3614_v57, %v3470_v58  ;;  %v3662_v17 = vadd.f32 %v3643_v47, %v3471_v25  ;;  %4980 = vrot.lane.b32.xlu0 %v4979_v26, %s5099_s25  ;;  %v3805_v47 = vrot.slane %v7466_v35, 6 }
 0x42b   :  { %v7479_v36 = vmax.f32 %v3710_v50, %v3726_v24  ;;  %v3683_v45 = vadd.f32 %v7438_v2, %v3661_v22  ;;  %v3684_v29 = vadd.f32 %v7440_v7, %v3662_v17  ;;  %v3430_v24 = vpop.f32.mrf.mxu0  ;;  %v3459_v22 = vpop.f32.mrf.mxu1 }
 0x42c   :  { %v3476_v10 = vadd.f32 %v3430_v24, %v3237_v14  ;;  %v3477_v18 = vadd.f32 %v3459_v22, %v3238_v61 }
 0x42d   :  { %v3699_v5 = vmax.f32 %v3683_v45, 0.0  ;;  %v3700_v37 = vmax.f32 %v3684_v29, 0.0  ;;  %v3806_v41 = vrot.slane %v7479_v36, 6  ;;  %v3758_v46 = vrot.slane %v7479_v36, 2 }
 0x42f   :  { %v3711_v32 = vmax.f32 %v3699_v5, %v3700_v37  ;;  %v4989_v44 = vpack.i.bf16 %v3806_v41, %v3803_v0  ;;  %v4984_v30 = vpack.i.bf16 %v3758_v46, %v3755_v51 }
 0x430   :  { %v3616_v52 = vpop.f32.mrf.mxu2  ;;  %v3645_v48 = vpop.f32.mrf.mxu3 }
 0x431   :  { %v3727_v4 = vrot.slane %v3711_v32, 1  ;;  %v3663_v42 = vadd.f32 %v3616_v52, %v3472_v9  ;;  %v3664_v1 = vadd.f32 %v3645_v48, %v3473_v53  ;;  %4990 = vrot.lane.b32.xlu2 %v4989_v44, %s5099_s25  ;;  %4985 = vrot.lane.b32.xlu0 %v4984_v30, %s5099_s25 }
 0x433   :  { %v7493_v63 = vmax.f32 %v3711_v32, %v3727_v4  ;;  %v3685_v23 = vadd.f32 %v7438_v2, %v3663_v42  ;;  %v3686_v15 = vadd.f32 %v7440_v7, %v3664_v1  ;;  %v4949_v4 = vld [vmem:[#allocation2 + $0x38] sm:$0xff]  ;;  %v4948_v1 = vld [vmem:[#allocation2 + $0x30] sm:$0xff] }
 0x434   :  { %v4957_v42 = vld [vmem:[#allocation2 + $0x78] sm:$0xff]  ;;  %4071 = vmatpush.bf16.msra.mxu0 %v4949_v4 }
 0x435   :  { %v3701_v31 = vmax.f32 %v3685_v23, 0.0  ;;  %v3702_v55 = vmax.f32 %v3686_v15, 0.0  ;;  %v3759_v12 = vrot.slane %v7493_v63, 2  ;;  %v3807_v41 = vrot.slane %v7493_v63, 6  ;;  %4084 = vmatpush.bf16.msra.mxu1 %v4957_v42  ;;  %v4955_v23 = vld [vmem:[#allocation2 + $0x68] sm:$0xff]  ;;  %v4946_v15 = vld [vmem:[#allocation2 + $0x20] sm:$0xff] }
 0x437   :  { %v3712_v56 = vmax.f32 %v3701_v31, %v3702_v55  ;;  %v4994_v13 = vpack.i.bf16 %v3759_v12, %v3804_v62  ;;  %v4953_v31 = vld [vmem:[#allocation2 + $0x58] sm:$0xff]  ;;  %v4944_v55 = vld [vmem:[#allocation2 + $0x10] sm:$0xff]  ;;  %v4943_v62 = vld [vmem:[#allocation2 + $0x8] sm:$0xff] }
 0x438   :  { %v3619_v39 = vpop.f32.mrf.mxu2  ;;  %v3648_v3 = vpop.f32.mrf.mxu3  ;;  %4072 = vmatpush.bf16.msra.mxu0 %v4948_v1  ;;  %v4952_v12 = vld [vmem:[#allocation2 + $0x50] sm:$0xff] }
 0x439   :  { %v3728_v43 = vrot.slane %v3712_v56, 1  ;;  %v3665_v8 = vadd.f32 %v3619_v39, %v3474_v28  ;;  %v3666_v38 = vadd.f32 %v3648_v3, %v3475_v60  ;;  %4995 = vrot.lane.b32.xlu1 %v4994_v13, %s5099_s25  ;;  %4085 = vmatpush.bf16.msra.mxu1 %v4956_v11 }
 0x43b   :  { %v7504_v6 = vmax.f32 %v3712_v56, %v3728_v43  ;;  %v3687_v50 = vadd.f32 %v7438_v2, %v3665_v8  ;;  %v3688_v58 = vadd.f32 %v7440_v7, %v3666_v38  ;;  %v4951_v56 = vld [vmem:[#allocation2 + $0x48] sm:$0xff]  ;;  %v4942_v43 = vld [vmem:[#allocation2] sm:$0xff] }
 0x43c   :  { %4073 = vmatpush.bf16.msra.mxu0 %v4947_v33  ;;  %v4950_v8 = vld [vmem:[#allocation2 + $0x40] sm:$0xff] }
 0x43d   :  { %v3703_v25 = vmax.f32 %v3687_v50, 0.0  ;;  %v3704_v26 = vmax.f32 %v3688_v58, 0.0  ;;  %v3760_v57 = vrot.slane %v7504_v6, 2  ;;  %4086 = vmatpush.bf16.msra.mxu1 %v4955_v23 }
 0x43f   :  { %v3713_v17 = vmax.f32 %v3703_v25, %v3704_v26  ;;  %v4999_v21 = vpack.i.bf16 %v3760_v57, %v3805_v47  ;;  %v3788_v57 = vrot.slane %v7462_v40, 4  ;;  %v4965_v47 = vld [vmem:[#allocation4 + $0x38] sm:$0xff] }
 0x440   :  { %v3621_v59 = vpop.f32.mrf.mxu2  ;;  %v3650_v16 = vpop.f32.mrf.mxu3  ;;  %4074 = vmatpush.bf16.msra.mxu0 %v4946_v15  ;;  %4167 = vmatpush.bf16.msra.mxu2 %v4965_v47 }
 0x441   :  { %v3729_v19 = vrot.slane %v3713_v17, 1  ;;  %v3667_v45 = vadd.f32 %v3621_v59, %v3476_v10  ;;  %v3668_v29 = vadd.f32 %v3650_v16, %v3477_v18  ;;  %5000 = vrot.lane.b32.xlu1 %v4999_v21, %s5099_s25  ;;  %4087 = vmatpush.bf16.msra.mxu1 %v4954_v27  ;;  %v3789_v10 = vrot.slane %v7466_v35, 4 }
 0x442   :  { %v3791_v27 = vrot.slane %v7493_v63, 4 }
 0x443   :  { %v7511_v54 = vmax.f32 %v3713_v17, %v3729_v19  ;;  %v3689_v20 = vadd.f32 %v7438_v2, %v3667_v45  ;;  %v3690_v0 = vadd.f32 %v7440_v7, %v3668_v29  ;;  %v3808_v7 = vrot.slane %v7504_v6, 6  ;;  %v4964_v45 = vld [vmem:[#allocation4 + $0x30] sm:$0xff] }
 0x444   :  { %4075 = vmatpush.bf16.msra.mxu0 %v4945_v49  ;;  %4168 = vmatpush.bf16.msra.mxu2 %v4964_v45  ;;  %v4962_v49 = vld [vmem:[#allocation4 + $0x20] sm:$0xff] }
 0x445   :  { %v3705_v51 = vmax.f32 %v3689_v20, 0.0  ;;  %v3706_v5 = vmax.f32 %v3690_v0, 0.0  ;;  %v3761_v37 = vrot.slane %v7511_v54, 2  ;;  %v3809_v44 = vrot.slane %v7511_v54, 6  ;;  %4088 = vmatpush.bf16.msra.mxu1 %v4953_v31 }
 0x446   :  { %v3787_v0 = vrot.slane %v7472_v34, 4 }
 0x447   :  { %v3714_v46 = vmax.f32 %v3705_v51, %v3706_v5  ;;  %v5004_v9 = vpack.i.bf16 %v3807_v41, %v3761_v37 }
 0x448   :  { %4076 = vmatpush.bf16.msra.mxu0 %v4944_v55 }
 0x449   :  { %v3730_v32 = vrot.slane %v3714_v46, 1  ;;  %5005 = vrot.lane.b32.xlu2 %v5004_v9, %s5099_s25  ;;  %4089 = vmatpush.bf16.msra.mxu1 %v4952_v12 }
 0x44b   :  { %v7518_v53 = vmax.f32 %v3714_v46, %v3730_v32 }
 0x44c   :  { %4077 = vmatpush.bf16.msra.mxu0 %v4943_v62 }
 0x44d   :  { %v3810_v30 = vrot.slane %v7518_v53, 6  ;;  %v3762_v2 = vrot.slane %v7518_v53, 2  ;;  %4090 = vmatpush.bf16.msra.mxu1 %v4951_v56 }
 0x44f   :  { %v5014_v52 = vpack.i.bf16 %v3810_v30, %v3809_v44  ;;  %v5009_v48 = vpack.i.bf16 %v3808_v7, %v3762_v2  ;;  %v4963_v44 = vld [vmem:[#allocation4 + $0x28] sm:$0xff] }
 0x450   :  { %4078 = vmatpush.bf16.msra.mxu0 %v4942_v43  ;;  %4169 = vmatpush.bf16.msra.mxu2 %v4963_v44 }
 0x451   :  { %5015 = vrot.lane.b32.xlu1 %v5014_v52, %s5099_s25  ;;  %5010 = vrot.lane.b32.xlu0 %v5009_v48, %s5099_s25 }
 0x452   :  { %4091 = vmatpush.bf16.msra.mxu1 %v4950_v8  ;;  %v3792_v8 = vrot.slane %v7504_v6, 4 }
 0x454   :  { %4170 = vmatpush.bf16.msra.mxu2 %v4962_v49 }
 0x48b   :  { %v4991_v38 = vpop.permute.xlu2 %4990 }
 0x48c   :  { %v4993_v24 = vunpack.i.h.bf16 %v4991_v38  ;;  %v4992_v29 = vunpack.i.l.bf16 %v4991_v38  ;;  %v4961_v38 = vld [vmem:[#allocation4 + $0x18] sm:$0xff] }
 0x48d   :  { %4171 = vmatpush.bf16.msra.mxu2 %v4961_v38  ;;  %v4966_v38 = vld [vmem:[#allocation6] sm:$0xff] }
 0x49b   :  { %v4981_v28 = vpop.permute.xlu0 %4980 }
 0x49c   :  { %v4982_v39 = vunpack.i.l.bf16 %v4981_v28  ;;  %v4983_v14 = vunpack.i.h.bf16 %v4981_v28 }
 0x49e   :  { %v3837_v61 = vsel %vm3835_vm0, %v7462_v40, %v4982_v39  ;;  %v3838_v22 = vsel %vm3835_vm0, %v7466_v35, %v4983_v14  ;;  %v3790_v40 = vrot.slane %v7479_v36, 4 }
 0x49f   :  { %v3854_v17 = vpack.c.bf16 %v3837_v61, %v3837_v61  ;;  %v3856_v51 = vpack.c.bf16 %v3838_v22, %v3838_v22 }
 0x4a0   :  { %v3847_v37 = vsel %vm3835_vm0, %v3790_v40, %v4993_v24 }
 0x4a1   :  { %v3922_v41 = vunpack.c.l.b16 %v3854_v17  ;;  %v3859_v52 = vpack.c.bf16 %v3847_v37, %v3847_v37  ;;  %v3924_v48 = vunpack.c.l.b16 %v3856_v51 }
 0x4a3   :  { %v4986_v60 = vpop.permute.xlu0 %4985  ;;  %v5006_v46 = vpop.permute.xlu2 %5005  ;;  %v3936_v1 = vrot.slane %v3922_v41, 7  ;;  %v3927_v62 = vunpack.c.l.b16 %v3859_v52  ;;  %v3939_v56 = vrot.slane %v3924_v48, 6 }
 0x4a4   :  { %v4987_v3 = vunpack.i.l.bf16 %v4986_v60  ;;  %v4988_v50 = vunpack.i.h.bf16 %v4986_v60  ;;  %v5008_v4 = vunpack.i.h.bf16 %v5006_v46  ;;  %v5007_v42 = vunpack.i.l.bf16 %v5006_v46 }
 0x4a6   :  { %v3836_v25 = vsel %vm3835_vm0, %v7472_v34, %v4987_v3  ;;  %v3839_v21 = vsel %vm3835_vm0, %v7479_v36, %v4988_v50  ;;  %v3844_v34 = vsel %vm3835_vm0, %v3787_v0, %v4992_v29  ;;  %v3848_v28 = vsel %vm3835_vm0, %v3791_v27, %v5008_v4 }
 0x4a7   :  { %v3852_v20 = vpack.c.bf16 %v3836_v25, %v3836_v25  ;;  %v3858_v9 = vpack.c.bf16 %v3839_v21, %v3839_v21  ;;  %v3853_v15 = vpack.c.bf16 %v3844_v34, %v3844_v34  ;;  %v3842_v60 = vsel %vm3835_vm0, %v7511_v54, %v5007_v42 }
 0x4a8   :  { %v3861_v14 = vpack.c.bf16 %v3848_v28, %v3848_v28  ;;  %v3864_v61 = vpack.c.bf16 %v3842_v60, %v3842_v60  ;;  %v3961_v25 = vrot.slane %v3927_v62, 5  ;;  %v4971_v62 = vld [vmem:[#allocation6 + $0x28] sm:$0xff]  ;;  %v4969_v28 = vld [vmem:[#allocation6 + $0x18] sm:$0xff]  ;;  %v4968_v60 = vld [vmem:[#allocation6 + $0x10] sm:$0xff] }
 0x4a9   :  { %v3920_v30 = vunpack.c.l.b16 %v3852_v20  ;;  %v3926_v11 = vunpack.c.l.b16 %v3858_v9  ;;  %v3921_v43 = vunpack.c.l.b16 %v3853_v15 }
 0x4aa   :  { %v3932_v45 = vunpack.c.l.b16 %v3864_v61 }
 0x4ab   :  { %v4996_v13 = vpop.permute.xlu1 %4995  ;;  %v3938_v31 = vsel %vm3937_vm4, %v3936_v1, %v3920_v30 }
 0x4ac   :  { %v4997_v58 = vunpack.i.l.bf16 %v4996_v13  ;;  %v4998_v26 = vunpack.i.h.bf16 %v4996_v13  ;;  %v3942_v13 = vrot.slane %v3926_v11, 5 }
 0x4ae   :  { %v3845_v59 = vsel %vm3835_vm0, %v3788_v57, %v4997_v58  ;;  %v3840_v35 = vsel %vm3835_vm0, %v7493_v63, %v4998_v26  ;;  %v3941_v63 = vsel %vm3940_vm5, %v3939_v56, %v3938_v31  ;;  %v3793_v26 = vrot.slane %v7511_v54, 4  ;;  %v4958_v31 = vld [vmem:[#allocation4] sm:$0xff] }
 0x4af   :  { %v3855_v32 = vpack.c.bf16 %v3845_v59, %v3845_v59  ;;  %v3860_v2 = vpack.c.bf16 %v3840_v35, %v3840_v35  ;;  %v3794_v57 = vrot.slane %v7518_v53, 4  ;;  %v3944_v47 = vsel %vm3943_vm6, %v3942_v13, %v3941_v63  ;;  %v4970_v56 = vld [vmem:[#allocation6 + $0x20] sm:$0xff] }
 0x4b0   :  { %v5019_v13 = vld [vmem:[%s7588_s6] ss:$0 sm:$0xff] }
 0x4b1   :  { %v3923_v33 = vunpack.c.l.b16 %v3855_v32  ;;  %v3928_v55 = vunpack.c.l.b16 %v3860_v2  ;;  %v4959_v32 = vld [vmem:[#allocation4 + $0x8] sm:$0xff] }
 0x4b3   :  { %v5001_v18 = vpop.permute.xlu1 %5000  ;;  %v3957_v39 = vrot.slane %v3923_v33, 7  ;;  %v3945_v50 = vrot.slane %v3928_v55, 4  ;;  %v4973_v55 = vld [vmem:[#allocation6 + $0x38] sm:$0xff] }
 0x4b4   :  { %v5003_v16 = vunpack.i.h.bf16 %v5001_v18  ;;  %v5002_v19 = vunpack.i.l.bf16 %v5001_v18  ;;  %4250 = vmatpush.bf16.msra.mxu3 %v4973_v55 }
 0x4b5   :  { %v3958_v24 = vsel %vm3937_vm4, %v3957_v39, %v3921_v43  ;;  %v3947_v54 = vsel %vm3946_vm7, %v3945_v50, %v3944_v47 }
 0x4b6   :  { %v3846_v5 = vsel %vm3835_vm0, %v3789_v10, %v5002_v19  ;;  %v3841_v36 = vsel %vm3835_vm0, %v7504_v6, %v5003_v16  ;;  %v4960_v16 = vld [vmem:[#allocation4 + $0x10] sm:$0xff]  ;;  %v3929_v19 = vunpack.c.l.b16 %v3861_v14 }
 0x4b7   :  { %v3857_v7 = vpack.c.bf16 %v3846_v5, %v3846_v5  ;;  %v3862_v23 = vpack.c.bf16 %v3841_v36, %v3841_v36  ;;  %4172 = vmatpush.bf16.msra.mxu2 %v4960_v16 }
 0x4b8   :  { %v3963_v2 = vrot.slane %v3929_v19, 4 }
 0x4b9   :  { %v3925_v12 = vunpack.c.l.b16 %v3857_v7  ;;  %v3930_v3 = vunpack.c.l.b16 %v3862_v23  ;;  %v3951_v7 = vrot.slane %v3932_v45, 2 }
 0x4bb   :  { %v3959_v58 = vrot.slane %v3925_v12, 6  ;;  %v3948_v22 = vrot.slane %v3930_v3, 3  ;;  %4173 = vmatpush.bf16.msra.mxu2 %v4959_v32  ;;  %v4972_v12 = vld [vmem:[#allocation6 + $0x30] sm:$0xff]  ;;  %v4967_v3 = vld [vmem:[#allocation6 + $0x8] sm:$0xff] }
 0x4bc   :  { %4251 = vmatpush.bf16.msra.mxu3 %v4972_v12 }
 0x4bd   :  { %v3960_v40 = vsel %vm3940_vm5, %v3959_v58, %v3958_v24  ;;  %v3950_v46 = vsel %vm3949_vm8, %v3948_v22, %v3947_v54 }
 0x4be   :  { %v3962_v9 = vsel %vm3943_vm6, %v3961_v25, %v3960_v40  ;;  %v3953_v42 = vsel %vm3952_vm9, %v3951_v7, %v3950_v46  ;;  %v5020_v25 = vld [vmem:[%s7590_s8] ss:$0 sm:$0xff] }
 0x4bf   :  { %v3964_v4 = vsel %vm3946_vm7, %v3963_v2, %v3962_v9  ;;  %4174 = vmatpush.bf16.msra.mxu2 %v4958_v31 }
 0x4c0   :  { %4252 = vmatpush.bf16.msra.mxu3 %v4971_v62 }
 0x4c3   :  { %v5016_v17 = vpop.permute.xlu1 %5015  ;;  %v5011_v6 = vpop.permute.xlu0 %5010 }
 0x4c4   :  { %v5018_v10 = vunpack.i.h.bf16 %v5016_v17  ;;  %v5017_v18 = vunpack.i.l.bf16 %v5016_v17  ;;  %v5013_v21 = vunpack.i.h.bf16 %v5011_v6  ;;  %v5012_v59 = vunpack.i.l.bf16 %v5011_v6  ;;  %4253 = vmatpush.bf16.msra.mxu3 %v4970_v56  ;;  %v5021_v17 = vld [vmem:[%s7592_s10] ss:$0 sm:$0xff] }
 0x4c6   :  { %v3851_v29 = vsel %vm3835_vm0, %v3794_v57, %v5018_v10  ;;  %v3850_v20 = vsel %vm3835_vm0, %v3793_v26, %v5017_v18  ;;  %v3849_v0 = vsel %vm3835_vm0, %v3792_v8, %v5013_v21  ;;  %v3843_v51 = vsel %vm3835_vm0, %v7518_v53, %v5012_v59 }
 0x4c7   :  { %v3867_v35 = vpack.c.bf16 %v3851_v29, %v3851_v29  ;;  %v3865_v5 = vpack.c.bf16 %v3850_v20, %v3850_v20  ;;  %v3863_v37 = vpack.c.bf16 %v3849_v0, %v3849_v0  ;;  %v3866_v41 = vpack.c.bf16 %v3843_v51, %v3843_v51 }
 0x4c8   :  { %4254 = vmatpush.bf16.msra.mxu3 %v4969_v28 }
 0x4c9   :  { %v3935_v36 = vunpack.c.l.b16 %v3867_v35  ;;  %v3933_v44 = vunpack.c.l.b16 %v3865_v5  ;;  %v3931_v34 = vunpack.c.l.b16 %v3863_v37  ;;  %v3934_v30 = vunpack.c.l.b16 %v3866_v41 }
 0x4cb   :  { %v3967_v52 = vrot.slane %v3933_v44, 2  ;;  %v3965_v53 = vrot.slane %v3931_v34, 3  ;;  %v3954_v48 = vrot.slane %v3934_v30, 1  ;;  %v3969_v1 = vrot.slane %v3935_v36, 1 }
 0x4cc   :  { %4255 = vmatpush.bf16.msra.mxu3 %v4968_v60 }
 0x4cd   :  { %v3966_v11 = vsel %vm3949_vm8, %v3965_v53, %v3964_v4  ;;  %v3956_v33 = vsel %vm3955_vm10, %v3954_v48, %v3953_v42 }
 0x4ce   :  { %v3968_v23 = vsel %vm3952_vm9, %v3967_v52, %v3966_v11  ;;  %v3971_v15 = vpack.c.b16 %v3956_v33, %v3956_v33 }
 0x4cf   :  { %v3970_v27 = vsel %vm3955_vm10, %v3969_v1, %v3968_v23 }
 0x4d0   :  { %4079 = vmatmul.bf16.vlgmr.msra.gmra.mxu0 %v3971_v15  ;;  %v3972_v49 = vpack.c.b16 %v3970_v27, %v3970_v27  ;;  %4256 = vmatpush.bf16.msra.mxu3 %v4967_v3 }
 0x4d2   :  { %4092 = vmatmul.bf16.vlgmr.msra.gmra.mxu1 %v3972_v49 }
 0x4d4   :  { %4257 = vmatpush.bf16.msra.mxu3 %v4966_v38 }
 0x54d   :  { %v4080_v39 = vpop.f32.mrf.mxu0 }
 0x54e   :  { %v4081_v43 = vadd.f32 %v5019_v13, %v4080_v39 }
 0x54f   :  { %v4093_v63 = vpop.f32.mrf.mxu1 }
 0x550   :  { %v4094_v8 = vadd.f32 %v4093_v63, %v4081_v43 }
 0x552   :  { %v4097_v14 = vmax.f32 %v4094_v8, 0.0 }
 0x554   :  { %v4098_v61 = vpack.c.bf16 %v4097_v14, %v4097_v14 }
 0x555   :  { %v4082_v50 = vpop.f32.mrf.mxu0 }
 0x556   :  { %4175 = vmatmul.bf16.vlgmr.msra.gmra.mxu2 %v4098_v61 }
 0x557   :  { %v4095_v58 = vpop.f32.mrf.mxu1 }
 0x5d9   :  { %v4176_v26 = vpop.f32.mrf.mxu2 }
 0x5da   :  { %v4177_v57 = vadd.f32 %v5020_v25, %v4176_v26 }
 0x5dc   :  { %v4180_v47 = vmax.f32 %v4177_v57, 0.0 }
 0x5de   :  { %v4181_v24 = vpack.c.bf16 %v4180_v47, %v4180_v47 }
 0x5e0   :  { %4258 = vmatmul.bf16.vlgmr.msra.gmra.mxu3 %v4181_v24 }
 0x5e1   :  { %v4178_v22 = vpop.f32.mrf.mxu2 }
 0x663   :  { %v4259_v6 = vpop.f32.mrf.mxu3 }
 0x664   :  { %v4260_v10 = vadd.f32 %v5021_v17, %v4259_v6 }
 0x666   :  { %4263 = vst [vmem:[%s7593_s11] sm:$0xff] %v4260_v10 }
 0x66b   :  { %v4261_v18 = vpop.f32.mrf.mxu3 }
 0x66c   :  { %4268 = vsyncpa [#allocation3], 1 }
 0x66d   :  { %4269 = vsyncpa [#allocation5], 1 }

</bundles_post_ra>
